<compile_context>
chip_gen: v5e
topology: v5e:2x2
jax: 0.10.0
libtpu: 0.0.40
codegen_flags: <defaults>
</compile_context>

<pallas_src>
import functools

import jax
import jax.numpy as jnp
import numpy as np
from jax.experimental import pallas as pl
from jax.experimental.pallas import tpu as pltpu


def _round_up(x: int, m: int) -> int:
    return (x + m - 1) // m * m


# Safe on every generation: v5e/v6e have 128 MiB physical VMEM, v7x has 64 MiB.
_VMEM_LIMIT_BYTES = 48 * 1024 * 1024


# ----------------------------------------------------------------------------
# index_maps (scalar-prefetch refs arrive as trailing positional args).
# ----------------------------------------------------------------------------
def _row_map(i, k, flat_ref, cid_ref, nnz_ref):
    return (i, 0)


def _lhat_map(i, k, flat_ref, cid_ref, nnz_ref):
    return (flat_ref[i, k], 0, 0)          # compacted L_hat block slot


def _col_map(i, k, flat_ref, cid_ref, nnz_ref):
    return (cid_ref[i, k], 0)              # column tile of h @ W1


def _resident_map(i, k, flat_ref, cid_ref, nnz_ref):
    return (0, 0)                          # VMEM-resident weights / bias


# ----------------------------------------------------------------------------
# Kernel 1: ChebConv layer 0 with the next layer's input projections fused
# into the epilogue (y itself never goes to HBM).
# ----------------------------------------------------------------------------
def _cheb_fused_kernel(flat_ref, cid_ref, nnz_ref,
                       xw0_ref, lhat_ref, xw1_ref, w0n_ref, w1n_ref, bn_ref,
                       xw0n_ref, xw1n_ref, acc_ref):
    i = pl.program_id(0)   # node row tile ("parallel"; sharded across v7x TensorCores)
    k = pl.program_id(1)   # index into this row tile's non-zero L_hat column tiles

    # NOTE: at k == 0 both _init and _accumulate may fire; the trace order below
    # (init before accumulate) guarantees the accumulator is seeded first.
    @pl.when(k == 0)
    def _init():
        acc_ref[...] = xw0_ref[...]                      # x @ W0 + b (precomputed, f32)

    @pl.when(k < nnz_ref[i])
    def _accumulate():
        # Padded steps (k >= nnz[i]) repeat the previous block indices -> no new DMA,
        # and the matmul is skipped entirely.
        acc_ref[...] += jnp.dot(lhat_ref[0], xw1_ref[...],
                                preferred_element_type=jnp.float32)

    @pl.when(k == pl.num_programs(1) - 1)
    def _finalize():
        y = jnp.maximum(acc_ref[...], 0.0).astype(jnp.bfloat16)      # relu(cheb0(x))
        # Fuse the next layer's projections: emit y@W0_1 + b_1 (f32 acc-init) and
        # y@W1_1 (bf16 reduction operand) so y never round-trips HBM.
        xw0n_ref[...] = (
            jnp.dot(y, w0n_ref[...], preferred_element_type=jnp.float32) + bn_ref[...]
        )
        xw1n_ref[...] = jnp.dot(
            y, w1n_ref[...], preferred_element_type=jnp.float32
        ).astype(jnp.bfloat16)


# ----------------------------------------------------------------------------
# Kernel 2: ChebConv layer 1, accumulating directly into the f32 output block
# (constant block index over k), with fused relu + (x + y) / 2 epilogue.
# ----------------------------------------------------------------------------
def _cheb_residual_kernel(flat_ref, cid_ref, nnz_ref,
                          xw0_ref, lhat_ref, xw1_ref, res_ref,
                          out_ref):
    i = pl.program_id(0)
    k = pl.program_id(1)

    @pl.when(k == 0)
    def _init():
        out_ref[...] = xw0_ref[...]                      # y1 @ W0 + b (from layer-0 epilogue)

    @pl.when(k < nnz_ref[i])
    def _accumulate():
        out_ref[...] += jnp.dot(lhat_ref[0], xw1_ref[...],
                                preferred_element_type=jnp.float32)

    @pl.when(k == pl.num_programs(1) - 1)
    def _finalize():
        y = jnp.maximum(out_ref[...], 0.0)
        out_ref[...] = (res_ref[...].astype(jnp.float32) + y) * 0.5


# ----------------------------------------------------------------------------
# pallas_call wrappers.
# ----------------------------------------------------------------------------
def _cheb_layer0_pass(flat, cid, nnz, xw0, lhat_tiles, xw1, w0n, w1n, bn, *,
                      tile_m, tile_k):
    n_pad_rows, c_pad = xw0.shape
    n_row_tiles = n_pad_rows // tile_m
    max_nnz = flat.shape[1]

    grid_spec = pltpu.PrefetchScalarGridSpec(
        num_scalar_prefetch=3,
        grid=(n_row_tiles, max_nnz),
        in_specs=[
            pl.BlockSpec((tile_m, c_pad), _row_map),        # x@W0 + b   (f32, acc init)
            pl.BlockSpec((1, tile_m, tile_k), _lhat_map),   # compacted L_hat (bf16)
            pl.BlockSpec((tile_k, c_pad), _col_map),        # x@W1       (bf16, streamed)
            pl.BlockSpec((c_pad, c_pad), _resident_map),    # W0_next    (bf16, resident)
            pl.BlockSpec((c_pad, c_pad), _resident_map),    # W1_next    (bf16, resident)
            pl.BlockSpec((1, c_pad), _resident_map),        # b_next     (f32, resident)
        ],
        out_specs=[
            pl.BlockSpec((tile_m, c_pad), _row_map),        # y@W0_next + b_next (f32)
            pl.BlockSpec((tile_m, c_pad), _row_map),        # y@W1_next          (bf16)
        ],
        scratch_shapes=[pltpu.VMEM((tile_m, c_pad), jnp.float32)],
    )
    return pl.pallas_call(
        _cheb_fused_kernel,
        out_shape=(jax.ShapeDtypeStruct((n_pad_rows, c_pad), jnp.float32),
                   jax.ShapeDtypeStruct((n_pad_rows, c_pad), jnp.bfloat16)),
        grid_spec=grid_spec,
        compiler_params=pltpu.CompilerParams(
            dimension_semantics=("parallel", "arbitrary"),
            vmem_limit_bytes=_VMEM_LIMIT_BYTES),
    )(flat, cid, nnz, xw0, lhat_tiles, xw1, w0n, w1n, bn)


def _cheb_residual_pass(flat, cid, nnz, xw0, lhat_tiles, xw1, residual_bf16, *,
                        tile_m, tile_k):
    n_pad_rows, c_pad = xw0.shape
    n_row_tiles = n_pad_rows // tile_m
    max_nnz = flat.shape[1]

    grid_spec = pltpu.PrefetchScalarGridSpec(
        num_scalar_prefetch=3,
        grid=(n_row_tiles, max_nnz),
        in_specs=[
            pl.BlockSpec((tile_m, c_pad), _row_map),        # y1@W0 + b  (f32, acc init)
            pl.BlockSpec((1, tile_m, tile_k), _lhat_map),   # compacted L_hat (bf16)
            pl.BlockSpec((tile_k, c_pad), _col_map),        # y1@W1      (bf16, streamed)
            pl.BlockSpec((tile_m, c_pad), _row_map),        # residual x (bf16)
        ],
        out_specs=pl.BlockSpec((tile_m, c_pad), _row_map),  # accumulated in place (f32)
        scratch_shapes=[],
    )
    return pl.pallas_call(
        _cheb_residual_kernel,
        out_shape=jax.ShapeDtypeStruct((n_pad_rows, c_pad), jnp.float32),
        grid_spec=grid_spec,
        compiler_params=pltpu.CompilerParams(
            dimension_semantics=("parallel", "arbitrary"),
            vmem_limit_bytes=_VMEM_LIMIT_BYTES),
    )(flat, cid, nnz, xw0, lhat_tiles, xw1, residual_bf16)


# ----------------------------------------------------------------------------
# Host-side (numpy) graph preprocessing: compacted scaled-Laplacian blocks and
# per-row-tile block-sparsity metadata.  Runs OUTSIDE jit so max_nnz is concrete.
# ----------------------------------------------------------------------------
def _build_lhat_tiles(edge_index, n, tile_m, tile_k, n_pad_rows, n_pad_cols):
    edge_index = np.asarray(edge_index)
    src = edge_index[0].astype(np.int64)
    dst = edge_index[1].astype(np.int64)

    deg = np.zeros((n,), np.float64)
    np.add.at(deg, dst, 1.0)                    # duplicate edges accumulate (matches PyG)
    # TODO(synk): PyG ChebConv with normalization=None expects an explicit/true
    # lambda_max; we use the 2*max_degree spectral upper bound of L.
    lam_max = 2.0 * max(float(deg.max()) if n > 0 else 1.0, 1.0)
    scale = 2.0 / lam_max

    n_row_tiles = n_pad_rows // tile_m
    n_col_tiles = n_pad_cols // tile_k
    nodes = np.arange(n, dtype=np.int64)

    e_pair = (dst // tile_m) * n_col_tiles + (src // tile_k)
    d_pair = (nodes // tile_m) * n_col_tiles + (nodes // tile_k)
    uniq = np.unique(np.concatenate([e_pair, d_pair]))
    num_tiles = max(int(uniq.shape[0]), 1)

    tiles = np.zeros((num_tiles, tile_m, tile_k), np.float32)
    if uniq.shape[0] > 0:
        e_slot = np.searchsorted(uniq, e_pair)
        d_slot = np.searchsorted(uniq, d_pair)
        np.add.at(tiles, (e_slot, dst % tile_m, src % tile_k), np.float32(-scale))
        np.add.at(tiles, (d_slot, nodes % tile_m, nodes % tile_k),
                  (scale * deg - 1.0).astype(np.float32))

    # Per-row-tile metadata.  uniq is sorted, so each row tile's blocks are contiguous.
    uniq_r = (uniq // n_col_tiles).astype(np.int64)
    uniq_c = (uniq % n_col_tiles).astype(np.int32)
    nnz = np.bincount(uniq_r, minlength=n_row_tiles).astype(np.int32)
    max_nnz = max(int(nnz.max()) if nnz.size else 1, 1)

    flat = np.zeros((n_row_tiles, max_nnz), np.int32)
    cid = np.zeros((n_row_tiles, max_nnz), np.int32)
    offsets = np.concatenate([[0], np.cumsum(nnz)]).astype(np.int64)
    for r in range(n_row_tiles):
        lo, hi = int(offsets[r]), int(offsets[r + 1])
        if hi > lo:
            slots = np.arange(lo, hi, dtype=np.int32)
            cols = uniq_c[lo:hi]
            flat[r, : hi - lo] = slots
            cid[r, : hi - lo] = cols
            # Padded steps repeat the last valid block -> no new DMA; matmul skipped.
            flat[r, hi - lo:] = slots[-1]
            cid[r, hi - lo:] = cols[-1]
        # else: fully-padded row tile; stays (0, 0); nnz==0 skips the matmul anyway.
    return tiles, flat, cid, nnz


# ----------------------------------------------------------------------------
# Jitted forward over the preprocessed graph.
# ----------------------------------------------------------------------------
@functools.partial(jax.jit, static_argnames=("tile_m", "tile_k"))
def _forward(x, params, lhat_tiles, flat, cid, nnz, *, tile_m, tile_k):
    n, c_in = x.shape
    (w0_0, w1_0, b_0), (w0_1, w1_1, b_1) = params
    c_out = w0_0.shape[1]
    c_pad = _round_up(c_out, 128)
    n_pad_rows = _round_up(n, tile_m)
    n_pad_cols = _round_up(n, tile_k)

    def pad_w(w):
        return jnp.zeros((c_pad, c_pad), jnp.float32).at[:w.shape[0], :w.shape[1]].set(w)

    def pad_b(b):
        return jnp.zeros((1, c_pad), jnp.float32).at[0, :b.shape[-1]].set(b.reshape(-1))

    w0_0p, w1_0p, b_0p = pad_w(w0_0), pad_w(w1_0), pad_b(b_0)
    w0_1p, w1_1p, b_1p = pad_w(w0_1), pad_w(w1_1), pad_b(b_1)

    x_rows = jnp.zeros((n_pad_rows, c_pad), jnp.float32).at[:n, :c_in].set(x)
    if n_pad_cols <= n_pad_rows:
        x_cols = x_rows[:n_pad_cols]
    else:
        x_cols = jnp.zeros((n_pad_cols, c_pad), jnp.float32).at[:n_pad_rows].set(x_rows)

    # Tiny N x C x C glue matmuls (negligible vs L_hat streaming).
    xw0_0 = x_rows @ w0_0p + b_0p                       # f32 accumulator init tiles
    xw1_0 = (x_cols @ w1_0p).astype(jnp.bfloat16)       # bf16 reduction operand

    # Layer 0 (+ fused next-layer projections in the epilogue).
    xw0_1, xw1_1_rows = _cheb_layer0_pass(
        flat, cid, nnz, xw0_0, lhat_tiles, xw1_0,
        w0_1p.astype(jnp.bfloat16), w1_1p.astype(jnp.bfloat16), b_1p,
        tile_m=tile_m, tile_k=tile_k)

    # Re-shape the streamed operand to the column-tile padding (rows beyond n are zero).
    if n_pad_cols <= n_pad_rows:
        xw1_1 = xw1_1_rows[:n_pad_cols]
    else:
        xw1_1 = jnp.zeros((n_pad_cols, c_pad), jnp.bfloat16).at[:n_pad_rows].set(xw1_1_rows)

    # Layer 1: accumulate into the output block, fused relu + (x + y)/2 epilogue.
    out_pad = _cheb_residual_pass(
        flat, cid, nnz, xw0_1, lhat_tiles, xw1_1, x_rows.astype(jnp.bfloat16),
        tile_m=tile_m, tile_k=tile_k)

    return out_pad[:n, :c_out]


# ----------------------------------------------------------------------------
# Public forward: GraphResBlock.  Call OUTSIDE jit (graph preprocessing is host-side).
# ----------------------------------------------------------------------------
def graph_res_block(x, edge_index, params, *, tile_m=1024, tile_k=256):
    """params = ((W0_0, W1_0, b_0), (W0_1, W1_1, b_1)), each W is [C_in, C_out]."""
    assert tile_m % 8 == 0 and tile_k % 128 == 0
    n, c_in = x.shape
    c_out = params[0][0].shape[1]
    assert c_in == c_out, "GraphResBlock residual requires in_channels == out_channels"

    n_pad_rows = _round_up(n, tile_m)
    n_pad_cols = _round_up(n, tile_k)

    tiles_np, flat_np, cid_np, nnz_np = _build_lhat_tiles(
        edge_index, n, tile_m, tile_k, n_pad_rows, n_pad_cols)

    # NOTE(v7x): the row-tile ("parallel") axis is sharded across both TensorCores;
    # keep n_pad_rows/tile_m even for balanced megacore work where possible.
    lhat_tiles = jnp.asarray(tiles_np, dtype=jnp.bfloat16)
    flat = jnp.asarray(flat_np)
    cid = jnp.asarray(cid_np)
    nnz = jnp.asarray(nnz_np)

    return _forward(x, params, lhat_tiles, flat, cid, nnz, tile_m=tile_m, tile_k=tile_k)


# ----------------------------------------------------------------------------
# Pure-JAX reference (sanity check against the kernel).
# ----------------------------------------------------------------------------
def _reference(x, edge_index, params):
    n = x.shape[0]
    src, dst = edge_index[0], edge_index[1]
    adj = jnp.zeros((n, n), jnp.float32).at[dst, src].add(1.0)
    deg = jnp.sum(adj, axis=1)
    lam_max = 2.0 * jnp.maximum(jnp.max(deg), 1.0)
    lhat = (2.0 / lam_max) * (jnp.diag(deg) - adj) - jnp.eye(n, dtype=jnp.float32)

    def cheb(h, w0, w1, b):
        return h @ w0 + lhat @ (h @ w1) + b.reshape(1, -1)

    y = jax.nn.relu(cheb(x, *params[0]))
    y = jax.nn.relu(cheb(y, *params[1]))
    return (x + y) / 2.0


if __name__ == "__main__":
    key = jax.random.PRNGKey(0)
    n, c = 1024, 128

    # Ring graph with 1-hop and 2-hop neighbours, plus two long-range edges so that
    # row tiles have unequal nnz (exercises the padded-step skip path).
    idx = jnp.arange(n, dtype=jnp.int32)
    dst = jnp.concatenate([(idx + 1) % n, (idx - 1) % n, (idx + 2) % n, (idx - 2) % n,
                           jnp.array([512, 0], jnp.int32)])
    src = jnp.concatenate([idx, idx, idx, idx, jnp.array([0, 512], jnp.int32)])
    edge_index = jnp.stack([src, dst]).astype(jnp.int32)

    k_x, k0, k1, k2, k3, kb0, kb1 = jax.random.split(key, 7)
    x = jax.random.normal(k_x, (n, c), jnp.float32)
    glorot = jax.nn.initializers.glorot_uniform()
    params = (
        (glorot(k0, (c, c), jnp.float32), glorot(k1, (c, c), jnp.float32),
         0.1 * jax.random.normal(kb0, (c,), jnp.float32)),
        (glorot(k2, (c, c), jnp.float32), glorot(k3, (c, c), jnp.float32),
         0.1 * jax.random.normal(kb1, (c,), jnp.float32)),
    )

    # Small tiles here so the demo exercises the multi-tile reduction, the parallel
    # row axis and the block-sparse skip path; production defaults are 1024/256.
    out = jax.block_until_ready(
        graph_res_block(x, edge_index, params, tile_m=256, tile_k=256))

    ref = _reference(x, edge_index, params)
    err = float(jnp.max(jnp.abs(out - ref)))
    assert out.shape == (n, c)
    assert err < 5e-2, f"max abs error vs reference: {err}"
    print("KERNEL_OK")
</pallas_src>

<mosaic_0001>
module attributes {stable_mosaic.version = 11 : i64} {
  func.func @_cheb_fused_kernel(%arg0: i32, %arg1: i32, %arg2: memref<4x4xi32, #tpu.memory_space<smem>>, %arg3: memref<4x4xi32, #tpu.memory_space<smem>>, %arg4: memref<4xi32, #tpu.memory_space<smem>>, %arg5: memref<256x128xf32, #tpu.memory_space<vmem>>, %arg6: memref<1x256x256xbf16, #tpu.memory_space<vmem>>, %arg7: memref<256x128xbf16, #tpu.memory_space<vmem>>, %arg8: memref<128x128xbf16, #tpu.memory_space<vmem>>, %arg9: memref<128x128xbf16, #tpu.memory_space<vmem>>, %arg10: memref<1x128xf32, #tpu.memory_space<vmem>>, %arg11: memref<256x128xf32, #tpu.memory_space<vmem>>, %arg12: memref<256x128xbf16, #tpu.memory_space<vmem>>, %arg13: memref<256x128xf32, #tpu.memory_space<vmem>>) attributes {dimension_semantics = [#tpu.dimension_semantics<parallel>, #tpu.dimension_semantics<arbitrary>], iteration_bounds = array<i64: 4, 4>, scalar_prefetch = 3 : i64, scratch_operands = 1 : i64, tpu.core_type = #tpu.core_type<tc>, window_params = [{transform_indices = @transform_0, window_bounds = array<i64: 256, 128>}, {transform_indices = @transform_1, window_bounds = array<i64: 1, 256, 256>}, {transform_indices = @transform_2, window_bounds = array<i64: 256, 128>}, {pipeline_mode = #tpu.pipeline_mode<synchronous>, transform_indices = @transform_3, window_bounds = array<i64: 128, 128>}, {pipeline_mode = #tpu.pipeline_mode<synchronous>, transform_indices = @transform_4, window_bounds = array<i64: 128, 128>}, {pipeline_mode = #tpu.pipeline_mode<synchronous>, transform_indices = @transform_5, window_bounds = array<i64: 1, 128>}, {transform_indices = @transform_6, window_bounds = array<i64: 256, 128>}, {transform_indices = @transform_7, window_bounds = array<i64: 256, 128>}]} {
    %c0_i32 = arith.constant 0 : i32
    %0 = arith.cmpi eq, %arg1, %c0_i32 : i32
    %1 = arith.extui %0 : i1 to i32
    %c0_i32_0 = arith.constant 0 : i32
    %2 = arith.cmpi ne, %1, %c0_i32_0 : i32
    scf.if %2 {
      %c0 = arith.constant 0 : index
      %c0_3 = arith.constant 0 : index
      %11 = vector.load %arg5[%c0, %c0_3] : memref<256x128xf32, #tpu.memory_space<vmem>>, vector<256x128xf32>
      %c0_4 = arith.constant 0 : index
      %c0_5 = arith.constant 0 : index
      %12 = vector.load %arg13[%c0_4, %c0_5] : memref<256x128xf32, #tpu.memory_space<vmem>>, vector<256x128xf32>
      tpu.vector_store %arg13[%c0_4, %c0_5], %11 {strides = array<i32>} : memref<256x128xf32, #tpu.memory_space<vmem>>, vector<256x128xf32>,
    } else {
    }
    %3 = arith.index_cast %arg0 : i32 to index
    %4 = memref.load %arg4[%3] : memref<4xi32, #tpu.memory_space<smem>>
    %5 = arith.cmpi slt, %arg1, %4 : i32
    %6 = arith.extui %5 : i1 to i32
    %c0_i32_1 = arith.constant 0 : i32
    %7 = arith.cmpi ne, %6, %c0_i32_1 : i32
    scf.if %7 {
      %c0 = arith.constant 0 : index
      %c0_3 = arith.constant 0 : index
      %11 = vector.load %arg13[%c0, %c0_3] : memref<256x128xf32, #tpu.memory_space<vmem>>, vector<256x128xf32>
      %c0_4 = arith.constant 0 : index
      %c0_5 = arith.constant 0 : index
      %c0_6 = arith.constant 0 : index
      %12 = vector.load %arg6[%c0_4, %c0_5, %c0_6] : memref<1x256x256xbf16, #tpu.memory_space<vmem>>, vector<1x256x256xbf16>
      %13 = vector.shape_cast %12 : vector<1x256x256xbf16> to vector<256x256xbf16>
      %c0_7 = arith.constant 0 : index
      %c0_8 = arith.constant 0 : index
      %14 = vector.load %arg7[%c0_7, %c0_8] : memref<256x128xbf16, #tpu.memory_space<vmem>>, vector<256x128xbf16>
      %cst = arith.constant dense<0.000000e+00> : vector<256x128xf32>
      %15 = tpu.matmul %13, %14, %cst {dimension_numbers = #tpu.dot_dimension_numbers<[1], [0], [0], [1], [0, 0, 1, 1], [], []>} : vector<256x256xbf16>, vector<256x128xbf16>, vector<256x128xf32> -> vector<256x128xf32>
      %16 = arith.addf %11, %15 : vector<256x128xf32>
      %c0_9 = arith.constant 0 : index
      %c0_10 = arith.constant 0 : index
      %17 = vector.load %arg13[%c0_9, %c0_10] : memref<256x128xf32, #tpu.memory_space<vmem>>, vector<256x128xf32>
      tpu.vector_store %arg13[%c0_9, %c0_10], %16 {strides = array<i32>} : memref<256x128xf32, #tpu.memory_space<vmem>>, vector<256x128xf32>,
    } else {
    }
    %c3_i32 = arith.constant 3 : i32
    %8 = arith.cmpi eq, %arg1, %c3_i32 : i32
    %9 = arith.extui %8 : i1 to i32
    %c0_i32_2 = arith.constant 0 : i32
    %10 = arith.cmpi ne, %9, %c0_i32_2 : i32
    scf.if %10 {
      %c0 = arith.constant 0 : index
      %c0_3 = arith.constant 0 : index
      %11 = vector.load %arg13[%c0, %c0_3] : memref<256x128xf32, #tpu.memory_space<vmem>>, vector<256x128xf32>
      %cst = arith.constant 0.000000e+00 : f32
      %12 = vector.broadcast %cst : f32 to vector<256x128xf32>
      %13 = arith.maximumf %11, %12 : vector<256x128xf32>
      %14 = arith.truncf %13 : vector<256x128xf32> to vector<256x128xbf16>
      %c0_4 = arith.constant 0 : index
      %c0_5 = arith.constant 0 : index
      %15 = vector.load %arg8[%c0_4, %c0_5] : memref<128x128xbf16, #tpu.memory_space<vmem>>, vector<128x128xbf16>
      %cst_6 = arith.constant dense<0.000000e+00> : vector<256x128xf32>
      %16 = tpu.matmul %14, %15, %cst_6 {dimension_numbers = #tpu.dot_dimension_numbers<[1], [0], [0], [1], [0, 0, 1, 1], [], []>} : vector<256x128xbf16>, vector<128x128xbf16>, vector<256x128xf32> -> vector<256x128xf32>
      %c0_7 = arith.constant 0 : index
      %c0_8 = arith.constant 0 : index
      %17 = vector.load %arg10[%c0_7, %c0_8] : memref<1x128xf32, #tpu.memory_space<vmem>>, vector<1x128xf32>
      %18 = vector.broadcast %17 : vector<1x128xf32> to vector<256x128xf32>
      %19 = arith.addf %16, %18 : vector<256x128xf32>
      %c0_9 = arith.constant 0 : index
      %c0_10 = arith.constant 0 : index
      %20 = vector.load %arg11[%c0_9, %c0_10] : memref<256x128xf32, #tpu.memory_space<vmem>>, vector<256x128xf32>
      tpu.vector_store %arg11[%c0_9, %c0_10], %19 {strides = array<i32>} : memref<256x128xf32, #tpu.memory_space<vmem>>, vector<256x128xf32>,
      %c0_11 = arith.constant 0 : index
      %c0_12 = arith.constant 0 : index
      %21 = vector.load %arg9[%c0_11, %c0_12] : memref<128x128xbf16, #tpu.memory_space<vmem>>, vector<128x128xbf16>
      %cst_13 = arith.constant dense<0.000000e+00> : vector<256x128xf32>
      %22 = tpu.matmul %14, %21, %cst_13 {dimension_numbers = #tpu.dot_dimension_numbers<[1], [0], [0], [1], [0, 0, 1, 1], [], []>} : vector<256x128xbf16>, vector<128x128xbf16>, vector<256x128xf32> -> vector<256x128xf32>
      %23 = arith.truncf %22 : vector<256x128xf32> to vector<256x128xbf16>
      %c0_14 = arith.constant 0 : index
      %c0_15 = arith.constant 0 : index
      %24 = vector.load %arg12[%c0_14, %c0_15] : memref<256x128xbf16, #tpu.memory_space<vmem>>, vector<256x128xbf16>
      tpu.vector_store %arg12[%c0_14, %c0_15], %23 {strides = array<i32>} : memref<256x128xbf16, #tpu.memory_space<vmem>>, vector<256x128xbf16>,
    } else {
    }
    return
  }
  func.func @transform_0(%arg0: i32, %arg1: i32, %arg2: memref<4x4xi32, #tpu.memory_space<smem>>, %arg3: memref<4x4xi32, #tpu.memory_space<smem>>, %arg4: memref<4xi32, #tpu.memory_space<smem>>) -> (i32, i32) {
    %c0_i32 = arith.constant 0 : i32
    %c0_i32_0 = arith.constant 0 : i32
    return %arg0, %c0_i32 : i32, i32
  }
  func.func @transform_1(%arg0: i32, %arg1: i32, %arg2: memref<4x4xi32, #tpu.memory_space<smem>>, %arg3: memref<4x4xi32, #tpu.memory_space<smem>>, %arg4: memref<4xi32, #tpu.memory_space<smem>>) -> (i32, i32, i32) {
    %0 = arith.index_cast %arg0 : i32 to index
    %1 = arith.index_cast %arg1 : i32 to index
    %2 = memref.load %arg2[%0, %1] : memref<4x4xi32, #tpu.memory_space<smem>>
    %c0_i32 = arith.constant 0 : i32
    %c0_i32_0 = arith.constant 0 : i32
    %c0_i32_1 = arith.constant 0 : i32
    return %2, %c0_i32, %c0_i32_0 : i32, i32, i32
  }
  func.func @transform_2(%arg0: i32, %arg1: i32, %arg2: memref<4x4xi32, #tpu.memory_space<smem>>, %arg3: memref<4x4xi32, #tpu.memory_space<smem>>, %arg4: memref<4xi32, #tpu.memory_space<smem>>) -> (i32, i32) {
    %0 = arith.index_cast %arg0 : i32 to index
    %1 = arith.index_cast %arg1 : i32 to index
    %2 = memref.load %arg3[%0, %1] : memref<4x4xi32, #tpu.memory_space<smem>>
    %c0_i32 = arith.constant 0 : i32
    %c0_i32_0 = arith.constant 0 : i32
    return %2, %c0_i32 : i32, i32
  }
  func.func @transform_3(%arg0: i32, %arg1: i32, %arg2: memref<4x4xi32, #tpu.memory_space<smem>>, %arg3: memref<4x4xi32, #tpu.memory_space<smem>>, %arg4: memref<4xi32, #tpu.memory_space<smem>>) -> (i32, i32) {
    %c0_i32 = arith.constant 0 : i32
    %c0_i32_0 = arith.constant 0 : i32
    %c0_i32_1 = arith.constant 0 : i32
    return %c0_i32, %c0_i32_0 : i32, i32
  }
  func.func @transform_4(%arg0: i32, %arg1: i32, %arg2: memref<4x4xi32, #tpu.memory_space<smem>>, %arg3: memref<4x4xi32, #tpu.memory_space<smem>>, %arg4: memref<4xi32, #tpu.memory_space<smem>>) -> (i32, i32) {
    %c0_i32 = arith.constant 0 : i32
    %c0_i32_0 = arith.constant 0 : i32
    %c0_i32_1 = arith.constant 0 : i32
    return %c0_i32, %c0_i32_0 : i32, i32
  }
  func.func @transform_5(%arg0: i32, %arg1: i32, %arg2: memref<4x4xi32, #tpu.memory_space<smem>>, %arg3: memref<4x4xi32, #tpu.memory_space<smem>>, %arg4: memref<4xi32, #tpu.memory_space<smem>>) -> (i32, i32) {
    %c0_i32 = arith.constant 0 : i32
    %c0_i32_0 = arith.constant 0 : i32
    %c0_i32_1 = arith.constant 0 : i32
    return %c0_i32, %c0_i32_0 : i32, i32
  }
  func.func @transform_6(%arg0: i32, %arg1: i32, %arg2: memref<4x4xi32, #tpu.memory_space<smem>>, %arg3: memref<4x4xi32, #tpu.memory_space<smem>>, %arg4: memref<4xi32, #tpu.memory_space<smem>>) -> (i32, i32) {
    %c0_i32 = arith.constant 0 : i32
    %c0_i32_0 = arith.constant 0 : i32
    return %arg0, %c0_i32 : i32, i32
  }
  func.func @transform_7(%arg0: i32, %arg1: i32, %arg2: memref<4x4xi32, #tpu.memory_space<smem>>, %arg3: memref<4x4xi32, #tpu.memory_space<smem>>, %arg4: memref<4xi32, #tpu.memory_space<smem>>) -> (i32, i32) {
    %c0_i32 = arith.constant 0 : i32
    %c0_i32_0 = arith.constant 0 : i32
    return %arg0, %c0_i32 : i32, i32
  }
}

module attributes {stable_mosaic.version = 11 : i64} {
  func.func @_cheb_residual_kernel(%arg0: i32, %arg1: i32, %arg2: memref<4x4xi32, #tpu.memory_space<smem>>, %arg3: memref<4x4xi32, #tpu.memory_space<smem>>, %arg4: memref<4xi32, #tpu.memory_space<smem>>, %arg5: memref<256x128xf32, #tpu.memory_space<vmem>>, %arg6: memref<1x256x256xbf16, #tpu.memory_space<vmem>>, %arg7: memref<256x128xbf16, #tpu.memory_space<vmem>>, %arg8: memref<256x128xbf16, #tpu.memory_space<vmem>>, %arg9: memref<256x128xf32, #tpu.memory_space<vmem>>) attributes {dimension_semantics = [#tpu.dimension_semantics<parallel>, #tpu.dimension_semantics<arbitrary>], iteration_bounds = array<i64: 4, 4>, scalar_prefetch = 3 : i64, scratch_operands = 0 : i64, tpu.core_type = #tpu.core_type<tc>, window_params = [{transform_indices = @transform_0, window_bounds = array<i64: 256, 128>}, {transform_indices = @transform_1, window_bounds = array<i64: 1, 256, 256>}, {transform_indices = @transform_2, window_bounds = array<i64: 256, 128>}, {transform_indices = @transform_3, window_bounds = array<i64: 256, 128>}, {transform_indices = @transform_4, window_bounds = array<i64: 256, 128>}]} {
    %c0_i32 = arith.constant 0 : i32
    %0 = arith.cmpi eq, %arg1, %c0_i32 : i32
    %1 = arith.extui %0 : i1 to i32
    %c0_i32_0 = arith.constant 0 : i32
    %2 = arith.cmpi ne, %1, %c0_i32_0 : i32
    scf.if %2 {
      %c0 = arith.constant 0 : index
      %c0_3 = arith.constant 0 : index
      %11 = vector.load %arg5[%c0, %c0_3] : memref<256x128xf32, #tpu.memory_space<vmem>>, vector<256x128xf32>
      %c0_4 = arith.constant 0 : index
      %c0_5 = arith.constant 0 : index
      %12 = vector.load %arg9[%c0_4, %c0_5] : memref<256x128xf32, #tpu.memory_space<vmem>>, vector<256x128xf32>
      tpu.vector_store %arg9[%c0_4, %c0_5], %11 {strides = array<i32>} : memref<256x128xf32, #tpu.memory_space<vmem>>, vector<256x128xf32>,
    } else {
    }
    %3 = arith.index_cast %arg0 : i32 to index
    %4 = memref.load %arg4[%3] : memref<4xi32, #tpu.memory_space<smem>>
    %5 = arith.cmpi slt, %arg1, %4 : i32
    %6 = arith.extui %5 : i1 to i32
    %c0_i32_1 = arith.constant 0 : i32
    %7 = arith.cmpi ne, %6, %c0_i32_1 : i32
    scf.if %7 {
      %c0 = arith.constant 0 : index
      %c0_3 = arith.constant 0 : index
      %11 = vector.load %arg9[%c0, %c0_3] : memref<256x128xf32, #tpu.memory_space<vmem>>, vector<256x128xf32>
      %c0_4 = arith.constant 0 : index
      %c0_5 = arith.constant 0 : index
      %c0_6 = arith.constant 0 : index
      %12 = vector.load %arg6[%c0_4, %c0_5, %c0_6] : memref<1x256x256xbf16, #tpu.memory_space<vmem>>, vector<1x256x256xbf16>
      %13 = vector.shape_cast %12 : vector<1x256x256xbf16> to vector<256x256xbf16>
      %c0_7 = arith.constant 0 : index
      %c0_8 = arith.constant 0 : index
      %14 = vector.load %arg7[%c0_7, %c0_8] : memref<256x128xbf16, #tpu.memory_space<vmem>>, vector<256x128xbf16>
      %cst = arith.constant dense<0.000000e+00> : vector<256x128xf32>
      %15 = tpu.matmul %13, %14, %cst {dimension_numbers = #tpu.dot_dimension_numbers<[1], [0], [0], [1], [0, 0, 1, 1], [], []>} : vector<256x256xbf16>, vector<256x128xbf16>, vector<256x128xf32> -> vector<256x128xf32>
      %16 = arith.addf %11, %15 : vector<256x128xf32>
      %c0_9 = arith.constant 0 : index
      %c0_10 = arith.constant 0 : index
      %17 = vector.load %arg9[%c0_9, %c0_10] : memref<256x128xf32, #tpu.memory_space<vmem>>, vector<256x128xf32>
      tpu.vector_store %arg9[%c0_9, %c0_10], %16 {strides = array<i32>} : memref<256x128xf32, #tpu.memory_space<vmem>>, vector<256x128xf32>,
    } else {
    }
    %c3_i32 = arith.constant 3 : i32
    %8 = arith.cmpi eq, %arg1, %c3_i32 : i32
    %9 = arith.extui %8 : i1 to i32
    %c0_i32_2 = arith.constant 0 : i32
    %10 = arith.cmpi ne, %9, %c0_i32_2 : i32
    scf.if %10 {
      %c0 = arith.constant 0 : index
      %c0_3 = arith.constant 0 : index
      %11 = vector.load %arg9[%c0, %c0_3] : memref<256x128xf32, #tpu.memory_space<vmem>>, vector<256x128xf32>
      %cst = arith.constant 0.000000e+00 : f32
      %12 = vector.broadcast %cst : f32 to vector<256x128xf32>
      %13 = arith.maximumf %11, %12 : vector<256x128xf32>
      %c0_4 = arith.constant 0 : index
      %c0_5 = arith.constant 0 : index
      %14 = vector.load %arg8[%c0_4, %c0_5] : memref<256x128xbf16, #tpu.memory_space<vmem>>, vector<256x128xbf16>
      %15 = arith.extf %14 : vector<256x128xbf16> to vector<256x128xf32>
      %16 = arith.addf %15, %13 : vector<256x128xf32>
      %cst_6 = arith.constant 5.000000e-01 : f32
      %17 = vector.broadcast %cst_6 : f32 to vector<256x128xf32>
      %18 = arith.mulf %16, %17 : vector<256x128xf32>
      %c0_7 = arith.constant 0 : index
      %c0_8 = arith.constant 0 : index
      %19 = vector.load %arg9[%c0_7, %c0_8] : memref<256x128xf32, #tpu.memory_space<vmem>>, vector<256x128xf32>
      tpu.vector_store %arg9[%c0_7, %c0_8], %18 {strides = array<i32>} : memref<256x128xf32, #tpu.memory_space<vmem>>, vector<256x128xf32>,
    } else {
    }
    return
  }
  func.func @transform_0(%arg0: i32, %arg1: i32, %arg2: memref<4x4xi32, #tpu.memory_space<smem>>, %arg3: memref<4x4xi32, #tpu.memory_space<smem>>, %arg4: memref<4xi32, #tpu.memory_space<smem>>) -> (i32, i32) {
    %c0_i32 = arith.constant 0 : i32
    %c0_i32_0 = arith.constant 0 : i32
    return %arg0, %c0_i32 : i32, i32
  }
  func.func @transform_1(%arg0: i32, %arg1: i32, %arg2: memref<4x4xi32, #tpu.memory_space<smem>>, %arg3: memref<4x4xi32, #tpu.memory_space<smem>>, %arg4: memref<4xi32, #tpu.memory_space<smem>>) -> (i32, i32, i32) {
    %0 = arith.index_cast %arg0 : i32 to index
    %1 = arith.index_cast %arg1 : i32 to index
    %2 = memref.load %arg2[%0, %1] : memref<4x4xi32, #tpu.memory_space<smem>>
    %c0_i32 = arith.constant 0 : i32
    %c0_i32_0 = arith.constant 0 : i32
    %c0_i32_1 = arith.constant 0 : i32
    return %2, %c0_i32, %c0_i32_0 : i32, i32, i32
  }
  func.func @transform_2(%arg0: i32, %arg1: i32, %arg2: memref<4x4xi32, #tpu.memory_space<smem>>, %arg3: memref<4x4xi32, #tpu.memory_space<smem>>, %arg4: memref<4xi32, #tpu.memory_space<smem>>) -> (i32, i32) {
    %0 = arith.index_cast %arg0 : i32 to index
    %1 = arith.index_cast %arg1 : i32 to index
    %2 = memref.load %arg3[%0, %1] : memref<4x4xi32, #tpu.memory_space<smem>>
    %c0_i32 = arith.constant 0 : i32
    %c0_i32_0 = arith.constant 0 : i32
    return %2, %c0_i32 : i32, i32
  }
  func.func @transform_3(%arg0: i32, %arg1: i32, %arg2: memref<4x4xi32, #tpu.memory_space<smem>>, %arg3: memref<4x4xi32, #tpu.memory_space<smem>>, %arg4: memref<4xi32, #tpu.memory_space<smem>>) -> (i32, i32) {
    %c0_i32 = arith.constant 0 : i32
    %c0_i32_0 = arith.constant 0 : i32
    return %arg0, %c0_i32 : i32, i32
  }
  func.func @transform_4(%arg0: i32, %arg1: i32, %arg2: memref<4x4xi32, #tpu.memory_space<smem>>, %arg3: memref<4x4xi32, #tpu.memory_space<smem>>, %arg4: memref<4xi32, #tpu.memory_space<smem>>) -> (i32, i32) {
    %c0_i32 = arith.constant 0 : i32
    %c0_i32_0 = arith.constant 0 : i32
    return %arg0, %c0_i32 : i32, i32
  }
}

</mosaic_0001>

<bundles_post_ra>
// kernel: _forward.2
= control target key start
LH: loop header
LB: loop body
LE: loop exit
PB: predicated region body
PF: predicated region fallthrough
CT: control target
= control target key end

     0   :  { %s2468_s19 = smov [#allocation4]   ;;  %s2469_s20 = smov [#allocation5]   ;;  %s2935_s0 = inlined_call_operand.vmem [shape: s32[4,4], index: 0, kind: input, shape index: {}]   ;;  %s2936_s3 = inlined_call_operand.vmem [shape: f32[1024,128], index: 3, kind: input, shape index: {}]   ;;  %s2937_s4 = inlined_call_operand.hbm [shape: bf16[14,256,256], index: 4, kind: input, shape index: {}]   ;;  %s2938_s5 = inlined_call_operand.vmem [shape: bf16[1024,128], index: 5, kind: input, shape index: {}]   ;;  %s2939_s6 = inlined_call_operand.vmem [shape: bf16[128,128], index: 6, kind: input, shape index: {}]   ;;  %s2940_s7 = inlined_call_operand.vmem [shape: bf16[128,128], index: 7, kind: input, shape index: {}]   ;;  %s2941_s8 = inlined_call_operand.vmem [shape: f32[1,128], index: 8, kind: input, shape index: {}]   ;;  %s2942_s9 = inlined_call_operand.vmem [shape: f32[1024,128], index: 9, kind: output, shape index: {0}]   ;;  %s2943_s10 = inlined_call_operand.vmem [shape: bf16[1024,128], index: 10, kind: output, shape index: {1}]   ;;  %s2944_s1 = inlined_call_operand.vmem [shape: s32[4,4], index: 1, kind: input, shape index: {}]   ;;  %s2945_s2 = inlined_call_operand.hbm [shape: s32[4], index: 2, kind: input, shape index: {}]  }
   0x1   :  { %s17_s15 = sshll.u32 %s2935_s0, 4  ;;  %s22_s18 = sshll.u32 %s2944_s1, 4  ;;  %s18_s15 = int_to_ptr.vmem [resolvable:$true] %s17_s15  ;;  %s23_s18 = int_to_ptr.vmem [resolvable:$true] %s22_s18 }
   0x2   :  { %20 = dma.vmem_to_smem %s18_s15, 64, %s2468_s19, [#allocation3] }
   0x3   :  { %25 = dma.vmem_to_smem %s23_s18, 64, %s2469_s20, [#allocation3] }
   0x4   :  { %s27_s23 = sshll.u32 %s2945_s2, 4  ;;  %s2470_s24 = smov [#allocation6]   ;;  %s28_s23 = int_to_ptr.hbm [resolvable:$true] %s27_s23 }
   0x5   :  { %30 = dma.hbm_to_smem %s28_s23, 16, %s2470_s24, [#allocation3] }
   0x6   :  { %2430 = dma.done.wait [#allocation3], 144 }
   0x7   :  { %2431 = vsyncadd [#allocation3], 4294967152 }
   0x8   :  { %33 = sfence }
   0x9   :  { %34 = vsyncpa [#allocation8], 0 }
   0xa   :  { %36 = vsyncpa [#allocation8 + $0x1], 0  ;;  %s2537_s0 = smov 0   ;;  %s2539_s1 = smov 0  }
   0xb   :  { %s2541_s25 = smov 0   ;;  %s2543_s26 = smov 0  }
   0xc   :  { %s2545_s27 = smov 0   ;;  %s2547_s28 = smov 0  }
   0xd   :  { %s2549_s2 = smov 0   ;;  %s2551_s29 = smov 0  }
   0xe LB: > { %2950 = sst [smem:[#allocation13_spill]] %s2458_s28  ;;  %s51_s30 = sadd.s32 1, %s2458_s28  ;;  %s2466_s29 = sphi %s2551_s29, %s42_s29   ;;  %s2462_s2 = sphi %s2549_s2, %s2962_s2   ;;  %s2458_s28 = sphi %s2547_s28, %s2961_s28   ;;  %s2454_s27 = sphi %s2545_s27, %s2960_s27   ;;  %s2450_s26 = sphi %s2543_s26, %s2959_s26   ;;  %s2446_s25 = sphi %s2541_s25, %s2965_s25   ;;  %s2442_s1 = sphi %s2539_s1, %s2964_s1   ;;  %s2438_s0 = sphi %s2537_s0, %s2963_s0  }
   0xf   : > { %2951 = sst [smem:[#allocation14_spill]] %s2462_s2  ;;  %p52_p0 = scmp.ge.s32.totalorder %s51_s30, 4 }
  0x10   : > { %s54_s11 = sadd.s32 1, %s2462_s2  ;;  %s84_s12 = sshra.s32 %s2458_s28, 7 }
  0x11   : > { %s2967_s30 = smov (%p52_p0, %s51_s30), 0  ;;  %s2969_s11 = smov (!%p52_p0, %s54_s11), %s2462_s2 }
  0x12   : > { %2952 = sst [smem:[#allocation15_spill]] %s2967_s30  ;;  %s86_s13 = sadd.s32 %s2462_s2, %s84_s12 }
  0x13   : > { %s89_s14 = sand.u32 127, %s2458_s28  ;;  %p56_p1 = scmp.ge.s32.totalorder %s2969_s11, 4 }
  0x14   : > { %s1777_s15 = sshll.u32 %s86_s13, 7  ;;  %s1775_s16 = sadd.s32 4294967295, %s2466_s29  }
  0x15   : > { %s92_s17 = sshra.s32 %s2967_s30, 7  ;;  %s2971_s11 = smov (%p56_p1, %s2969_s11), 0 }
  0x16   : > { %2953 = sst [smem:[#allocation16_spill]] %s2971_s11  ;;  %s90_s18 = sadd.s32 %s1777_s15, %s89_s14 }
  0x17   : > { %s97_s19 = sand.u32 127, %s2967_s30  ;;  %s91_s20 = sld [smem:[#allocation4 + %s90_s18]] }
  0x18   : > { %s94_s21 = sadd.s32 %s92_s17, %s2971_s11  ;;  %p110_p2 = scmp.ne.s32.totalorder %s2446_s25, %s2442_s1 }
  0x19   : > { %s1778_s22 = sshll.u32 %s94_s21, 7  ;;  %p116_p3 = scmp.ne.s32.totalorder %s2442_s1, %s2438_s0 }
  0x1a   : > { %s98_s23 = sadd.s32 %s1778_s22, %s97_s19  ;;  %p111_p4 = scmp.eq.s32.totalorder %s2466_s29, 0 }
  0x1b   : > { %s99_s24 = sld [smem:[#allocation4 + %s98_s23]]  ;;  %p117_p5 = scmp.eq.s32.totalorder %s1775_s16, 0 }
  0x1c   : > { %s315_s13 = sand.u32 1, %s2446_s25   ;;  %p112_p7 = por %p111_p4, %p110_p2 }
  0x1d   : > { %p2596_p6 = por %p117_p5, %p116_p3  ;;  %s103_s14 = sadd.s32 1, %s2446_s25 }
  0x1e   : > { %p2261_p8 = scmp.lt.s32.totalorder %s2466_s29, 16  ;;  %s1783_s17 = sshll.u32 %s315_s13, 8 }
  0x1f   : > { %s2251_s0 = scalar_select %p112_p7, [#allocation4], [#allocation9] }
  0x20   : > { %p2603_p10 = pnand %p2261_p8, %p112_p7  ;;  %s2973_s18 = smov (!%p112_p7, %s90_s18), 0 }
  0x21   : > { %s100_s15 = ssub.s32 %s91_s20, %s99_s24  ;;  %s2975_s0 = smov (!%p2261_p8, %s2251_s0), [#allocation10] }
  0x22   : > { %p101_p9 = scmp.eq.s32.totalorder %s100_s15, 0  ;;  %s2977_s18 = smov (!%p2261_p8, %s2973_s18), 0 }
  0x23   : > { %s327_s16 = sld [smem:[%s2975_s0 + %s2977_s18]]  ;;  %p1787_p11 = scmp.ge.s32.totalorder %s2466_s29, 1 }
  0x24   : > { %s2608_s19 = scalar_select %p101_p9, %s2446_s25, %s103_s14  }
  0x25   : > { %p368_p12 = scmp.lt.s32.totalorder %s2466_s29, 17  ;;  %s319_s22 = scalar_lea.vmem [#allocation7], %s1783_s17 }
  0x26   : > { %2956 = sst [smem:[#allocation17_spill]] %s2608_s19  ;;  %s335_s23 = sshll.u32 %s319_s22, 4  ;;  %s336_s23 = int_to_ptr.vmem [resolvable:$true] %s335_s23 }
  0x27   : > { %p2612_p13 = pnand %p1787_p11, %p368_p12  ;;  %s316_s2 = scalar_lea.sflag [#allocation8], %s315_s13 }
  0x28   : > { %p2372_p1 = pneg %p2603_p10 }
  0x29   : > { %s2059_s24 = sshll.u32 %s327_s16, 8  ;;  %s2375_s16 = scalar_lea.hbm %s2937_s4, 3584 }
  0x2a   : > { %s332_s14 = scalar_lea.hbm %s2937_s4, %s2059_s24 }
  0x2b   : > { %s333_s30 = sshll.u32 %s332_s14, 4  ;;  %s334_s30 = int_to_ptr.hbm [resolvable:$true] %s333_s30 }
  0x2c   : > { %s2368_s28 = sshra.s32 %s334_s30, 4  ;;  %s2369_s28 = int_to_ptr.hbm [resolvable:$true] %s2368_s28 }
  0x2d   : > { %s2370_s18 = scalar_lea.hbm %s2369_s28, 256  ;;  %p2376_p4 = scmp.lt.s32.totalorder %s2369_s28, %s2937_s4 }
  0x2e   : > { %p2371_p0 = scmp.ne.s32.totalorder %s2369_s28, %s2370_s18  ;;  %p2377_p5 = scmp.lt.s32.totalorder %s2375_s16, %s2370_s18 }
  0x30   : > { %p2373_p2 = pnand %p2372_p1, %p2371_p0  ;;  %p2378_p7 = por %p2377_p5, %p2376_p4 }
  0x32   : > { %p2374_p3 = pneg %p2373_p2 }
  0x34   : > { %p2379_p8 = pnand %p2378_p7, %p2374_p3 }
  0x36   : > { %2382 = shalt.err (!%p2379_p8)
}
  0x37   : > { %s2471_s11 = smov 128   ;;  %s2472_s13 = smov 8  }
  0x38   : > { %2260 = dma.hbm_to_vmem [thread:$0]  (!%p2603_p10), %s334_s30, 4096, %s336_s23, %s316_s2, %s2471_s11, %s2471_s11, %s2472_s13  }
  0x39   : > { %372 = sbr.rel (%p2612_p13) target bundleno = 710 (0x2c6), region = 44  ;;  %s374_s24 = sand.u32 (!%p2612_p13), 1, %s2442_s1  }
  0x3a   : > { %s1788_s15 = sshll.u32 (!%p2612_p13), %s374_s24, 8  ;;  %s375_s14 = scalar_lea.sflag (!%p2612_p13), [#allocation8], %s374_s24 }
  0x3b   : > { %s2632_s17 = scalar_lea.vmem (!%p2612_p13), [#allocation7], %s1788_s15 }
  0x3e   : > { %2433 = dma.done.wait (%p2596_p6), %s375_s14, 4096  }
  0x3f   : > { %2435 = vsyncadd (%p2596_p6), %s375_s14, 4294963200  ;;  %s447_s28 = sshra.s32 %s2450_s26, 7  ;;  %s452_s2 = sand.u32 127, %s2450_s26 }
  0x40   : > { %s449_s30 = sadd.s32 %s2454_s27, %s447_s28  ;;  %s1789_s21 = sshll.u32 %s2454_s27, 5 }
  0x41   : > { %s1791_s19 = sshll.u32 %s449_s30, 7  ;;  %p434_p9 = scmp.lt.s32.totalorder %s1789_s21, 127 }
  0x42   : > { %s453_s23 = sadd.s32 %s1791_s19, %s452_s2  ;;  %p1798_p10 = scmp.ne.s32.totalorder %s2450_s26, 0 }
  0x43   : > { %s454_s20 = sld [smem:[#allocation5 + %s453_s23]]  ;;  %s2979_s21 = smov (!%p434_p9, %s1789_s21), 127 }
  0x44   : > { %s1790_s18 = sshll.u32 %s2979_s21, 3  ;;  %s1797_s0 = sshll.u32 %s2979_s21, 2 }
  0x45   : > { %s2645_s12 = scalar_lea.vmem %s2936_s3, %s1790_s18  ;;  %s2650_s24 = scalar_lea.vmem %s2942_s9, %s1790_s18 }
  0x46   : > { %s2655_s28 = scalar_lea.vmem %s2943_s10, %s1797_s0 }
  0x49   : > { %s1792_s2 = sshll.u32 %s454_s20, 5 }
  0x4a   : > { %p456_p6 = scmp.lt.s32.totalorder %s1792_s2, 127  ;;  %484 = sbr.rel (%p1798_p10) target bundleno = 112 (0x70), region = 52 }
  0x4c   : > { %s2981_s2 = smov (!%p456_p6, %s1792_s2), 127 }
  0x4d   : > { %s1793_s30 = sshll.u32 %s2981_s2, 2 }
  0x4e   : > { %s2660_s23 = scalar_lea.vmem %s2938_s5, %s1793_s30 }
  0x4f   : > { %v485_v0 = vld [vmem:[%s2645_s12] sm:$0xff]  ;;  %v486_v1 = vld [vmem:[%s2645_s12 + $0x8] sm:$0xff]  ;;  %v487_v2 = vld [vmem:[%s2645_s12 + $0x10] sm:$0xff] }
  0x50   : > { %517 = vst [vmem:[#allocation2 + $0xb0] sm:$0xff] %v485_v0  ;;  %v488_v3 = vld [vmem:[%s2645_s12 + $0x18] sm:$0xff]  ;;  %v489_v4 = vld [vmem:[%s2645_s12 + $0x20] sm:$0xff]  ;;  %v490_v5 = vld [vmem:[%s2645_s12 + $0x28] sm:$0xff] }
  0x51   : > { %518 = vst [vmem:[#allocation2] sm:$0xff] %v486_v1  ;;  %v491_v6 = vld [vmem:[%s2645_s12 + $0x30] sm:$0xff]  ;;  %v492_v7 = vld [vmem:[%s2645_s12 + $0x38] sm:$0xff]  ;;  %v493_v8 = vld [vmem:[%s2645_s12 + $0x40] sm:$0xff] }
  0x52   : > { %519 = vst [vmem:[#allocation2 + $0xd8] sm:$0xff] %v487_v2  ;;  %v494_v9 = vld [vmem:[%s2645_s12 + $0x48] sm:$0xff]  ;;  %v495_v10 = vld [vmem:[%s2645_s12 + $0x50] sm:$0xff]  ;;  %v496_v11 = vld [vmem:[%s2645_s12 + $0x58] sm:$0xff] }
  0x53   : > { %520 = vst [vmem:[#allocation2 + $0x18] sm:$0xff] %v488_v3  ;;  %v497_v12 = vld [vmem:[%s2645_s12 + $0x60] sm:$0xff]  ;;  %v498_v13 = vld [vmem:[%s2645_s12 + $0x68] sm:$0xff]  ;;  %v499_v14 = vld [vmem:[%s2645_s12 + $0x70] sm:$0xff] }
  0x54   : > { %521 = vst [vmem:[#allocation2 + $0x50] sm:$0xff] %v489_v4  ;;  %v500_v15 = vld [vmem:[%s2645_s12 + $0x78] sm:$0xff]  ;;  %v501_v16 = vld [vmem:[%s2645_s12 + $0x80] sm:$0xff]  ;;  %v502_v17 = vld [vmem:[%s2645_s12 + $0x88] sm:$0xff] }
  0x55   : > { %522 = vst [vmem:[#allocation2 + $0x68] sm:$0xff] %v490_v5  ;;  %v503_v18 = vld [vmem:[%s2645_s12 + $0x90] sm:$0xff]  ;;  %v504_v19 = vld [vmem:[%s2645_s12 + $0x98] sm:$0xff]  ;;  %v505_v20 = vld [vmem:[%s2645_s12 + $0xa0] sm:$0xff] }
  0x56   : > { %523 = vst [vmem:[#allocation2 + $0x30] sm:$0xff] %v491_v6  ;;  %v506_v21 = vld [vmem:[%s2645_s12 + $0xa8] sm:$0xff]  ;;  %v507_v22 = vld [vmem:[%s2645_s12 + $0xb0] sm:$0xff]  ;;  %v508_v23 = vld [vmem:[%s2645_s12 + $0xb8] sm:$0xff] }
  0x57   : > { %524 = vst [vmem:[#allocation2 + $0x48] sm:$0xff] %v492_v7  ;;  %v509_v24 = vld [vmem:[%s2645_s12 + $0xc0] sm:$0xff]  ;;  %v510_v25 = vld [vmem:[%s2645_s12 + $0xc8] sm:$0xff]  ;;  %v511_v26 = vld [vmem:[%s2645_s12 + $0xd0] sm:$0xff] }
  0x58   : > { %525 = vst [vmem:[#allocation2 + $0x80] sm:$0xff] %v493_v8  ;;  %v512_v27 = vld [vmem:[%s2645_s12 + $0xd8] sm:$0xff]  ;;  %v513_v28 = vld [vmem:[%s2645_s12 + $0xe0] sm:$0xff]  ;;  %v514_v29 = vld [vmem:[%s2645_s12 + $0xe8] sm:$0xff] }
  0x59   : > { %526 = vst [vmem:[#allocation2 + $0x88] sm:$0xff] %v494_v9  ;;  %v515_v30 = vld [vmem:[%s2645_s12 + $0xf0] sm:$0xff]  ;;  %v516_v31 = vld [vmem:[%s2645_s12 + $0xf8] sm:$0xff] }
  0x5a   : > { %527 = vst [vmem:[#allocation2 + $0xe8] sm:$0xff] %v495_v10 }
  0x5b   : > { %528 = vst [vmem:[#allocation2 + $0xb8] sm:$0xff] %v496_v11 }
  0x5c   : > { %529 = vst [vmem:[#allocation2 + $0x60] sm:$0xff] %v497_v12 }
  0x5d   : > { %530 = vst [vmem:[#allocation2 + $0xf0] sm:$0xff] %v498_v13 }
  0x5e   : > { %531 = vst [vmem:[#allocation2 + $0x8] sm:$0xff] %v499_v14 }
  0x5f   : > { %532 = vst [vmem:[#allocation2 + $0x78] sm:$0xff] %v500_v15 }
  0x60   : > { %533 = vst [vmem:[#allocation2 + $0x38] sm:$0xff] %v501_v16 }
  0x61   : > { %534 = vst [vmem:[#allocation2 + $0x58] sm:$0xff] %v502_v17 }
  0x62   : > { %535 = vst [vmem:[#allocation2 + $0x40] sm:$0xff] %v503_v18 }
  0x63   : > { %536 = vst [vmem:[#allocation2 + $0xc8] sm:$0xff] %v504_v19 }
  0x64   : > { %537 = vst [vmem:[#allocation2 + $0xe0] sm:$0xff] %v505_v20 }
  0x65   : > { %538 = vst [vmem:[#allocation2 + $0x90] sm:$0xff] %v506_v21 }
  0x66   : > { %539 = vst [vmem:[#allocation2 + $0x70] sm:$0xff] %v507_v22 }
  0x67   : > { %540 = vst [vmem:[#allocation2 + $0xc0] sm:$0xff] %v508_v23 }
  0x68   : > { %541 = vst [vmem:[#allocation2 + $0xa8] sm:$0xff] %v509_v24 }
  0x69   : > { %542 = vst [vmem:[#allocation2 + $0xd0] sm:$0xff] %v510_v25 }
  0x6a   : > { %543 = vst [vmem:[#allocation2 + $0x10] sm:$0xff] %v511_v26 }
  0x6b   : > { %544 = vst [vmem:[#allocation2 + $0x28] sm:$0xff] %v512_v27 }
  0x6c   : > { %545 = vst [vmem:[#allocation2 + $0xa0] sm:$0xff] %v513_v28 }
  0x6d   : > { %546 = vst [vmem:[#allocation2 + $0xf8] sm:$0xff] %v514_v29 }
  0x6e   : > { %547 = vst [vmem:[#allocation2 + $0x20] sm:$0xff] %v515_v30 }
  0x6f   : > { %548 = vst [vmem:[#allocation2 + $0x98] sm:$0xff] %v516_v31 }
  0x70 PF: > { %s549_s20 = sld [smem:[#allocation6 + %s2454_s27]] }
  0x76   : > { %p1799_p11 = scmp.ge.s32.totalorder %s2450_s26, %s549_s20 }
  0x78   : > { %553 = sbr.rel (%p1799_p11) target bundleno = 415 (0x19f), region = 56 }
  0x7d   : > { %v2099_v32 = vld [vmem:[%s2660_s23 + $0x38] sm:$0xff]  ;;  %v2098_v34 = vld [vmem:[%s2660_s23 + $0x30] sm:$0xff]  ;;  %v2097_v36 = vld [vmem:[%s2660_s23 + $0x28] sm:$0xff] }
  0x7e   : > { %v2107_v33 = vld [vmem:[%s2660_s23 + $0x78] sm:$0xff]  ;;  %906 = vmatpush.bf16.msra.mxu0 %v2099_v32  ;;  %2219 = vmatpush.bf16.msra.mxu2 %v2099_v32  ;;  %v2106_v35 = vld [vmem:[%s2660_s23 + $0x70] sm:$0xff]  ;;  %v2105_v37 = vld [vmem:[%s2660_s23 + $0x68] sm:$0xff] }
  0x7f   : > { %995 = vmatpush.bf16.msra.mxu1 %v2107_v33  ;;  %2227 = vmatpush.bf16.msra.mxu3 %v2107_v33  ;;  %v2096_v38 = vld [vmem:[%s2660_s23 + $0x20] sm:$0xff]  ;;  %v2095_v40 = vld [vmem:[%s2660_s23 + $0x18] sm:$0xff]  ;;  %v2094_v42 = vld [vmem:[%s2660_s23 + $0x10] sm:$0xff] }
  0x80   : > { %v2104_v39 = vld [vmem:[%s2660_s23 + $0x60] sm:$0xff]  ;;  %v2103_v41 = vld [vmem:[%s2660_s23 + $0x58] sm:$0xff]  ;;  %v2102_v43 = vld [vmem:[%s2660_s23 + $0x50] sm:$0xff] }
  0x81   : > { %v2093_v44 = vld [vmem:[%s2660_s23 + $0x8] sm:$0xff]  ;;  %v2092_v46 = vld [vmem:[%s2660_s23] sm:$0xff]  ;;  %v1810_v60 = vld [vmem:[%s2632_s17 + $0x10] sm:$0xf] }
  0x82   : > { %907 = vmatpush.bf16.msra.mxu0 %v2098_v34  ;;  %2220 = vmatpush.bf16.msra.mxu2 %v2098_v34  ;;  %v2101_v45 = vld [vmem:[%s2660_s23 + $0x48] sm:$0xff]  ;;  %v2100_v47 = vld [vmem:[%s2660_s23 + $0x40] sm:$0xff]  ;;  %v2063_v61 = vld [vmem:[%s2632_s17 + $0x14] sm:$0xf0] }
  0x83   : > { %996 = vmatpush.bf16.msra.mxu1 %v2106_v35  ;;  %2228 = vmatpush.bf16.msra.mxu3 %v2106_v35  ;;  %v1802_v48 = vld [vmem:[%s2632_s17] sm:$0xf]  ;;  %v2061_v49 = vld [vmem:[%s2632_s17 + $0x4] sm:$0xf0]  ;;  %v2060_v52 = vld [vmem:[%s2632_s17 + $0x4] sm:$0xf]  ;;  %v1811_v4 = vor.u32 %v2063_v61, %v1810_v60 }
  0x84   : > { %v1866_v50 = vld [vmem:[%s2632_s17 + $0x80] sm:$0xf]  ;;  %v2077_v51 = vld [vmem:[%s2632_s17 + $0x84] sm:$0xf0]  ;;  %v1804_v53 = vld [vmem:[%s2632_s17 + $0x8] sm:$0xf0]  ;;  %v1803_v56 = vor.u32 %v2061_v49, %v1802_v48 }
  0x85   : > { %v2076_v54 = vld [vmem:[%s2632_s17 + $0x84] sm:$0xf]  ;;  %v1868_v55 = vld [vmem:[%s2632_s17 + $0x88] sm:$0xf0]  ;;  %v1867_v57 = vor.u32 %v2077_v51, %v1866_v50  ;;  %v1807_v58 = vor.u32 %v2060_v52, %v1804_v53  ;;  %v1874_v62 = vld [vmem:[%s2632_s17 + $0x90] sm:$0xf] }
  0x86   : > { %908 = vmatpush.bf16.msra.mxu0 %v2097_v36  ;;  %2221 = vmatpush.bf16.msra.mxu2 %v2097_v36  ;;  %v1871_v59 = vor.u32 %v2076_v54, %v1868_v55  ;;  %v2079_v63 = vld [vmem:[%s2632_s17 + $0x94] sm:$0xf0]  ;;  %v2062_v0 = vld [vmem:[%s2632_s17 + $0x14] sm:$0xf]  ;;  %v1812_v1 = vld [vmem:[%s2632_s17 + $0x18] sm:$0xf0] }
  0x87   : > { %997 = vmatpush.bf16.msra.mxu1 %v2105_v37  ;;  %2229 = vmatpush.bf16.msra.mxu3 %v2105_v37  ;;  %v2078_v2 = vld [vmem:[%s2632_s17 + $0x94] sm:$0xf]  ;;  %v1876_v3 = vld [vmem:[%s2632_s17 + $0x98] sm:$0xf0]  ;;  %v1875_v5 = vor.u32 %v2079_v63, %v1874_v62  ;;  %v1815_v6 = vor.u32 %v2062_v0, %v1812_v1  ;;  %v1818_v8 = vld [vmem:[%s2632_s17 + $0x20] sm:$0xf] }
  0x88   : > { %v1879_v7 = vor.u32 %v2078_v2, %v1876_v3  ;;  %v2065_v9 = vld [vmem:[%s2632_s17 + $0x24] sm:$0xf0]  ;;  %v1882_v10 = vld [vmem:[%s2632_s17 + $0xa0] sm:$0xf]  ;;  %v2064_v12 = vld [vmem:[%s2632_s17 + $0x24] sm:$0xf] }
  0x89   : > { %v2081_v11 = vld [vmem:[%s2632_s17 + $0xa4] sm:$0xf0]  ;;  %v1820_v13 = vld [vmem:[%s2632_s17 + $0x28] sm:$0xf0]  ;;  %v2080_v14 = vld [vmem:[%s2632_s17 + $0xa4] sm:$0xf]  ;;  %v1819_v16 = vor.u32 %v2065_v9, %v1818_v8 }
  0x8a   : > { %909 = vmatpush.bf16.msra.mxu0 %v2096_v38  ;;  %2222 = vmatpush.bf16.msra.mxu2 %v2096_v38  ;;  %v1884_v15 = vld [vmem:[%s2632_s17 + $0xa8] sm:$0xf0]  ;;  %v1883_v17 = vor.u32 %v2081_v11, %v1882_v10  ;;  %v1823_v18 = vor.u32 %v2064_v12, %v1820_v13  ;;  %v1826_v20 = vld [vmem:[%s2632_s17 + $0x30] sm:$0xf]  ;;  %v2067_v21 = vld [vmem:[%s2632_s17 + $0x34] sm:$0xf0] }
  0x8b   : > { %998 = vmatpush.bf16.msra.mxu1 %v2104_v39  ;;  %2230 = vmatpush.bf16.msra.mxu3 %v2104_v39  ;;  %v1887_v19 = vor.u32 %v2080_v14, %v1884_v15  ;;  %v1890_v22 = vld [vmem:[%s2632_s17 + $0xb0] sm:$0xf]  ;;  %v2083_v23 = vld [vmem:[%s2632_s17 + $0xb4] sm:$0xf0]  ;;  %v2066_v24 = vld [vmem:[%s2632_s17 + $0x34] sm:$0xf]  ;;  %v1827_v28 = vor.u32 %v2067_v21, %v1826_v20 }
  0x8c   : > { %v1828_v25 = vld [vmem:[%s2632_s17 + $0x38] sm:$0xf0]  ;;  %v2082_v26 = vld [vmem:[%s2632_s17 + $0xb4] sm:$0xf]  ;;  %v1891_v29 = vor.u32 %v2083_v23, %v1890_v22  ;;  %v1834_v32 = vld [vmem:[%s2632_s17 + $0x40] sm:$0xf] }
  0x8d   : > { %v1892_v27 = vld [vmem:[%s2632_s17 + $0xb8] sm:$0xf0]  ;;  %v1831_v30 = vor.u32 %v2066_v24, %v1828_v25  ;;  %v2069_v33 = vld [vmem:[%s2632_s17 + $0x44] sm:$0xf0]  ;;  %v1898_v34 = vld [vmem:[%s2632_s17 + $0xc0] sm:$0xf] }
  0x8e   : > { %910 = vmatpush.bf16.msra.mxu0 %v2095_v40  ;;  %2223 = vmatpush.bf16.msra.mxu2 %v2095_v40  ;;  %v1895_v31 = vor.u32 %v2082_v26, %v1892_v27  ;;  %v2085_v35 = vld [vmem:[%s2632_s17 + $0xc4] sm:$0xf0]  ;;  %v2068_v36 = vld [vmem:[%s2632_s17 + $0x44] sm:$0xf]  ;;  %v1836_v37 = vld [vmem:[%s2632_s17 + $0x48] sm:$0xf0]  ;;  %v1835_v40 = vor.u32 %v2069_v33, %v1834_v32 }
  0x8f   : > { %999 = vmatpush.bf16.msra.mxu1 %v2103_v41  ;;  %2231 = vmatpush.bf16.msra.mxu3 %v2103_v41  ;;  %v2084_v38 = vld [vmem:[%s2632_s17 + $0xc4] sm:$0xf]  ;;  %v1900_v39 = vld [vmem:[%s2632_s17 + $0xc8] sm:$0xf0]  ;;  %v1899_v41 = vor.u32 %v2085_v35, %v1898_v34  ;;  %v2070_v48 = vld [vmem:[%s2632_s17 + $0x54] sm:$0xf] }
  0x90   : > { %v1844_v49 = vld [vmem:[%s2632_s17 + $0x58] sm:$0xf0]  ;;  %v2086_v50 = vld [vmem:[%s2632_s17 + $0xd4] sm:$0xf]  ;;  %v2072_v60 = vld [vmem:[%s2632_s17 + $0x64] sm:$0xf] }
  0x91   : > { %v1908_v51 = vld [vmem:[%s2632_s17 + $0xd8] sm:$0xf0]  ;;  %v1847_v54 = vor.u32 %v2070_v48, %v1844_v49  ;;  %v1852_v61 = vld [vmem:[%s2632_s17 + $0x68] sm:$0xf0]  ;;  %v2088_v62 = vld [vmem:[%s2632_s17 + $0xe4] sm:$0xf] }
  0x92   : > { %911 = vmatpush.bf16.msra.mxu0 %v2094_v42  ;;  %2224 = vmatpush.bf16.msra.mxu2 %v2094_v42  ;;  %v1839_v42 = vor.u32 %v2068_v36, %v1836_v37  ;;  %v1911_v55 = vor.u32 %v2086_v50, %v1908_v51  ;;  %v1916_v63 = vld [vmem:[%s2632_s17 + $0xe8] sm:$0xf0]  ;;  %v1855_v2 = vor.u32 %v2072_v60, %v1852_v61  ;;  %v2074_v8 = vld [vmem:[%s2632_s17 + $0x74] sm:$0xf]  ;;  %v1860_v9 = vld [vmem:[%s2632_s17 + $0x78] sm:$0xf0] }
  0x93   : > { %1000 = vmatpush.bf16.msra.mxu1 %v2102_v43  ;;  %2232 = vmatpush.bf16.msra.mxu3 %v2102_v43  ;;  %v1903_v43 = vor.u32 %v2084_v38, %v1900_v39  ;;  %v1919_v3 = vor.u32 %v2088_v62, %v1916_v63  ;;  %v2090_v10 = vld [vmem:[%s2632_s17 + $0xf4] sm:$0xf]  ;;  %v1924_v11 = vld [vmem:[%s2632_s17 + $0xf8] sm:$0xf0]  ;;  %v1863_v14 = vor.u32 %v2074_v8, %v1860_v9  ;;  %v555_v26 = vld [vmem:[#allocation2] sm:$0xff] }
  0x94   : > { %v1927_v15 = vor.u32 %v2090_v10, %v1924_v11  ;;  %v570_v22 = vld [vmem:[#allocation2 + $0x38] sm:$0xff]  ;;  %v574_v62 = vld [vmem:[#allocation2 + $0xe0] sm:$0xff]  ;;  %v575_v8 = vld [vmem:[#allocation2 + $0x90] sm:$0xff] }
  0x95   : > { %v571_v32 = vld [vmem:[#allocation2 + $0x58] sm:$0xff] }
  0x96   : > { %912 = vmatpush.bf16.msra.mxu0 %v2093_v44  ;;  %2225 = vmatpush.bf16.msra.mxu2 %v2093_v44  ;;  %v1842_v44 = vld [vmem:[%s2632_s17 + $0x50] sm:$0xf]  ;;  %v556_v36 = vld [vmem:[#allocation2 + $0xd8] sm:$0xff] }
  0x97   : > { %1001 = vmatpush.bf16.msra.mxu1 %v2101_v45  ;;  %2233 = vmatpush.bf16.msra.mxu3 %v2101_v45  ;;  %v2071_v45 = vld [vmem:[%s2632_s17 + $0x54] sm:$0xf0] }
  0x98   : > { %v1843_v52 = vor.u32 %v2071_v45, %v1842_v44 }
  0x9a   : > { %913 = vmatpush.bf16.msra.mxu0 %v2092_v46  ;;  %2226 = vmatpush.bf16.msra.mxu2 %v2092_v46  ;;  %v1906_v46 = vld [vmem:[%s2632_s17 + $0xd0] sm:$0xf] }
  0x9b   : > { %1002 = vmatpush.bf16.msra.mxu1 %v2100_v47  ;;  %2234 = vmatpush.bf16.msra.mxu3 %v2100_v47  ;;  %v2087_v47 = vld [vmem:[%s2632_s17 + $0xd4] sm:$0xf0] }
  0x9c   : > { %v1907_v53 = vor.u32 %v2087_v47, %v1906_v46  ;;  %v557_v46 = vld [vmem:[#allocation2 + $0x18] sm:$0xff] }
  0x9d   : > { %914 = vmatmul.bf16.vlgmr.msra.gmra.mxu0 %v1803_v56  ;;  %954 = vmatmul.bf16.vlgmr.msra.gmra.mxu2 %v1867_v57  ;;  %v1850_v56 = vld [vmem:[%s2632_s17 + $0x60] sm:$0xf]  ;;  %v2073_v57 = vld [vmem:[%s2632_s17 + $0x64] sm:$0xf0] }
  0x9e   : > { %1003 = vmatmul.bf16.vlgmr.msra.gmra.mxu1 %v1807_v58  ;;  %1043 = vmatmul.bf16.vlgmr.msra.gmra.mxu3 %v1871_v59  ;;  %v1914_v58 = vld [vmem:[%s2632_s17 + $0xe0] sm:$0xf]  ;;  %v2089_v59 = vld [vmem:[%s2632_s17 + $0xe4] sm:$0xf0]  ;;  %v1851_v0 = vor.u32 %v2073_v57, %v1850_v56  ;;  %v558_v56 = vld [vmem:[#allocation2 + $0x50] sm:$0xff] }
  0x9f   : > { %v1915_v1 = vor.u32 %v2089_v59, %v1914_v58 }
  0xad   : > { %919 = vmatmul.bf16.gmra.mxu0 %v1811_v4  ;;  %959 = vmatmul.bf16.gmra.mxu2 %v1875_v5  ;;  %v1858_v4 = vld [vmem:[%s2632_s17 + $0x70] sm:$0xf]  ;;  %v2075_v5 = vld [vmem:[%s2632_s17 + $0x74] sm:$0xf0] }
  0xae   : > { %1008 = vmatmul.bf16.gmra.mxu1 %v1815_v6  ;;  %1048 = vmatmul.bf16.gmra.mxu3 %v1879_v7  ;;  %v1922_v6 = vld [vmem:[%s2632_s17 + $0xf0] sm:$0xf]  ;;  %v2091_v7 = vld [vmem:[%s2632_s17 + $0xf4] sm:$0xf0]  ;;  %v1859_v12 = vor.u32 %v2075_v5, %v1858_v4 }
  0xaf   : > { %v1923_v13 = vor.u32 %v2091_v7, %v1922_v6 }
  0xbd   : > { %924 = vmatmul.bf16.gmra.mxu0 %v1819_v16  ;;  %964 = vmatmul.bf16.gmra.mxu2 %v1883_v17  ;;  %v554_v17 = vld [vmem:[#allocation2 + $0xb0] sm:$0xff] }
  0xbe   : > { %1013 = vmatmul.bf16.gmra.mxu1 %v1823_v18  ;;  %1053 = vmatmul.bf16.gmra.mxu3 %v1887_v19 }
  0xcd   : > { %929 = vmatmul.bf16.gmra.mxu0 %v1827_v28  ;;  %969 = vmatmul.bf16.gmra.mxu2 %v1891_v29 }
  0xce   : > { %1018 = vmatmul.bf16.gmra.mxu1 %v1831_v30  ;;  %1058 = vmatmul.bf16.gmra.mxu3 %v1895_v31 }
  0xdd   : > { %934 = vmatmul.bf16.gmra.mxu0 %v1835_v40  ;;  %974 = vmatmul.bf16.gmra.mxu2 %v1899_v41 }
  0xde   : > { %1023 = vmatmul.bf16.gmra.mxu1 %v1839_v42  ;;  %1063 = vmatmul.bf16.gmra.mxu3 %v1903_v43  ;;  %v572_v42 = vld [vmem:[#allocation2 + $0x40] sm:$0xff] }
  0xed   : > { %939 = vmatmul.bf16.gmra.mxu0 %v1843_v52  ;;  %979 = vmatmul.bf16.gmra.mxu2 %v1907_v53  ;;  %v573_v52 = vld [vmem:[#allocation2 + $0xc8] sm:$0xff] }
  0xee   : > { %1028 = vmatmul.bf16.gmra.mxu1 %v1847_v54  ;;  %1068 = vmatmul.bf16.gmra.mxu3 %v1911_v55 }
  0xfd   : > { %944 = vmatmul.bf16.gmra.mxu0 %v1851_v0  ;;  %984 = vmatmul.bf16.gmra.mxu2 %v1915_v1 }
  0xfe   : > { %1033 = vmatmul.bf16.gmra.mxu1 %v1855_v2  ;;  %1073 = vmatmul.bf16.gmra.mxu3 %v1919_v3  ;;  %v559_v2 = vld [vmem:[#allocation2 + $0x68] sm:$0xff] }
 0x10d   : > { %949 = vmatmul.bf16.gmra.mxu0 %v1859_v12  ;;  %989 = vmatmul.bf16.gmra.mxu2 %v1923_v13  ;;  %v560_v12 = vld [vmem:[#allocation2 + $0x30] sm:$0xff] }
 0x10e   : > { %1038 = vmatmul.bf16.gmra.mxu1 %v1863_v14  ;;  %1078 = vmatmul.bf16.gmra.mxu3 %v1927_v15 }
 0x11a   : > { %v915_v16 = vpop.f32.mrf.mxu0 }
 0x11b   : > { %v1004_v18 = vpop.f32.mrf.mxu1 }
 0x11c   : > { %v1005_v19 = vadd.f32 %v1004_v18, %v915_v16  ;;  %v576_v18 = vld [vmem:[#allocation2 + $0x70] sm:$0xff] }
 0x11e   : > { %v1084_v20 = vadd.f32 %v1005_v19, %v554_v17 }
 0x120   : > { %1116 = vst [vmem:[#allocation2 + $0xb0] sm:$0xff] %v1084_v20  ;;  %v955_v21 = vpop.f32.mrf.mxu2 }
 0x121   : > { %v1044_v23 = vpop.f32.mrf.mxu3 }
 0x122   : > { %v1045_v24 = vadd.f32 %v1044_v23, %v955_v21  ;;  %v917_v25 = vpop.f32.mrf.mxu0 }
 0x123   : > { %v1006_v27 = vpop.f32.mrf.mxu1 }
 0x124   : > { %v1100_v28 = vadd.f32 %v1045_v24, %v570_v22  ;;  %v1007_v29 = vadd.f32 %v1006_v27, %v917_v25  ;;  %v561_v22 = vld [vmem:[#allocation2 + $0x48] sm:$0xff] }
 0x126   : > { %1132 = vst [vmem:[#allocation2 + $0x38] sm:$0xff] %v1100_v28  ;;  %v1085_v30 = vadd.f32 %v1007_v29, %v555_v26  ;;  %v577_v28 = vld [vmem:[#allocation2 + $0xc0] sm:$0xff] }
 0x128   : > { %1117 = vst [vmem:[#allocation2] sm:$0xff] %v1085_v30  ;;  %v957_v31 = vpop.f32.mrf.mxu2 }
 0x129   : > { %v1046_v33 = vpop.f32.mrf.mxu3 }
 0x12a   : > { %v1047_v34 = vadd.f32 %v1046_v33, %v957_v31  ;;  %v920_v35 = vpop.f32.mrf.mxu0 }
 0x12b   : > { %v1009_v37 = vpop.f32.mrf.mxu1 }
 0x12c   : > { %v1101_v38 = vadd.f32 %v1047_v34, %v571_v32  ;;  %v1010_v39 = vadd.f32 %v1009_v37, %v920_v35  ;;  %v562_v32 = vld [vmem:[#allocation2 + $0x80] sm:$0xff] }
 0x12e   : > { %1133 = vst [vmem:[#allocation2 + $0x58] sm:$0xff] %v1101_v38  ;;  %v1086_v40 = vadd.f32 %v1010_v39, %v556_v36  ;;  %v578_v38 = vld [vmem:[#allocation2 + $0xa8] sm:$0xff] }
 0x130   : > { %1118 = vst [vmem:[#allocation2 + $0xd8] sm:$0xff] %v1086_v40  ;;  %v960_v41 = vpop.f32.mrf.mxu2 }
 0x131   : > { %v1049_v43 = vpop.f32.mrf.mxu3 }
 0x132   : > { %v1050_v44 = vadd.f32 %v1049_v43, %v960_v41  ;;  %v922_v45 = vpop.f32.mrf.mxu0 }
 0x133   : > { %v1011_v47 = vpop.f32.mrf.mxu1 }
 0x134   : > { %v1102_v48 = vadd.f32 %v1050_v44, %v572_v42  ;;  %v1012_v49 = vadd.f32 %v1011_v47, %v922_v45  ;;  %v563_v42 = vld [vmem:[#allocation2 + $0x88] sm:$0xff] }
 0x136   : > { %1134 = vst [vmem:[#allocation2 + $0x40] sm:$0xff] %v1102_v48  ;;  %v1087_v50 = vadd.f32 %v1012_v49, %v557_v46  ;;  %v579_v48 = vld [vmem:[#allocation2 + $0xd0] sm:$0xff] }
 0x138   : > { %1119 = vst [vmem:[#allocation2 + $0x18] sm:$0xff] %v1087_v50  ;;  %v962_v51 = vpop.f32.mrf.mxu2 }
 0x139   : > { %v1051_v53 = vpop.f32.mrf.mxu3 }
 0x13a   : > { %v1052_v54 = vadd.f32 %v1051_v53, %v962_v51  ;;  %v925_v55 = vpop.f32.mrf.mxu0 }
 0x13b   : > { %v1014_v57 = vpop.f32.mrf.mxu1 }
 0x13c   : > { %v1103_v58 = vadd.f32 %v1052_v54, %v573_v52  ;;  %v1015_v59 = vadd.f32 %v1014_v57, %v925_v55  ;;  %v564_v52 = vld [vmem:[#allocation2 + $0xe8] sm:$0xff] }
 0x13e   : > { %1135 = vst [vmem:[#allocation2 + $0xc8] sm:$0xff] %v1103_v58  ;;  %v1088_v60 = vadd.f32 %v1015_v59, %v558_v56  ;;  %v580_v58 = vld [vmem:[#allocation2 + $0x10] sm:$0xff] }
 0x140   : > { %1120 = vst [vmem:[#allocation2 + $0x50] sm:$0xff] %v1088_v60  ;;  %v965_v61 = vpop.f32.mrf.mxu2 }
 0x141   : > { %v1054_v63 = vpop.f32.mrf.mxu3 }
 0x142   : > { %v1055_v0 = vadd.f32 %v1054_v63, %v965_v61  ;;  %v927_v1 = vpop.f32.mrf.mxu0 }
 0x143   : > { %v1016_v3 = vpop.f32.mrf.mxu1 }
 0x144   : > { %v1104_v4 = vadd.f32 %v1055_v0, %v574_v62  ;;  %v1017_v5 = vadd.f32 %v1016_v3, %v927_v1  ;;  %v565_v62 = vld [vmem:[#allocation2 + $0xb8] sm:$0xff] }
 0x146   : > { %1136 = vst [vmem:[#allocation2 + $0xe0] sm:$0xff] %v1104_v4  ;;  %v1089_v6 = vadd.f32 %v1017_v5, %v559_v2  ;;  %v581_v4 = vld [vmem:[#allocation2 + $0x28] sm:$0xff] }
 0x148   : > { %1121 = vst [vmem:[#allocation2 + $0x68] sm:$0xff] %v1089_v6  ;;  %v967_v7 = vpop.f32.mrf.mxu2 }
 0x149   : > { %v1056_v9 = vpop.f32.mrf.mxu3 }
 0x14a   : > { %v1057_v10 = vadd.f32 %v1056_v9, %v967_v7  ;;  %v930_v11 = vpop.f32.mrf.mxu0 }
 0x14b   : > { %v1019_v13 = vpop.f32.mrf.mxu1 }
 0x14c   : > { %v1105_v14 = vadd.f32 %v1057_v10, %v575_v8  ;;  %v1020_v15 = vadd.f32 %v1019_v13, %v930_v11  ;;  %v566_v8 = vld [vmem:[#allocation2 + $0x60] sm:$0xff] }
 0x14e   : > { %1137 = vst [vmem:[#allocation2 + $0x90] sm:$0xff] %v1105_v14  ;;  %v1090_v16 = vadd.f32 %v1020_v15, %v560_v12  ;;  %v582_v14 = vld [vmem:[#allocation2 + $0xa0] sm:$0xff] }
 0x150   : > { %1122 = vst [vmem:[#allocation2 + $0x30] sm:$0xff] %v1090_v16  ;;  %v970_v17 = vpop.f32.mrf.mxu2 }
 0x151   : > { %v1059_v19 = vpop.f32.mrf.mxu3 }
 0x152   : > { %v1060_v20 = vadd.f32 %v1059_v19, %v970_v17  ;;  %v932_v21 = vpop.f32.mrf.mxu0 }
 0x153   : > { %v1021_v23 = vpop.f32.mrf.mxu1 }
 0x154   : > { %v1106_v24 = vadd.f32 %v1060_v20, %v576_v18  ;;  %v1022_v25 = vadd.f32 %v1021_v23, %v932_v21  ;;  %v567_v18 = vld [vmem:[#allocation2 + $0xf0] sm:$0xff] }
 0x156   : > { %1138 = vst [vmem:[#allocation2 + $0x70] sm:$0xff] %v1106_v24  ;;  %v1091_v26 = vadd.f32 %v1022_v25, %v561_v22  ;;  %v583_v24 = vld [vmem:[#allocation2 + $0xf8] sm:$0xff] }
 0x158   : > { %1123 = vst [vmem:[#allocation2 + $0x48] sm:$0xff] %v1091_v26  ;;  %v972_v27 = vpop.f32.mrf.mxu2 }
 0x159   : > { %v1061_v29 = vpop.f32.mrf.mxu3 }
 0x15a   : > { %v1062_v30 = vadd.f32 %v1061_v29, %v972_v27  ;;  %v935_v31 = vpop.f32.mrf.mxu0 }
 0x15b   : > { %v1024_v33 = vpop.f32.mrf.mxu1 }
 0x15c   : > { %v1107_v34 = vadd.f32 %v1062_v30, %v577_v28  ;;  %v1025_v35 = vadd.f32 %v1024_v33, %v935_v31  ;;  %v568_v28 = vld [vmem:[#allocation2 + $0x8] sm:$0xff] }
 0x15e   : > { %1139 = vst [vmem:[#allocation2 + $0xc0] sm:$0xff] %v1107_v34  ;;  %v1092_v36 = vadd.f32 %v1025_v35, %v562_v32  ;;  %v584_v34 = vld [vmem:[#allocation2 + $0x20] sm:$0xff] }
 0x160   : > { %1124 = vst [vmem:[#allocation2 + $0x80] sm:$0xff] %v1092_v36  ;;  %v975_v37 = vpop.f32.mrf.mxu2 }
 0x161   : > { %v1064_v39 = vpop.f32.mrf.mxu3 }
 0x162   : > { %v1065_v40 = vadd.f32 %v1064_v39, %v975_v37  ;;  %v937_v41 = vpop.f32.mrf.mxu0 }
 0x163   : > { %v1026_v43 = vpop.f32.mrf.mxu1 }
 0x164   : > { %v1108_v44 = vadd.f32 %v1065_v40, %v578_v38  ;;  %v1027_v45 = vadd.f32 %v1026_v43, %v937_v41  ;;  %v569_v38 = vld [vmem:[#allocation2 + $0x78] sm:$0xff] }
 0x166   : > { %1140 = vst [vmem:[#allocation2 + $0xa8] sm:$0xff] %v1108_v44  ;;  %v1093_v46 = vadd.f32 %v1027_v45, %v563_v42  ;;  %v585_v44 = vld [vmem:[#allocation2 + $0x98] sm:$0xff] }
 0x168   : > { %1125 = vst [vmem:[#allocation2 + $0x88] sm:$0xff] %v1093_v46  ;;  %v977_v47 = vpop.f32.mrf.mxu2 }
 0x169   : > { %v1066_v49 = vpop.f32.mrf.mxu3 }
 0x16a   : > { %v1067_v50 = vadd.f32 %v1066_v49, %v977_v47  ;;  %v940_v51 = vpop.f32.mrf.mxu0 }
 0x16b   : > { %v1029_v53 = vpop.f32.mrf.mxu1 }
 0x16c   : > { %v1109_v54 = vadd.f32 %v1067_v50, %v579_v48  ;;  %v1030_v55 = vadd.f32 %v1029_v53, %v940_v51 }
 0x16e   : > { %1141 = vst [vmem:[#allocation2 + $0xd0] sm:$0xff] %v1109_v54  ;;  %v1094_v56 = vadd.f32 %v1030_v55, %v564_v52 }
 0x170   : > { %1126 = vst [vmem:[#allocation2 + $0xe8] sm:$0xff] %v1094_v56  ;;  %v980_v57 = vpop.f32.mrf.mxu2 }
 0x171   : > { %v1069_v59 = vpop.f32.mrf.mxu3 }
 0x172   : > { %v1070_v60 = vadd.f32 %v1069_v59, %v980_v57  ;;  %v942_v61 = vpop.f32.mrf.mxu0 }
 0x173   : > { %v1031_v63 = vpop.f32.mrf.mxu1 }
 0x174   : > { %v1110_v0 = vadd.f32 %v1070_v60, %v580_v58  ;;  %v1032_v1 = vadd.f32 %v1031_v63, %v942_v61 }
 0x176   : > { %1142 = vst [vmem:[#allocation2 + $0x10] sm:$0xff] %v1110_v0  ;;  %v1095_v2 = vadd.f32 %v1032_v1, %v565_v62 }
 0x178   : > { %1127 = vst [vmem:[#allocation2 + $0xb8] sm:$0xff] %v1095_v2  ;;  %v982_v3 = vpop.f32.mrf.mxu2 }
 0x179   : > { %v1071_v5 = vpop.f32.mrf.mxu3 }
 0x17a   : > { %v1072_v6 = vadd.f32 %v1071_v5, %v982_v3  ;;  %v945_v7 = vpop.f32.mrf.mxu0 }
 0x17b   : > { %v1034_v9 = vpop.f32.mrf.mxu1 }
 0x17c   : > { %v1111_v10 = vadd.f32 %v1072_v6, %v581_v4  ;;  %v1035_v11 = vadd.f32 %v1034_v9, %v945_v7 }
 0x17e   : > { %1143 = vst [vmem:[#allocation2 + $0x28] sm:$0xff] %v1111_v10  ;;  %v1096_v12 = vadd.f32 %v1035_v11, %v566_v8 }
 0x180   : > { %1128 = vst [vmem:[#allocation2 + $0x60] sm:$0xff] %v1096_v12  ;;  %v985_v13 = vpop.f32.mrf.mxu2 }
 0x181   : > { %v1074_v15 = vpop.f32.mrf.mxu3 }
 0x182   : > { %v1075_v16 = vadd.f32 %v1074_v15, %v985_v13  ;;  %v947_v17 = vpop.f32.mrf.mxu0 }
 0x183   : > { %v1036_v19 = vpop.f32.mrf.mxu1 }
 0x184   : > { %v1112_v20 = vadd.f32 %v1075_v16, %v582_v14  ;;  %v1037_v21 = vadd.f32 %v1036_v19, %v947_v17 }
 0x186   : > { %1144 = vst [vmem:[#allocation2 + $0xa0] sm:$0xff] %v1112_v20  ;;  %v1097_v22 = vadd.f32 %v1037_v21, %v567_v18 }
 0x188   : > { %1129 = vst [vmem:[#allocation2 + $0xf0] sm:$0xff] %v1097_v22  ;;  %v987_v23 = vpop.f32.mrf.mxu2 }
 0x189   : > { %v1076_v25 = vpop.f32.mrf.mxu3 }
 0x18a   : > { %v1077_v26 = vadd.f32 %v1076_v25, %v987_v23  ;;  %v950_v27 = vpop.f32.mrf.mxu0 }
 0x18b   : > { %v1039_v29 = vpop.f32.mrf.mxu1 }
 0x18c   : > { %v1113_v30 = vadd.f32 %v1077_v26, %v583_v24  ;;  %v1040_v31 = vadd.f32 %v1039_v29, %v950_v27 }
 0x18e   : > { %1145 = vst [vmem:[#allocation2 + $0xf8] sm:$0xff] %v1113_v30  ;;  %v1098_v32 = vadd.f32 %v1040_v31, %v568_v28 }
 0x190   : > { %1130 = vst [vmem:[#allocation2 + $0x8] sm:$0xff] %v1098_v32  ;;  %v990_v33 = vpop.f32.mrf.mxu2 }
 0x191   : > { %v1079_v35 = vpop.f32.mrf.mxu3 }
 0x192   : > { %v1080_v36 = vadd.f32 %v1079_v35, %v990_v33  ;;  %v952_v37 = vpop.f32.mrf.mxu0 }
 0x193   : > { %v1041_v39 = vpop.f32.mrf.mxu1 }
 0x194   : > { %v1114_v40 = vadd.f32 %v1080_v36, %v584_v34  ;;  %v1042_v41 = vadd.f32 %v1041_v39, %v952_v37 }
 0x196   : > { %1146 = vst [vmem:[#allocation2 + $0x20] sm:$0xff] %v1114_v40  ;;  %v1099_v42 = vadd.f32 %v1042_v41, %v569_v38 }
 0x198   : > { %1131 = vst [vmem:[#allocation2 + $0x78] sm:$0xff] %v1099_v42  ;;  %v992_v43 = vpop.f32.mrf.mxu2 }
 0x199   : > { %v1081_v45 = vpop.f32.mrf.mxu3 }
 0x19a   : > { %v1082_v46 = vadd.f32 %v1081_v45, %v992_v43 }
 0x19c   : > { %v1115_v47 = vadd.f32 %v1082_v46, %v585_v44 }
 0x19e   : > { %1147 = vst [vmem:[#allocation2 + $0x98] sm:$0xff] %v1115_v47 }
 0x19f PF: > { %p1992_p12 = scmp.ne.s32.totalorder %s2450_s26, 3 }
 0x1a1   : > { %1151 = sbr.rel (%p1992_p12) target bundleno = 710 (0x2c6), region = 60 }
 0x1a6   : > { %v2115_v48 = vld [vmem:[%s2939_s6 + $0x38] sm:$0xff]  ;;  %v2114_v50 = vld [vmem:[%s2939_s6 + $0x30] sm:$0xff]  ;;  %v2113_v52 = vld [vmem:[%s2939_s6 + $0x28] sm:$0xff] }
 0x1a7   : > { %v2123_v49 = vld [vmem:[%s2940_s7 + $0x38] sm:$0xff]  ;;  %1300 = vmatpush.bf16.msra.mxu0 %v2115_v48  ;;  %2235 = vmatpush.bf16.msra.mxu2 %v2115_v48  ;;  %v2122_v51 = vld [vmem:[%s2940_s7 + $0x30] sm:$0xff]  ;;  %v2121_v53 = vld [vmem:[%s2940_s7 + $0x28] sm:$0xff] }
 0x1a8   : > { %1485 = vmatpush.bf16.msra.mxu1 %v2123_v49  ;;  %2243 = vmatpush.bf16.msra.mxu3 %v2123_v49  ;;  %v2112_v54 = vld [vmem:[%s2939_s6 + $0x20] sm:$0xff]  ;;  %v2111_v56 = vld [vmem:[%s2939_s6 + $0x18] sm:$0xff]  ;;  %v2110_v58 = vld [vmem:[%s2939_s6 + $0x10] sm:$0xff] }
 0x1a9   : > { %v2120_v55 = vld [vmem:[%s2940_s7 + $0x20] sm:$0xff]  ;;  %v2119_v57 = vld [vmem:[%s2940_s7 + $0x18] sm:$0xff]  ;;  %v2118_v59 = vld [vmem:[%s2940_s7 + $0x10] sm:$0xff] }
 0x1aa   : > { %v2109_v60 = vld [vmem:[%s2939_s6 + $0x8] sm:$0xff]  ;;  %v1152_v61 = vld [vmem:[#allocation2 + $0xb0] sm:$0xff]  ;;  %v1153_v62 = vld [vmem:[#allocation2] sm:$0xff] }
 0x1ab   : > { %1301 = vmatpush.bf16.msra.mxu0 %v2114_v50  ;;  %2236 = vmatpush.bf16.msra.mxu2 %v2114_v50  ;;  %v1168_v63 = vld [vmem:[#allocation2 + $0x38] sm:$0xff]  ;;  %v2117_v1 = vld [vmem:[%s2940_s7 + $0x8] sm:$0xff]  ;;  %v1184_v2 = vmax.f32 %v1152_v61, 0.0  ;;  %v1185_v3 = vmax.f32 %v1153_v62, 0.0  ;;  %v2108_v6 = vld [vmem:[%s2939_s6] sm:$0xff] }
 0x1ac   : > { %1486 = vmatpush.bf16.msra.mxu1 %v2122_v51  ;;  %2244 = vmatpush.bf16.msra.mxu3 %v2122_v51  ;;  %v1169_v0 = vld [vmem:[#allocation2 + $0x58] sm:$0xff]  ;;  %v1200_v4 = vmax.f32 %v1168_v63, 0.0  ;;  %v2116_v7 = vld [vmem:[%s2940_s7] sm:$0xff]  ;;  %v1171_v13 = vld [vmem:[#allocation2 + $0xc8] sm:$0xff] }
 0x1ad   : > { %v1201_v5 = vmax.f32 %v1169_v0, 0.0  ;;  %v1216_v8 = vpack.c.bf16 %v1185_v3, %v1184_v2  ;;  %v1154_v10 = vld [vmem:[#allocation2 + $0xd8] sm:$0xff]  ;;  %v1170_v12 = vld [vmem:[#allocation2 + $0x40] sm:$0xff]  ;;  %v1203_v17 = vmax.f32 %v1171_v13, 0.0  ;;  %v1156_v20 = vld [vmem:[#allocation2 + $0x50] sm:$0xff] }
 0x1ae   : > { %v1155_v11 = vld [vmem:[#allocation2 + $0x18] sm:$0xff]  ;;  %v1186_v14 = vmax.f32 %v1154_v10, 0.0  ;;  %v1202_v16 = vmax.f32 %v1170_v12, 0.0  ;;  %v1157_v21 = vld [vmem:[#allocation2 + $0x68] sm:$0xff]  ;;  %v1172_v22 = vld [vmem:[#allocation2 + $0xe0] sm:$0xff]  ;;  %v1188_v24 = vmax.f32 %v1156_v20, 0.0 }
 0x1af   : > { %1302 = vmatpush.bf16.msra.mxu0 %v2113_v52  ;;  %2237 = vmatpush.bf16.msra.mxu2 %v2113_v52  ;;  %v1224_v9 = vpack.c.bf16 %v1201_v5, %v1200_v4  ;;  %v1187_v15 = vmax.f32 %v1155_v11, 0.0  ;;  %v1173_v23 = vld [vmem:[#allocation2 + $0x90] sm:$0xff]  ;;  %v1189_v25 = vmax.f32 %v1157_v21, 0.0  ;;  %v1204_v26 = vmax.f32 %v1172_v22, 0.0  ;;  %v1159_v31 = vld [vmem:[#allocation2 + $0x48] sm:$0xff]  ;;  %v1175_v33 = vld [vmem:[#allocation2 + $0xc0] sm:$0xff] }
 0x1b0   : > { %1487 = vmatpush.bf16.msra.mxu1 %v2121_v53  ;;  %2245 = vmatpush.bf16.msra.mxu3 %v2121_v53  ;;  %v1225_v19 = vpack.c.bf16 %v1203_v17, %v1202_v16  ;;  %v1205_v27 = vmax.f32 %v1173_v23, 0.0  ;;  %v1158_v30 = vld [vmem:[#allocation2 + $0x30] sm:$0xff]  ;;  %v1191_v35 = vmax.f32 %v1159_v31, 0.0  ;;  %v1207_v37 = vmax.f32 %v1175_v33, 0.0  ;;  %v1160_v40 = vld [vmem:[#allocation2 + $0x80] sm:$0xff]  ;;  %v1161_v41 = vld [vmem:[#allocation2 + $0x88] sm:$0xff] }
 0x1b1   : > { %v1217_v18 = vpack.c.bf16 %v1187_v15, %v1186_v14  ;;  %v1218_v28 = vpack.c.bf16 %v1189_v25, %v1188_v24  ;;  %v1174_v32 = vld [vmem:[#allocation2 + $0x70] sm:$0xff]  ;;  %v1190_v34 = vmax.f32 %v1158_v30, 0.0  ;;  %v1176_v42 = vld [vmem:[#allocation2 + $0xa8] sm:$0xff]  ;;  %v1192_v44 = vmax.f32 %v1160_v40, 0.0  ;;  %v1163_v51 = vld [vmem:[#allocation2 + $0xb8] sm:$0xff] }
 0x1b2   : > { %v1226_v29 = vpack.c.bf16 %v1205_v27, %v1204_v26  ;;  %v1206_v36 = vmax.f32 %v1174_v32, 0.0  ;;  %v1177_v43 = vld [vmem:[#allocation2 + $0xd0] sm:$0xff]  ;;  %v1193_v45 = vmax.f32 %v1161_v41, 0.0  ;;  %v1208_v46 = vmax.f32 %v1176_v42, 0.0  ;;  %v1162_v50 = vld [vmem:[#allocation2 + $0xe8] sm:$0xff]  ;;  %v1180_v62 = vld [vmem:[#allocation2 + $0xa0] sm:$0xff] }
 0x1b3   : > { %1303 = vmatpush.bf16.msra.mxu0 %v2112_v54  ;;  %2238 = vmatpush.bf16.msra.mxu2 %v2112_v54  ;;  %v1219_v38 = vpack.c.bf16 %v1191_v35, %v1190_v34  ;;  %v1209_v47 = vmax.f32 %v1177_v43, 0.0  ;;  %v1178_v52 = vld [vmem:[#allocation2 + $0x10] sm:$0xff]  ;;  %v1179_v53 = vld [vmem:[#allocation2 + $0x28] sm:$0xff]  ;;  %v1194_v54 = vmax.f32 %v1162_v50, 0.0  ;;  %v1181_v63 = vld [vmem:[#allocation2 + $0xf8] sm:$0xff]  ;;  %v1212_v2 = vmax.f32 %v1180_v62, 0.0 }
 0x1b4   : > { %1488 = vmatpush.bf16.msra.mxu1 %v2120_v55  ;;  %2246 = vmatpush.bf16.msra.mxu3 %v2120_v55  ;;  %v1227_v39 = vpack.c.bf16 %v1207_v37, %v1206_v36  ;;  %v1220_v48 = vpack.c.bf16 %v1193_v45, %v1192_v44  ;;  %v1195_v55 = vmax.f32 %v1163_v51, 0.0  ;;  %v1165_v61 = vld [vmem:[#allocation2 + $0xf0] sm:$0xff]  ;;  %v1213_v3 = vmax.f32 %v1181_v63, 0.0  ;;  %v2829_v16 = vld [vmem:[%s2941_s8] ss:$0 sm:$0xff] }
 0x1b5   : > { %v1228_v49 = vpack.c.bf16 %v1209_v47, %v1208_v46 }
 0x1b6   : > { %v1230_v5 = vpack.c.bf16 %v1213_v3, %v1212_v2 }
 0x1b7   : > { %1304 = vmatpush.bf16.msra.mxu0 %v2111_v56  ;;  %2239 = vmatpush.bf16.msra.mxu2 %v2111_v56  ;;  %v1210_v56 = vmax.f32 %v1178_v52, 0.0 }
 0x1b8   : > { %1489 = vmatpush.bf16.msra.mxu1 %v2119_v57  ;;  %2247 = vmatpush.bf16.msra.mxu3 %v2119_v57  ;;  %v1211_v57 = vmax.f32 %v1179_v53, 0.0 }
 0x1bb   : > { %1305 = vmatpush.bf16.msra.mxu0 %v2110_v58  ;;  %2240 = vmatpush.bf16.msra.mxu2 %v2110_v58  ;;  %v1221_v58 = vpack.c.bf16 %v1195_v55, %v1194_v54 }
 0x1bc   : > { %1490 = vmatpush.bf16.msra.mxu1 %v2118_v59  ;;  %2248 = vmatpush.bf16.msra.mxu3 %v2118_v59  ;;  %v1229_v59 = vpack.c.bf16 %v1211_v57, %v1210_v56 }
 0x1bf   : > { %1306 = vmatpush.bf16.msra.mxu0 %v2109_v60  ;;  %2241 = vmatpush.bf16.msra.mxu2 %v2109_v60  ;;  %v1164_v60 = vld [vmem:[#allocation2 + $0x60] sm:$0xff] }
 0x1c0   : > { %1491 = vmatpush.bf16.msra.mxu1 %v2117_v1  ;;  %2249 = vmatpush.bf16.msra.mxu3 %v2117_v1  ;;  %v1196_v0 = vmax.f32 %v1164_v60, 0.0  ;;  %v1197_v1 = vmax.f32 %v1165_v61, 0.0 }
 0x1c2   : > { %v1222_v4 = vpack.c.bf16 %v1197_v1, %v1196_v0 }
 0x1c3   : > { %1307 = vmatpush.bf16.msra.mxu0 %v2108_v6  ;;  %2242 = vmatpush.bf16.msra.mxu2 %v2108_v6  ;;  %v1166_v6 = vld [vmem:[#allocation2 + $0x8] sm:$0xff] }
 0x1c4   : > { %1492 = vmatpush.bf16.msra.mxu1 %v2116_v7  ;;  %2250 = vmatpush.bf16.msra.mxu3 %v2116_v7  ;;  %v1167_v7 = vld [vmem:[#allocation2 + $0x78] sm:$0xff]  ;;  %v1198_v10 = vmax.f32 %v1166_v6, 0.0 }
 0x1c5   : > { %v1199_v11 = vmax.f32 %v1167_v7, 0.0 }
 0x1c6   : > { %1308 = vmatmul.bf16.vlgmr.msra.gmra.mxu0 %v1216_v8  ;;  %1348 = vmatmul.bf16.vlgmr.msra.gmra.mxu2 %v1224_v9 }
 0x1c7   : > { %1493 = vmatmul.bf16.vlgmr.msra.gmra.mxu1 %v1216_v8  ;;  %1533 = vmatmul.bf16.vlgmr.msra.gmra.mxu3 %v1224_v9  ;;  %v1182_v8 = vld [vmem:[#allocation2 + $0x20] sm:$0xff]  ;;  %v1183_v9 = vld [vmem:[#allocation2 + $0x98] sm:$0xff]  ;;  %v1223_v14 = vpack.c.bf16 %v1199_v11, %v1198_v10 }
 0x1c8   : > { %v1214_v12 = vmax.f32 %v1182_v8, 0.0  ;;  %v1215_v13 = vmax.f32 %v1183_v9, 0.0 }
 0x1ca   : > { %v1231_v15 = vpack.c.bf16 %v1215_v13, %v1214_v12 }
 0x1d6   : > { %1313 = vmatmul.bf16.gmra.mxu0 %v1217_v18  ;;  %1353 = vmatmul.bf16.gmra.mxu2 %v1225_v19 }
 0x1d7   : > { %1498 = vmatmul.bf16.gmra.mxu1 %v1217_v18  ;;  %1538 = vmatmul.bf16.gmra.mxu3 %v1225_v19 }
 0x1e6   : > { %1318 = vmatmul.bf16.gmra.mxu0 %v1218_v28  ;;  %1358 = vmatmul.bf16.gmra.mxu2 %v1226_v29 }
 0x1e7   : > { %1503 = vmatmul.bf16.gmra.mxu1 %v1218_v28  ;;  %1543 = vmatmul.bf16.gmra.mxu3 %v1226_v29 }
 0x1f6   : > { %1323 = vmatmul.bf16.gmra.mxu0 %v1219_v38  ;;  %1363 = vmatmul.bf16.gmra.mxu2 %v1227_v39 }
 0x1f7   : > { %1508 = vmatmul.bf16.gmra.mxu1 %v1219_v38  ;;  %1548 = vmatmul.bf16.gmra.mxu3 %v1227_v39 }
 0x206   : > { %1328 = vmatmul.bf16.gmra.mxu0 %v1220_v48  ;;  %1368 = vmatmul.bf16.gmra.mxu2 %v1228_v49 }
 0x207   : > { %1513 = vmatmul.bf16.gmra.mxu1 %v1220_v48  ;;  %1553 = vmatmul.bf16.gmra.mxu3 %v1228_v49 }
 0x216   : > { %1333 = vmatmul.bf16.gmra.mxu0 %v1221_v58  ;;  %1373 = vmatmul.bf16.gmra.mxu2 %v1229_v59 }
 0x217   : > { %1518 = vmatmul.bf16.gmra.mxu1 %v1221_v58  ;;  %1558 = vmatmul.bf16.gmra.mxu3 %v1229_v59 }
 0x226   : > { %1338 = vmatmul.bf16.gmra.mxu0 %v1222_v4  ;;  %1378 = vmatmul.bf16.gmra.mxu2 %v1230_v5 }
 0x227   : > { %1523 = vmatmul.bf16.gmra.mxu1 %v1222_v4  ;;  %1563 = vmatmul.bf16.gmra.mxu3 %v1230_v5 }
 0x236   : > { %1343 = vmatmul.bf16.gmra.mxu0 %v1223_v14  ;;  %1383 = vmatmul.bf16.gmra.mxu2 %v1231_v15 }
 0x237   : > { %1528 = vmatmul.bf16.gmra.mxu1 %v1223_v14  ;;  %1568 = vmatmul.bf16.gmra.mxu3 %v1231_v15 }
 0x243   : > { %v1309_v17 = vpop.f32.mrf.mxu0 }
 0x244   : > { %v1310_v18 = vadd.f32 %v2829_v16, %v1309_v17  ;;  %v1494_v19 = vpop.f32.mrf.mxu1 }
 0x246   : > { %1389 = vst [vmem:[%s2650_s24] sm:$0xff] %v1310_v18 }
 0x249   : > { %v1349_v20 = vpop.f32.mrf.mxu2 }
 0x24a   : > { %v1350_v21 = vadd.f32 %v2829_v16, %v1349_v20  ;;  %v1534_v22 = vpop.f32.mrf.mxu3 }
 0x24b   : > { %v1311_v23 = vpop.f32.mrf.mxu0 }
 0x24c   : > { %1405 = vst [vmem:[%s2650_s24 + $0x80] sm:$0xff] %v1350_v21  ;;  %v1312_v24 = vadd.f32 %v2829_v16, %v1311_v23  ;;  %v1496_v25 = vpop.f32.mrf.mxu1 }
 0x24d   : > { %v2127_v26 = vpack.c.bf16 %v1496_v25, %v1494_v19 }
 0x24e   : > { %1390 = vst [vmem:[%s2650_s24 + $0x8] sm:$0xff] %v1312_v24 }
 0x24f   : > { %2128 = vst [vmem:[%s2655_s28] sm:$0xff] %v2127_v26  }
 0x251   : > { %v1351_v27 = vpop.f32.mrf.mxu2 }
 0x252   : > { %v1352_v28 = vadd.f32 %v2829_v16, %v1351_v27  ;;  %v1536_v29 = vpop.f32.mrf.mxu3 }
 0x253   : > { %v2167_v30 = vpack.c.bf16 %v1536_v29, %v1534_v22  ;;  %v1314_v31 = vpop.f32.mrf.mxu0 }
 0x254   : > { %1406 = vst [vmem:[%s2650_s24 + $0x88] sm:$0xff] %v1352_v28  ;;  %v1315_v32 = vadd.f32 %v2829_v16, %v1314_v31  ;;  %v1499_v33 = vpop.f32.mrf.mxu1 }
 0x255   : > { %2211 = vst [vmem:[%s2655_s28 + $0x40] sm:$0xff] %v2167_v30  }
 0x256   : > { %1391 = vst [vmem:[%s2650_s24 + $0x10] sm:$0xff] %v1315_v32 }
 0x259   : > { %v1354_v34 = vpop.f32.mrf.mxu2 }
 0x25a   : > { %v1355_v35 = vadd.f32 %v2829_v16, %v1354_v34  ;;  %v1539_v36 = vpop.f32.mrf.mxu3 }
 0x25b   : > { %v1316_v37 = vpop.f32.mrf.mxu0 }
 0x25c   : > { %1407 = vst [vmem:[%s2650_s24 + $0x90] sm:$0xff] %v1355_v35  ;;  %v1317_v38 = vadd.f32 %v2829_v16, %v1316_v37  ;;  %v1501_v39 = vpop.f32.mrf.mxu1 }
 0x25d   : > { %v2132_v40 = vpack.c.bf16 %v1501_v39, %v1499_v33 }
 0x25e   : > { %1392 = vst [vmem:[%s2650_s24 + $0x18] sm:$0xff] %v1317_v38 }
 0x25f   : > { %2204 = vst [vmem:[%s2655_s28 + $0x8] sm:$0xff] %v2132_v40  }
 0x261   : > { %v1356_v41 = vpop.f32.mrf.mxu2 }
 0x262   : > { %v1357_v42 = vadd.f32 %v2829_v16, %v1356_v41  ;;  %v1541_v43 = vpop.f32.mrf.mxu3 }
 0x263   : > { %v2172_v44 = vpack.c.bf16 %v1541_v43, %v1539_v36  ;;  %v1319_v45 = vpop.f32.mrf.mxu0 }
 0x264   : > { %1408 = vst [vmem:[%s2650_s24 + $0x98] sm:$0xff] %v1357_v42  ;;  %v1320_v46 = vadd.f32 %v2829_v16, %v1319_v45  ;;  %v1504_v47 = vpop.f32.mrf.mxu1 }
 0x265   : > { %2212 = vst [vmem:[%s2655_s28 + $0x48] sm:$0xff] %v2172_v44  }
 0x266   : > { %1393 = vst [vmem:[%s2650_s24 + $0x20] sm:$0xff] %v1320_v46 }
 0x269   : > { %v1359_v48 = vpop.f32.mrf.mxu2 }
 0x26a   : > { %v1360_v49 = vadd.f32 %v2829_v16, %v1359_v48  ;;  %v1544_v50 = vpop.f32.mrf.mxu3 }
 0x26b   : > { %v1321_v51 = vpop.f32.mrf.mxu0 }
 0x26c   : > { %1409 = vst [vmem:[%s2650_s24 + $0xa0] sm:$0xff] %v1360_v49  ;;  %v1322_v52 = vadd.f32 %v2829_v16, %v1321_v51  ;;  %v1506_v53 = vpop.f32.mrf.mxu1 }
 0x26d   : > { %v2137_v54 = vpack.c.bf16 %v1506_v53, %v1504_v47 }
 0x26e   : > { %1394 = vst [vmem:[%s2650_s24 + $0x28] sm:$0xff] %v1322_v52 }
 0x26f   : > { %2205 = vst [vmem:[%s2655_s28 + $0x10] sm:$0xff] %v2137_v54  }
 0x271   : > { %v1361_v55 = vpop.f32.mrf.mxu2 }
 0x272   : > { %v1362_v56 = vadd.f32 %v2829_v16, %v1361_v55  ;;  %v1546_v57 = vpop.f32.mrf.mxu3 }
 0x273   : > { %v2177_v58 = vpack.c.bf16 %v1546_v57, %v1544_v50  ;;  %v1324_v59 = vpop.f32.mrf.mxu0 }
 0x274   : > { %1410 = vst [vmem:[%s2650_s24 + $0xa8] sm:$0xff] %v1362_v56  ;;  %v1325_v60 = vadd.f32 %v2829_v16, %v1324_v59  ;;  %v1509_v61 = vpop.f32.mrf.mxu1 }
 0x275   : > { %2213 = vst [vmem:[%s2655_s28 + $0x50] sm:$0xff] %v2177_v58  }
 0x276   : > { %1395 = vst [vmem:[%s2650_s24 + $0x30] sm:$0xff] %v1325_v60 }
 0x279   : > { %v1364_v62 = vpop.f32.mrf.mxu2 }
 0x27a   : > { %v1365_v63 = vadd.f32 %v2829_v16, %v1364_v62  ;;  %v1549_v0 = vpop.f32.mrf.mxu3 }
 0x27b   : > { %v1326_v1 = vpop.f32.mrf.mxu0 }
 0x27c   : > { %1411 = vst [vmem:[%s2650_s24 + $0xb0] sm:$0xff] %v1365_v63  ;;  %v1327_v2 = vadd.f32 %v2829_v16, %v1326_v1  ;;  %v1511_v3 = vpop.f32.mrf.mxu1 }
 0x27d   : > { %v2142_v4 = vpack.c.bf16 %v1511_v3, %v1509_v61 }
 0x27e   : > { %1396 = vst [vmem:[%s2650_s24 + $0x38] sm:$0xff] %v1327_v2 }
 0x27f   : > { %2206 = vst [vmem:[%s2655_s28 + $0x18] sm:$0xff] %v2142_v4  }
 0x281   : > { %v1366_v5 = vpop.f32.mrf.mxu2 }
 0x282   : > { %v1367_v6 = vadd.f32 %v2829_v16, %v1366_v5  ;;  %v1551_v7 = vpop.f32.mrf.mxu3 }
 0x283   : > { %v2182_v8 = vpack.c.bf16 %v1551_v7, %v1549_v0  ;;  %v1329_v9 = vpop.f32.mrf.mxu0 }
 0x284   : > { %1412 = vst [vmem:[%s2650_s24 + $0xb8] sm:$0xff] %v1367_v6  ;;  %v1330_v10 = vadd.f32 %v2829_v16, %v1329_v9  ;;  %v1514_v11 = vpop.f32.mrf.mxu1 }
 0x285   : > { %2214 = vst [vmem:[%s2655_s28 + $0x58] sm:$0xff] %v2182_v8  }
 0x286   : > { %1397 = vst [vmem:[%s2650_s24 + $0x40] sm:$0xff] %v1330_v10 }
 0x289   : > { %v1369_v12 = vpop.f32.mrf.mxu2 }
 0x28a   : > { %v1370_v13 = vadd.f32 %v2829_v16, %v1369_v12  ;;  %v1554_v14 = vpop.f32.mrf.mxu3 }
 0x28b   : > { %v1331_v15 = vpop.f32.mrf.mxu0 }
 0x28c   : > { %1413 = vst [vmem:[%s2650_s24 + $0xc0] sm:$0xff] %v1370_v13  ;;  %v1332_v17 = vadd.f32 %v2829_v16, %v1331_v15  ;;  %v1516_v18 = vpop.f32.mrf.mxu1 }
 0x28d   : > { %v2147_v19 = vpack.c.bf16 %v1516_v18, %v1514_v11 }
 0x28e   : > { %1398 = vst [vmem:[%s2650_s24 + $0x48] sm:$0xff] %v1332_v17 }
 0x28f   : > { %2207 = vst [vmem:[%s2655_s28 + $0x20] sm:$0xff] %v2147_v19  }
 0x291   : > { %v1371_v20 = vpop.f32.mrf.mxu2 }
 0x292   : > { %v1372_v21 = vadd.f32 %v2829_v16, %v1371_v20  ;;  %v1556_v22 = vpop.f32.mrf.mxu3 }
 0x293   : > { %v2187_v23 = vpack.c.bf16 %v1556_v22, %v1554_v14  ;;  %v1334_v24 = vpop.f32.mrf.mxu0 }
 0x294   : > { %1414 = vst [vmem:[%s2650_s24 + $0xc8] sm:$0xff] %v1372_v21  ;;  %v1335_v25 = vadd.f32 %v2829_v16, %v1334_v24  ;;  %v1519_v26 = vpop.f32.mrf.mxu1 }
 0x295   : > { %2215 = vst [vmem:[%s2655_s28 + $0x60] sm:$0xff] %v2187_v23  }
 0x296   : > { %1399 = vst [vmem:[%s2650_s24 + $0x50] sm:$0xff] %v1335_v25 }
 0x299   : > { %v1374_v27 = vpop.f32.mrf.mxu2 }
 0x29a   : > { %v1375_v28 = vadd.f32 %v2829_v16, %v1374_v27  ;;  %v1559_v29 = vpop.f32.mrf.mxu3 }
 0x29b   : > { %v1336_v30 = vpop.f32.mrf.mxu0 }
 0x29c   : > { %1415 = vst [vmem:[%s2650_s24 + $0xd0] sm:$0xff] %v1375_v28  ;;  %v1337_v31 = vadd.f32 %v2829_v16, %v1336_v30  ;;  %v1521_v32 = vpop.f32.mrf.mxu1 }
 0x29d   : > { %v2152_v33 = vpack.c.bf16 %v1521_v32, %v1519_v26 }
 0x29e   : > { %1400 = vst [vmem:[%s2650_s24 + $0x58] sm:$0xff] %v1337_v31 }
 0x29f   : > { %2208 = vst [vmem:[%s2655_s28 + $0x28] sm:$0xff] %v2152_v33  }
 0x2a1   : > { %v1376_v34 = vpop.f32.mrf.mxu2 }
 0x2a2   : > { %v1377_v35 = vadd.f32 %v2829_v16, %v1376_v34  ;;  %v1561_v36 = vpop.f32.mrf.mxu3 }
 0x2a3   : > { %v2192_v37 = vpack.c.bf16 %v1561_v36, %v1559_v29  ;;  %v1339_v38 = vpop.f32.mrf.mxu0 }
 0x2a4   : > { %1416 = vst [vmem:[%s2650_s24 + $0xd8] sm:$0xff] %v1377_v35  ;;  %v1340_v39 = vadd.f32 %v2829_v16, %v1339_v38  ;;  %v1524_v40 = vpop.f32.mrf.mxu1 }
 0x2a5   : > { %2216 = vst [vmem:[%s2655_s28 + $0x68] sm:$0xff] %v2192_v37  }
 0x2a6   : > { %1401 = vst [vmem:[%s2650_s24 + $0x60] sm:$0xff] %v1340_v39 }
 0x2a9   : > { %v1379_v41 = vpop.f32.mrf.mxu2 }
 0x2aa   : > { %v1380_v42 = vadd.f32 %v2829_v16, %v1379_v41  ;;  %v1564_v43 = vpop.f32.mrf.mxu3 }
 0x2ab   : > { %v1341_v44 = vpop.f32.mrf.mxu0 }
 0x2ac   : > { %1417 = vst [vmem:[%s2650_s24 + $0xe0] sm:$0xff] %v1380_v42  ;;  %v1342_v45 = vadd.f32 %v2829_v16, %v1341_v44  ;;  %v1526_v46 = vpop.f32.mrf.mxu1 }
 0x2ad   : > { %v2157_v47 = vpack.c.bf16 %v1526_v46, %v1524_v40 }
 0x2ae   : > { %1402 = vst [vmem:[%s2650_s24 + $0x68] sm:$0xff] %v1342_v45 }
 0x2af   : > { %2209 = vst [vmem:[%s2655_s28 + $0x30] sm:$0xff] %v2157_v47  }
 0x2b1   : > { %v1381_v48 = vpop.f32.mrf.mxu2 }
 0x2b2   : > { %v1382_v49 = vadd.f32 %v2829_v16, %v1381_v48  ;;  %v1566_v50 = vpop.f32.mrf.mxu3 }
 0x2b3   : > { %v2197_v51 = vpack.c.bf16 %v1566_v50, %v1564_v43  ;;  %v1344_v52 = vpop.f32.mrf.mxu0 }
 0x2b4   : > { %1418 = vst [vmem:[%s2650_s24 + $0xe8] sm:$0xff] %v1382_v49  ;;  %v1345_v53 = vadd.f32 %v2829_v16, %v1344_v52  ;;  %v1529_v54 = vpop.f32.mrf.mxu1 }
 0x2b5   : > { %2217 = vst [vmem:[%s2655_s28 + $0x70] sm:$0xff] %v2197_v51  }
 0x2b6   : > { %1403 = vst [vmem:[%s2650_s24 + $0x70] sm:$0xff] %v1345_v53 }
 0x2b9   : > { %v1384_v55 = vpop.f32.mrf.mxu2 }
 0x2ba   : > { %v1385_v56 = vadd.f32 %v2829_v16, %v1384_v55  ;;  %v1569_v57 = vpop.f32.mrf.mxu3 }
 0x2bb   : > { %v1346_v58 = vpop.f32.mrf.mxu0 }
 0x2bc   : > { %1419 = vst [vmem:[%s2650_s24 + $0xf0] sm:$0xff] %v1385_v56  ;;  %v1347_v59 = vadd.f32 %v2829_v16, %v1346_v58  ;;  %v1531_v60 = vpop.f32.mrf.mxu1 }
 0x2bd   : > { %v2162_v61 = vpack.c.bf16 %v1531_v60, %v1529_v54 }
 0x2be   : > { %1404 = vst [vmem:[%s2650_s24 + $0x78] sm:$0xff] %v1347_v59 }
 0x2bf   : > { %2210 = vst [vmem:[%s2655_s28 + $0x38] sm:$0xff] %v2162_v61  }
 0x2c1   : > { %v1386_v62 = vpop.f32.mrf.mxu2 }
 0x2c2   : > { %v1387_v63 = vadd.f32 %v2829_v16, %v1386_v62  ;;  %v1571_v0 = vpop.f32.mrf.mxu3 }
 0x2c3   : > { %v2202_v1 = vpack.c.bf16 %v1571_v0, %v1569_v57 }
 0x2c4   : > { %1420 = vst [vmem:[%s2650_s24 + $0xf8] sm:$0xff] %v1387_v63 }
 0x2c5   : > { %2218 = vst [vmem:[%s2655_s28 + $0x78] sm:$0xff] %v2202_v1  }
 0x2c6 PF: > { %s42_s29 = sadd.s32 1, %s2466_s29   ;;  %s2958_s23 = sld [smem:[#allocation17_spill]] }
 0x2c7   : > { %p39_p13 = scmp.ge.s32.totalorder %s42_s29, 18   ;;  %s2959_s26 = sld [smem:[#allocation13_spill]] }
 0x2c8   : > { %s2960_s27 = sld [smem:[#allocation14_spill]]  ;;  %s2963_s0 = smov %s2442_s1 }
 0x2c9   : > { %s2961_s28 = sld [smem:[#allocation15_spill]]  ;;  %s2964_s1 = smov %s2446_s25 }
 0x2ca   : > { %s2962_s2 = sld [smem:[#allocation16_spill]]  ;;  %41 = sbr.rel (!%p39_p13) target bundleno = 14 (0xe), region = 114 }
 0x2cc   : > { %s2965_s25 = smov %s2958_s23 }
 0x2cf   :  { %1677 = vsyncpa [#allocation8], 1 }
 0x2d0   :  { %1679 = vsyncpa [#allocation8 + $0x1], 1 }

// kernel: _forward.3
= control target key start
LH: loop header
LB: loop body
LE: loop exit
PB: predicated region body
PF: predicated region fallthrough
CT: control target
= control target key end

     0   :  { %s2003_s30 = smov [#allocation3]   ;;  %s2004_s8 = smov [#allocation4]   ;;  %s2492_s0 = inlined_call_operand.vmem [shape: s32[4,4], index: 0, kind: input, shape index: {}]   ;;  %s2493_s3 = inlined_call_operand.vmem [shape: f32[1024,128], index: 3, kind: input, shape index: {}]   ;;  %s2494_s4 = inlined_call_operand.vmem [shape: bf16[14,256,256], index: 4, kind: input, shape index: {}]   ;;  %s2495_s5 = inlined_call_operand.vmem [shape: bf16[1024,128], index: 5, kind: input, shape index: {}]   ;;  %s2496_s6 = inlined_call_operand.vmem [shape: bf16[1024,128], index: 6, kind: input, shape index: {}]   ;;  %s2497_s7 = inlined_call_operand.hbm [shape: f32[1024,128], index: 7, kind: output, shape index: {}]   ;;  %s2498_s1 = inlined_call_operand.vmem [shape: s32[4,4], index: 1, kind: input, shape index: {}]   ;;  %s2499_s2 = inlined_call_operand.vmem [shape: s32[4], index: 2, kind: input, shape index: {}]  }
   0x1   :  { %s13_s26 = sshll.u32 %s2492_s0, 4  ;;  %s18_s29 = sshll.u32 %s2498_s1, 4  ;;  %s14_s26 = int_to_ptr.vmem [resolvable:$true] %s13_s26  ;;  %s19_s29 = int_to_ptr.vmem [resolvable:$true] %s18_s29 }
   0x2   :  { %16 = dma.vmem_to_smem %s14_s26, 64, %s2003_s30, [#allocation2] }
   0x3   :  { %21 = dma.vmem_to_smem %s19_s29, 64, %s2004_s8, [#allocation2] }
   0x4   :  { %s23_s11 = sshll.u32 %s2499_s2, 4  ;;  %s2005_s12 = smov [#allocation5]   ;;  %s24_s11 = int_to_ptr.vmem [resolvable:$true] %s23_s11 }
   0x5   :  { %26 = dma.vmem_to_smem %s24_s11, 16, %s2005_s12, [#allocation2] }
   0x6   :  { %1965 = dma.done.wait [#allocation2], 144 }
   0x7   :  { %1966 = vsyncadd [#allocation2], 4294967152 }
   0x8   :  { %29 = sfence }
   0x9   :  { %30 = vsyncpa [#allocation7], 0 }
   0xa   :  { %32 = vsyncpa [#allocation7 + $0x1], 0  ;;  %s2057_s0 = smov 0   ;;  %s2059_s1 = smov 0  }
   0xb   :  { %s2061_s13 = smov 0   ;;  %s2063_s14 = smov 0  }
   0xc   :  { %s2065_s15 = smov 0   ;;  %s2067_s16 = smov 0  }
   0xd   :  { %s2069_s2 = smov 0   ;;  %s2071_s17 = smov 0  }
   0xe LB: > { %2505 = sst [smem:[#allocation10_spill]] %s1981_s13  ;;  %s1428_s18 = sadd.s32 4294967295, %s2001_s17   ;;  %s2001_s17 = sphi %s2071_s17, %s38_s17   ;;  %s1997_s2 = sphi %s2069_s2, %s2519_s2   ;;  %s1993_s16 = sphi %s2067_s16, %s2522_s16   ;;  %s1989_s15 = sphi %s2065_s15, %s2517_s15   ;;  %s1985_s14 = sphi %s2063_s14, %s2516_s14   ;;  %s1981_s13 = sphi %s2061_s13, %s2515_s13   ;;  %s1977_s1 = sphi %s2059_s1, %s2521_s1   ;;  %s1973_s0 = sphi %s2057_s0, %s2520_s0  }
   0xf   : > { %2506 = sst [smem:[#allocation11_spill]] %s1993_s16  ;;  %s1429_s19 = sadd.s32 4294967294, %s2001_s17  }
  0x10   : > { %2507 = sst [smem:[#allocation12_spill]] %s1997_s2  ;;  %s47_s20 = sadd.s32 1, %s1993_s16 }
  0x11   : > { %p48_p0 = scmp.ge.s32.totalorder %s47_s20, 4  ;;  %s50_s21 = sadd.s32 1, %s1997_s2 }
  0x12   : > { %p203_p1 = scmp.ne.s32.totalorder %s1981_s13, %s1977_s1  ;;  %p204_p2 = scmp.eq.s32.totalorder %s1428_s18, 15 }
  0x13   : > { %s2524_s20 = smov (%p48_p0, %s47_s20), 0  ;;  %s2526_s21 = smov (!%p48_p0, %s50_s21), %s1997_s2 }
  0x14   : > { %2508 = sst [smem:[#allocation13_spill]] %s2524_s20  ;;  %p2106_p3 = por %p204_p2, %p203_p1 }
  0x15   : > { %p209_p4 = scmp.ne.s32.totalorder %s1977_s1, %s1973_s0  ;;  %p52_p5 = scmp.ge.s32.totalorder %s2526_s21, 4 }
  0x16   : > { %p210_p6 = scmp.eq.s32.totalorder %s1429_s19, 15  ;;  %p1436_p7 = scmp.ge.s32.totalorder %s2001_s17, 1 }
  0x17   : > { %p295_p8 = scmp.lt.s32.totalorder %s2001_s17, 17  ;;  %s2528_s21 = smov (%p52_p5, %s2526_s21), 0 }
  0x18   : > { %2510 = sst [smem:[#allocation14_spill]] %s2528_s21  ;;  %p2116_p9 = por %p210_p6, %p209_p4 }
  0x19   : > { %p296_p10 = pnand %p1436_p7, %p295_p8  ;;  %s190_s24 = ssub.s32 %s1997_s2, %s2528_s21 }
  0x1a   : > { %s193_s25 = sadd.s32 1, %s1981_s13  ;;  %p191_p11 = scmp.eq.s32.totalorder %s190_s24, 0 }
  0x1b   : > { %299 = sbr.rel (%p296_p10) target bundleno = 448 (0x1c0), region = 36  ;;  %s2503_s27 = sand.u32 (!%p296_p10), 1, %s1977_s1  }
  0x1c   : > { %s2124_s26 = scalar_select %p191_p11, %s1981_s13, %s193_s25  }
  0x1d   : > { %s1438_s28 = sshll.u32 (!%p296_p10), %s1989_s15, 5  ;;  %s1437_s29 = sshll.u32 (!%p296_p10), %s2503_s27, 8 }
  0x1e   : > { %2512 = sst [smem:[#allocation15_spill]] %s2124_s26  ;;  %p353_p12 = scmp.lt.s32.totalorder (!%p296_p10), %s1438_s28, 127 }
  0x1f   : > { %s358_s30 = sshra.s32 (!%p296_p10), %s1985_s14, 7  ;;  %s363_s9 = sand.u32 (!%p296_p10), 127, %s1985_s14 }
  0x20   : > { %s2530_s28 = smov (!%p353_p12, %s1438_s28), 127  ;;  %s360_s8 = sadd.s32 %s1989_s15, %s358_s30 }
  0x21   : > { %s1439_s10 = sshll.u32 %s2530_s28, 3  ;;  %s1440_s11 = sshll.u32 %s360_s8, 7 }
  0x22   : > { %s2136_s19 = scalar_lea.vmem %s2493_s3, %s1439_s10  ;;  %s364_s24 = sadd.s32 %s1440_s11, %s363_s9 }
  0x23   : > { %s365_s25 = sld [smem:[#allocation3 + %s364_s24]]  ;;  %s1447_s21 = sshll.u32 %s2530_s28, 2 }
  0x24   : > { %s386_s20 = sld [smem:[#allocation4 + %s364_s24]]  ;;  %s2141_s27 = scalar_lea.vmem %s2496_s6, %s1447_s21 }
  0x25   : > { %s2153_s16 = scalar_lea.vmem [#allocation6], %s1437_s29  ;;  %p1448_p1 = scmp.ne.s32.totalorder %s1985_s14, 0 }
  0x29   : > { %p366_p13 = scmp.lt.s32.totalorder %s365_s25, 13 }
  0x2a   : > { %s1444_s26 = sshll.u32 %s386_s20, 5 }
  0x2b   : > { %s2532_s25 = smov (!%p366_p13, %s365_s25), 13  ;;  %p388_p0 = scmp.lt.s32.totalorder %s1444_s26, 127 }
  0x2c   : > { %s1648_s30 = sshll.u32 %s2532_s25, 8  ;;  %411 = sbr.rel (%p1448_p1) target bundleno = 82 (0x52), region = 40 }
  0x2d   : > { %s2146_s12 = scalar_lea.vmem %s2494_s4, %s1648_s30  ;;  %s2534_s26 = smov (!%p388_p0, %s1444_s26), 127 }
  0x2e   : > { %s1445_s9 = sshll.u32 %s2534_s26, 2 }
  0x2f   : > { %s2151_s11 = scalar_lea.vmem %s2495_s5, %s1445_s9 }
  0x31   : > { %v412_v0 = vld [vmem:[%s2136_s19] sm:$0xff]  ;;  %v413_v1 = vld [vmem:[%s2136_s19 + $0x8] sm:$0xff]  ;;  %v414_v2 = vld [vmem:[%s2136_s19 + $0x10] sm:$0xff] }
  0x32   : > { %444 = vst [vmem:[%s2153_s16] sm:$0xff] %v412_v0  ;;  %v415_v3 = vld [vmem:[%s2136_s19 + $0x18] sm:$0xff]  ;;  %v416_v4 = vld [vmem:[%s2136_s19 + $0x20] sm:$0xff]  ;;  %v417_v5 = vld [vmem:[%s2136_s19 + $0x28] sm:$0xff] }
  0x33   : > { %445 = vst [vmem:[%s2153_s16 + $0x8] sm:$0xff] %v413_v1  ;;  %v418_v6 = vld [vmem:[%s2136_s19 + $0x30] sm:$0xff]  ;;  %v419_v7 = vld [vmem:[%s2136_s19 + $0x38] sm:$0xff]  ;;  %v420_v8 = vld [vmem:[%s2136_s19 + $0x40] sm:$0xff] }
  0x34   : > { %446 = vst [vmem:[%s2153_s16 + $0x10] sm:$0xff] %v414_v2  ;;  %v421_v9 = vld [vmem:[%s2136_s19 + $0x48] sm:$0xff]  ;;  %v422_v10 = vld [vmem:[%s2136_s19 + $0x50] sm:$0xff]  ;;  %v423_v11 = vld [vmem:[%s2136_s19 + $0x58] sm:$0xff] }
  0x35   : > { %447 = vst [vmem:[%s2153_s16 + $0x18] sm:$0xff] %v415_v3  ;;  %v424_v12 = vld [vmem:[%s2136_s19 + $0x60] sm:$0xff]  ;;  %v425_v13 = vld [vmem:[%s2136_s19 + $0x68] sm:$0xff]  ;;  %v426_v14 = vld [vmem:[%s2136_s19 + $0x70] sm:$0xff] }
  0x36   : > { %448 = vst [vmem:[%s2153_s16 + $0x20] sm:$0xff] %v416_v4  ;;  %v427_v15 = vld [vmem:[%s2136_s19 + $0x78] sm:$0xff]  ;;  %v428_v16 = vld [vmem:[%s2136_s19 + $0x80] sm:$0xff]  ;;  %v429_v17 = vld [vmem:[%s2136_s19 + $0x88] sm:$0xff] }
  0x37   : > { %449 = vst [vmem:[%s2153_s16 + $0x28] sm:$0xff] %v417_v5  ;;  %v430_v18 = vld [vmem:[%s2136_s19 + $0x90] sm:$0xff]  ;;  %v431_v19 = vld [vmem:[%s2136_s19 + $0x98] sm:$0xff]  ;;  %v432_v20 = vld [vmem:[%s2136_s19 + $0xa0] sm:$0xff] }
  0x38   : > { %450 = vst [vmem:[%s2153_s16 + $0x30] sm:$0xff] %v418_v6  ;;  %v433_v21 = vld [vmem:[%s2136_s19 + $0xa8] sm:$0xff]  ;;  %v434_v22 = vld [vmem:[%s2136_s19 + $0xb0] sm:$0xff]  ;;  %v435_v23 = vld [vmem:[%s2136_s19 + $0xb8] sm:$0xff] }
  0x39   : > { %451 = vst [vmem:[%s2153_s16 + $0x38] sm:$0xff] %v419_v7  ;;  %v436_v24 = vld [vmem:[%s2136_s19 + $0xc0] sm:$0xff]  ;;  %v437_v25 = vld [vmem:[%s2136_s19 + $0xc8] sm:$0xff]  ;;  %v438_v26 = vld [vmem:[%s2136_s19 + $0xd0] sm:$0xff] }
  0x3a   : > { %452 = vst [vmem:[%s2153_s16 + $0x40] sm:$0xff] %v420_v8  ;;  %v439_v27 = vld [vmem:[%s2136_s19 + $0xd8] sm:$0xff]  ;;  %v440_v28 = vld [vmem:[%s2136_s19 + $0xe0] sm:$0xff]  ;;  %v441_v29 = vld [vmem:[%s2136_s19 + $0xe8] sm:$0xff] }
  0x3b   : > { %453 = vst [vmem:[%s2153_s16 + $0x48] sm:$0xff] %v421_v9  ;;  %v442_v30 = vld [vmem:[%s2136_s19 + $0xf0] sm:$0xff]  ;;  %v443_v31 = vld [vmem:[%s2136_s19 + $0xf8] sm:$0xff] }
  0x3c   : > { %454 = vst [vmem:[%s2153_s16 + $0x50] sm:$0xff] %v422_v10 }
  0x3d   : > { %455 = vst [vmem:[%s2153_s16 + $0x58] sm:$0xff] %v423_v11 }
  0x3e   : > { %456 = vst [vmem:[%s2153_s16 + $0x60] sm:$0xff] %v424_v12 }
  0x3f   : > { %457 = vst [vmem:[%s2153_s16 + $0x68] sm:$0xff] %v425_v13 }
  0x40   : > { %458 = vst [vmem:[%s2153_s16 + $0x70] sm:$0xff] %v426_v14 }
  0x41   : > { %459 = vst [vmem:[%s2153_s16 + $0x78] sm:$0xff] %v427_v15 }
  0x42   : > { %460 = vst [vmem:[%s2153_s16 + $0x80] sm:$0xff] %v428_v16 }
  0x43   : > { %461 = vst [vmem:[%s2153_s16 + $0x88] sm:$0xff] %v429_v17 }
  0x44   : > { %462 = vst [vmem:[%s2153_s16 + $0x90] sm:$0xff] %v430_v18 }
  0x45   : > { %463 = vst [vmem:[%s2153_s16 + $0x98] sm:$0xff] %v431_v19 }
  0x46   : > { %464 = vst [vmem:[%s2153_s16 + $0xa0] sm:$0xff] %v432_v20 }
  0x47   : > { %465 = vst [vmem:[%s2153_s16 + $0xa8] sm:$0xff] %v433_v21 }
  0x48   : > { %466 = vst [vmem:[%s2153_s16 + $0xb0] sm:$0xff] %v434_v22 }
  0x49   : > { %467 = vst [vmem:[%s2153_s16 + $0xb8] sm:$0xff] %v435_v23 }
  0x4a   : > { %468 = vst [vmem:[%s2153_s16 + $0xc0] sm:$0xff] %v436_v24 }
  0x4b   : > { %469 = vst [vmem:[%s2153_s16 + $0xc8] sm:$0xff] %v437_v25 }
  0x4c   : > { %470 = vst [vmem:[%s2153_s16 + $0xd0] sm:$0xff] %v438_v26 }
  0x4d   : > { %471 = vst [vmem:[%s2153_s16 + $0xd8] sm:$0xff] %v439_v27 }
  0x4e   : > { %472 = vst [vmem:[%s2153_s16 + $0xe0] sm:$0xff] %v440_v28 }
  0x4f   : > { %473 = vst [vmem:[%s2153_s16 + $0xe8] sm:$0xff] %v441_v29 }
  0x50   : > { %474 = vst [vmem:[%s2153_s16 + $0xf0] sm:$0xff] %v442_v30 }
  0x51   : > { %475 = vst [vmem:[%s2153_s16 + $0xf8] sm:$0xff] %v443_v31 }
  0x52 PF: > { %s476_s13 = sld [smem:[#allocation5 + %s1989_s15]] }
  0x58   : > { %p1449_p2 = scmp.ge.s32.totalorder %s1985_s14, %s476_s13 }
  0x5a   : > { %480 = sbr.rel (%p1449_p2) target bundleno = 385 (0x181), region = 44 }
  0x5f   : > { %v1688_v32 = vld [vmem:[%s2151_s11 + $0x38] sm:$0xff]  ;;  %v1687_v34 = vld [vmem:[%s2151_s11 + $0x30] sm:$0xff]  ;;  %v1686_v36 = vld [vmem:[%s2151_s11 + $0x28] sm:$0xff] }
  0x60   : > { %v1696_v33 = vld [vmem:[%s2151_s11 + $0x78] sm:$0xff]  ;;  %833 = vmatpush.bf16.msra.mxu0 %v1688_v32  ;;  %1777 = vmatpush.bf16.msra.mxu2 %v1688_v32  ;;  %v1695_v35 = vld [vmem:[%s2151_s11 + $0x70] sm:$0xff]  ;;  %v1694_v37 = vld [vmem:[%s2151_s11 + $0x68] sm:$0xff] }
  0x61   : > { %922 = vmatpush.bf16.msra.mxu1 %v1696_v33  ;;  %1785 = vmatpush.bf16.msra.mxu3 %v1696_v33  ;;  %v1685_v38 = vld [vmem:[%s2151_s11 + $0x20] sm:$0xff]  ;;  %v1684_v40 = vld [vmem:[%s2151_s11 + $0x18] sm:$0xff]  ;;  %v1683_v42 = vld [vmem:[%s2151_s11 + $0x10] sm:$0xff] }
  0x62   : > { %v1693_v39 = vld [vmem:[%s2151_s11 + $0x60] sm:$0xff]  ;;  %v1692_v41 = vld [vmem:[%s2151_s11 + $0x58] sm:$0xff]  ;;  %v1691_v43 = vld [vmem:[%s2151_s11 + $0x50] sm:$0xff] }
  0x63   : > { %v1682_v44 = vld [vmem:[%s2151_s11 + $0x8] sm:$0xff]  ;;  %v1681_v46 = vld [vmem:[%s2151_s11] sm:$0xff]  ;;  %v1460_v60 = vld [vmem:[%s2146_s12 + $0x10] sm:$0xf] }
  0x64   : > { %834 = vmatpush.bf16.msra.mxu0 %v1687_v34  ;;  %1778 = vmatpush.bf16.msra.mxu2 %v1687_v34  ;;  %v1690_v45 = vld [vmem:[%s2151_s11 + $0x48] sm:$0xff]  ;;  %v1689_v47 = vld [vmem:[%s2151_s11 + $0x40] sm:$0xff]  ;;  %v1652_v61 = vld [vmem:[%s2146_s12 + $0x14] sm:$0xf0] }
  0x65   : > { %923 = vmatpush.bf16.msra.mxu1 %v1695_v35  ;;  %1786 = vmatpush.bf16.msra.mxu3 %v1695_v35  ;;  %v1452_v48 = vld [vmem:[%s2146_s12] sm:$0xf]  ;;  %v1650_v49 = vld [vmem:[%s2146_s12 + $0x4] sm:$0xf0]  ;;  %v1649_v52 = vld [vmem:[%s2146_s12 + $0x4] sm:$0xf]  ;;  %v1461_v4 = vor.u32 %v1652_v61, %v1460_v60 }
  0x66   : > { %v1516_v50 = vld [vmem:[%s2146_s12 + $0x80] sm:$0xf]  ;;  %v1666_v51 = vld [vmem:[%s2146_s12 + $0x84] sm:$0xf0]  ;;  %v1454_v53 = vld [vmem:[%s2146_s12 + $0x8] sm:$0xf0]  ;;  %v1453_v56 = vor.u32 %v1650_v49, %v1452_v48 }
  0x67   : > { %v1665_v54 = vld [vmem:[%s2146_s12 + $0x84] sm:$0xf]  ;;  %v1518_v55 = vld [vmem:[%s2146_s12 + $0x88] sm:$0xf0]  ;;  %v1517_v57 = vor.u32 %v1666_v51, %v1516_v50  ;;  %v1457_v58 = vor.u32 %v1649_v52, %v1454_v53  ;;  %v1524_v62 = vld [vmem:[%s2146_s12 + $0x90] sm:$0xf] }
  0x68   : > { %835 = vmatpush.bf16.msra.mxu0 %v1686_v36  ;;  %1779 = vmatpush.bf16.msra.mxu2 %v1686_v36  ;;  %v1521_v59 = vor.u32 %v1665_v54, %v1518_v55  ;;  %v1668_v63 = vld [vmem:[%s2146_s12 + $0x94] sm:$0xf0]  ;;  %v1651_v0 = vld [vmem:[%s2146_s12 + $0x14] sm:$0xf]  ;;  %v1462_v1 = vld [vmem:[%s2146_s12 + $0x18] sm:$0xf0] }
  0x69   : > { %924 = vmatpush.bf16.msra.mxu1 %v1694_v37  ;;  %1787 = vmatpush.bf16.msra.mxu3 %v1694_v37  ;;  %v1667_v2 = vld [vmem:[%s2146_s12 + $0x94] sm:$0xf]  ;;  %v1526_v3 = vld [vmem:[%s2146_s12 + $0x98] sm:$0xf0]  ;;  %v1525_v5 = vor.u32 %v1668_v63, %v1524_v62  ;;  %v1465_v6 = vor.u32 %v1651_v0, %v1462_v1  ;;  %v1468_v8 = vld [vmem:[%s2146_s12 + $0x20] sm:$0xf] }
  0x6a   : > { %v1529_v7 = vor.u32 %v1667_v2, %v1526_v3  ;;  %v1654_v9 = vld [vmem:[%s2146_s12 + $0x24] sm:$0xf0]  ;;  %v1532_v10 = vld [vmem:[%s2146_s12 + $0xa0] sm:$0xf]  ;;  %v1653_v12 = vld [vmem:[%s2146_s12 + $0x24] sm:$0xf] }
  0x6b   : > { %v1670_v11 = vld [vmem:[%s2146_s12 + $0xa4] sm:$0xf0]  ;;  %v1470_v13 = vld [vmem:[%s2146_s12 + $0x28] sm:$0xf0]  ;;  %v1669_v14 = vld [vmem:[%s2146_s12 + $0xa4] sm:$0xf]  ;;  %v1469_v16 = vor.u32 %v1654_v9, %v1468_v8 }
  0x6c   : > { %836 = vmatpush.bf16.msra.mxu0 %v1685_v38  ;;  %1780 = vmatpush.bf16.msra.mxu2 %v1685_v38  ;;  %v1534_v15 = vld [vmem:[%s2146_s12 + $0xa8] sm:$0xf0]  ;;  %v1533_v17 = vor.u32 %v1670_v11, %v1532_v10  ;;  %v1473_v18 = vor.u32 %v1653_v12, %v1470_v13  ;;  %v1476_v20 = vld [vmem:[%s2146_s12 + $0x30] sm:$0xf]  ;;  %v1656_v21 = vld [vmem:[%s2146_s12 + $0x34] sm:$0xf0] }
  0x6d   : > { %925 = vmatpush.bf16.msra.mxu1 %v1693_v39  ;;  %1788 = vmatpush.bf16.msra.mxu3 %v1693_v39  ;;  %v1537_v19 = vor.u32 %v1669_v14, %v1534_v15  ;;  %v1540_v22 = vld [vmem:[%s2146_s12 + $0xb0] sm:$0xf]  ;;  %v1672_v23 = vld [vmem:[%s2146_s12 + $0xb4] sm:$0xf0]  ;;  %v1655_v24 = vld [vmem:[%s2146_s12 + $0x34] sm:$0xf]  ;;  %v1477_v28 = vor.u32 %v1656_v21, %v1476_v20 }
  0x6e   : > { %v1478_v25 = vld [vmem:[%s2146_s12 + $0x38] sm:$0xf0]  ;;  %v1671_v26 = vld [vmem:[%s2146_s12 + $0xb4] sm:$0xf]  ;;  %v1541_v29 = vor.u32 %v1672_v23, %v1540_v22  ;;  %v1484_v32 = vld [vmem:[%s2146_s12 + $0x40] sm:$0xf] }
  0x6f   : > { %v1542_v27 = vld [vmem:[%s2146_s12 + $0xb8] sm:$0xf0]  ;;  %v1481_v30 = vor.u32 %v1655_v24, %v1478_v25  ;;  %v1658_v33 = vld [vmem:[%s2146_s12 + $0x44] sm:$0xf0]  ;;  %v1548_v34 = vld [vmem:[%s2146_s12 + $0xc0] sm:$0xf] }
  0x70   : > { %837 = vmatpush.bf16.msra.mxu0 %v1684_v40  ;;  %1781 = vmatpush.bf16.msra.mxu2 %v1684_v40  ;;  %v1545_v31 = vor.u32 %v1671_v26, %v1542_v27  ;;  %v1674_v35 = vld [vmem:[%s2146_s12 + $0xc4] sm:$0xf0]  ;;  %v1657_v36 = vld [vmem:[%s2146_s12 + $0x44] sm:$0xf]  ;;  %v1486_v37 = vld [vmem:[%s2146_s12 + $0x48] sm:$0xf0]  ;;  %v1485_v40 = vor.u32 %v1658_v33, %v1484_v32 }
  0x71   : > { %926 = vmatpush.bf16.msra.mxu1 %v1692_v41  ;;  %1789 = vmatpush.bf16.msra.mxu3 %v1692_v41  ;;  %v1673_v38 = vld [vmem:[%s2146_s12 + $0xc4] sm:$0xf]  ;;  %v1550_v39 = vld [vmem:[%s2146_s12 + $0xc8] sm:$0xf0]  ;;  %v1549_v41 = vor.u32 %v1674_v35, %v1548_v34  ;;  %v1659_v48 = vld [vmem:[%s2146_s12 + $0x54] sm:$0xf] }
  0x72   : > { %v1494_v49 = vld [vmem:[%s2146_s12 + $0x58] sm:$0xf0]  ;;  %v1675_v50 = vld [vmem:[%s2146_s12 + $0xd4] sm:$0xf]  ;;  %v1661_v60 = vld [vmem:[%s2146_s12 + $0x64] sm:$0xf] }
  0x73   : > { %v1558_v51 = vld [vmem:[%s2146_s12 + $0xd8] sm:$0xf0]  ;;  %v1497_v54 = vor.u32 %v1659_v48, %v1494_v49  ;;  %v1502_v61 = vld [vmem:[%s2146_s12 + $0x68] sm:$0xf0]  ;;  %v1677_v62 = vld [vmem:[%s2146_s12 + $0xe4] sm:$0xf] }
  0x74   : > { %838 = vmatpush.bf16.msra.mxu0 %v1683_v42  ;;  %1782 = vmatpush.bf16.msra.mxu2 %v1683_v42  ;;  %v1489_v42 = vor.u32 %v1657_v36, %v1486_v37  ;;  %v1561_v55 = vor.u32 %v1675_v50, %v1558_v51  ;;  %v1566_v63 = vld [vmem:[%s2146_s12 + $0xe8] sm:$0xf0]  ;;  %v1505_v2 = vor.u32 %v1661_v60, %v1502_v61  ;;  %v1663_v8 = vld [vmem:[%s2146_s12 + $0x74] sm:$0xf]  ;;  %v1510_v9 = vld [vmem:[%s2146_s12 + $0x78] sm:$0xf0] }
  0x75   : > { %927 = vmatpush.bf16.msra.mxu1 %v1691_v43  ;;  %1790 = vmatpush.bf16.msra.mxu3 %v1691_v43  ;;  %v1553_v43 = vor.u32 %v1673_v38, %v1550_v39  ;;  %v1569_v3 = vor.u32 %v1677_v62, %v1566_v63  ;;  %v1679_v10 = vld [vmem:[%s2146_s12 + $0xf4] sm:$0xf]  ;;  %v1574_v11 = vld [vmem:[%s2146_s12 + $0xf8] sm:$0xf0]  ;;  %v1513_v14 = vor.u32 %v1663_v8, %v1510_v9  ;;  %v497_v22 = vld [vmem:[%s2153_s16 + $0x80] sm:$0xff] }
  0x76   : > { %v1577_v15 = vor.u32 %v1679_v10, %v1574_v11  ;;  %v482_v26 = vld [vmem:[%s2153_s16 + $0x8] sm:$0xff]  ;;  %v483_v36 = vld [vmem:[%s2153_s16 + $0x10] sm:$0xff]  ;;  %v501_v62 = vld [vmem:[%s2153_s16 + $0xa0] sm:$0xff] }
  0x77   : > { %v498_v32 = vld [vmem:[%s2153_s16 + $0x88] sm:$0xff] }
  0x78   : > { %839 = vmatpush.bf16.msra.mxu0 %v1682_v44  ;;  %1783 = vmatpush.bf16.msra.mxu2 %v1682_v44  ;;  %v1492_v44 = vld [vmem:[%s2146_s12 + $0x50] sm:$0xf]  ;;  %v502_v8 = vld [vmem:[%s2153_s16 + $0xa8] sm:$0xff] }
  0x79   : > { %928 = vmatpush.bf16.msra.mxu1 %v1690_v45  ;;  %1791 = vmatpush.bf16.msra.mxu3 %v1690_v45  ;;  %v1660_v45 = vld [vmem:[%s2146_s12 + $0x54] sm:$0xf0] }
  0x7a   : > { %v1493_v52 = vor.u32 %v1660_v45, %v1492_v44 }
  0x7c   : > { %840 = vmatpush.bf16.msra.mxu0 %v1681_v46  ;;  %1784 = vmatpush.bf16.msra.mxu2 %v1681_v46  ;;  %v1556_v46 = vld [vmem:[%s2146_s12 + $0xd0] sm:$0xf] }
  0x7d   : > { %929 = vmatpush.bf16.msra.mxu1 %v1689_v47  ;;  %1792 = vmatpush.bf16.msra.mxu3 %v1689_v47  ;;  %v1676_v47 = vld [vmem:[%s2146_s12 + $0xd4] sm:$0xf0] }
  0x7e   : > { %v1557_v53 = vor.u32 %v1676_v47, %v1556_v46  ;;  %v484_v46 = vld [vmem:[%s2153_s16 + $0x18] sm:$0xff] }
  0x7f   : > { %841 = vmatmul.bf16.vlgmr.msra.gmra.mxu0 %v1453_v56  ;;  %881 = vmatmul.bf16.vlgmr.msra.gmra.mxu2 %v1517_v57  ;;  %v1500_v56 = vld [vmem:[%s2146_s12 + $0x60] sm:$0xf]  ;;  %v1662_v57 = vld [vmem:[%s2146_s12 + $0x64] sm:$0xf0] }
  0x80   : > { %930 = vmatmul.bf16.vlgmr.msra.gmra.mxu1 %v1457_v58  ;;  %970 = vmatmul.bf16.vlgmr.msra.gmra.mxu3 %v1521_v59  ;;  %v1564_v58 = vld [vmem:[%s2146_s12 + $0xe0] sm:$0xf]  ;;  %v1678_v59 = vld [vmem:[%s2146_s12 + $0xe4] sm:$0xf0]  ;;  %v1501_v0 = vor.u32 %v1662_v57, %v1500_v56 }
  0x81   : > { %v1565_v1 = vor.u32 %v1678_v59, %v1564_v58  ;;  %v485_v56 = vld [vmem:[%s2153_s16 + $0x20] sm:$0xff] }
  0x8f   : > { %846 = vmatmul.bf16.gmra.mxu0 %v1461_v4  ;;  %886 = vmatmul.bf16.gmra.mxu2 %v1525_v5  ;;  %v1508_v4 = vld [vmem:[%s2146_s12 + $0x70] sm:$0xf]  ;;  %v1664_v5 = vld [vmem:[%s2146_s12 + $0x74] sm:$0xf0] }
  0x90   : > { %935 = vmatmul.bf16.gmra.mxu1 %v1465_v6  ;;  %975 = vmatmul.bf16.gmra.mxu3 %v1529_v7  ;;  %v1572_v6 = vld [vmem:[%s2146_s12 + $0xf0] sm:$0xf]  ;;  %v1680_v7 = vld [vmem:[%s2146_s12 + $0xf4] sm:$0xf0]  ;;  %v1509_v12 = vor.u32 %v1664_v5, %v1508_v4 }
  0x91   : > { %v1573_v13 = vor.u32 %v1680_v7, %v1572_v6 }
  0x9f   : > { %851 = vmatmul.bf16.gmra.mxu0 %v1469_v16  ;;  %891 = vmatmul.bf16.gmra.mxu2 %v1533_v17  ;;  %v481_v17 = vld [vmem:[%s2153_s16] sm:$0xff] }
  0xa0   : > { %940 = vmatmul.bf16.gmra.mxu1 %v1473_v18  ;;  %980 = vmatmul.bf16.gmra.mxu3 %v1537_v19 }
  0xaf   : > { %856 = vmatmul.bf16.gmra.mxu0 %v1477_v28  ;;  %896 = vmatmul.bf16.gmra.mxu2 %v1541_v29 }
  0xb0   : > { %945 = vmatmul.bf16.gmra.mxu1 %v1481_v30  ;;  %985 = vmatmul.bf16.gmra.mxu3 %v1545_v31 }
  0xbf   : > { %861 = vmatmul.bf16.gmra.mxu0 %v1485_v40  ;;  %901 = vmatmul.bf16.gmra.mxu2 %v1549_v41 }
  0xc0   : > { %950 = vmatmul.bf16.gmra.mxu1 %v1489_v42  ;;  %990 = vmatmul.bf16.gmra.mxu3 %v1553_v43  ;;  %v499_v42 = vld [vmem:[%s2153_s16 + $0x90] sm:$0xff] }
  0xcf   : > { %866 = vmatmul.bf16.gmra.mxu0 %v1493_v52  ;;  %906 = vmatmul.bf16.gmra.mxu2 %v1557_v53  ;;  %v500_v52 = vld [vmem:[%s2153_s16 + $0x98] sm:$0xff] }
  0xd0   : > { %955 = vmatmul.bf16.gmra.mxu1 %v1497_v54  ;;  %995 = vmatmul.bf16.gmra.mxu3 %v1561_v55 }
  0xdf   : > { %871 = vmatmul.bf16.gmra.mxu0 %v1501_v0  ;;  %911 = vmatmul.bf16.gmra.mxu2 %v1565_v1 }
  0xe0   : > { %960 = vmatmul.bf16.gmra.mxu1 %v1505_v2  ;;  %1000 = vmatmul.bf16.gmra.mxu3 %v1569_v3  ;;  %v486_v2 = vld [vmem:[%s2153_s16 + $0x28] sm:$0xff] }
  0xef   : > { %876 = vmatmul.bf16.gmra.mxu0 %v1509_v12  ;;  %916 = vmatmul.bf16.gmra.mxu2 %v1573_v13  ;;  %v487_v12 = vld [vmem:[%s2153_s16 + $0x30] sm:$0xff] }
  0xf0   : > { %965 = vmatmul.bf16.gmra.mxu1 %v1513_v14  ;;  %1005 = vmatmul.bf16.gmra.mxu3 %v1577_v15 }
  0xfc   : > { %v842_v16 = vpop.f32.mrf.mxu0 }
  0xfd   : > { %v931_v18 = vpop.f32.mrf.mxu1 }
  0xfe   : > { %v932_v19 = vadd.f32 %v931_v18, %v842_v16  ;;  %v503_v18 = vld [vmem:[%s2153_s16 + $0xb0] sm:$0xff] }
 0x100   : > { %v1011_v20 = vadd.f32 %v932_v19, %v481_v17 }
 0x102   : > { %1043 = vst [vmem:[%s2153_s16] sm:$0xff] %v1011_v20  ;;  %v882_v21 = vpop.f32.mrf.mxu2 }
 0x103   : > { %v971_v23 = vpop.f32.mrf.mxu3 }
 0x104   : > { %v972_v24 = vadd.f32 %v971_v23, %v882_v21  ;;  %v844_v25 = vpop.f32.mrf.mxu0 }
 0x105   : > { %v933_v27 = vpop.f32.mrf.mxu1 }
 0x106   : > { %v1027_v28 = vadd.f32 %v972_v24, %v497_v22  ;;  %v934_v29 = vadd.f32 %v933_v27, %v844_v25  ;;  %v488_v22 = vld [vmem:[%s2153_s16 + $0x38] sm:$0xff] }
 0x108   : > { %1059 = vst [vmem:[%s2153_s16 + $0x80] sm:$0xff] %v1027_v28  ;;  %v1012_v30 = vadd.f32 %v934_v29, %v482_v26  ;;  %v504_v28 = vld [vmem:[%s2153_s16 + $0xb8] sm:$0xff] }
 0x10a   : > { %1044 = vst [vmem:[%s2153_s16 + $0x8] sm:$0xff] %v1012_v30  ;;  %v884_v31 = vpop.f32.mrf.mxu2 }
 0x10b   : > { %v973_v33 = vpop.f32.mrf.mxu3 }
 0x10c   : > { %v974_v34 = vadd.f32 %v973_v33, %v884_v31  ;;  %v847_v35 = vpop.f32.mrf.mxu0 }
 0x10d   : > { %v936_v37 = vpop.f32.mrf.mxu1 }
 0x10e   : > { %v1028_v38 = vadd.f32 %v974_v34, %v498_v32  ;;  %v937_v39 = vadd.f32 %v936_v37, %v847_v35  ;;  %v489_v32 = vld [vmem:[%s2153_s16 + $0x40] sm:$0xff] }
 0x110   : > { %1060 = vst [vmem:[%s2153_s16 + $0x88] sm:$0xff] %v1028_v38  ;;  %v1013_v40 = vadd.f32 %v937_v39, %v483_v36  ;;  %v505_v38 = vld [vmem:[%s2153_s16 + $0xc0] sm:$0xff] }
 0x112   : > { %1045 = vst [vmem:[%s2153_s16 + $0x10] sm:$0xff] %v1013_v40  ;;  %v887_v41 = vpop.f32.mrf.mxu2 }
 0x113   : > { %v976_v43 = vpop.f32.mrf.mxu3 }
 0x114   : > { %v977_v44 = vadd.f32 %v976_v43, %v887_v41  ;;  %v849_v45 = vpop.f32.mrf.mxu0 }
 0x115   : > { %v938_v47 = vpop.f32.mrf.mxu1 }
 0x116   : > { %v1029_v48 = vadd.f32 %v977_v44, %v499_v42  ;;  %v939_v49 = vadd.f32 %v938_v47, %v849_v45  ;;  %v490_v42 = vld [vmem:[%s2153_s16 + $0x48] sm:$0xff] }
 0x118   : > { %1061 = vst [vmem:[%s2153_s16 + $0x90] sm:$0xff] %v1029_v48  ;;  %v1014_v50 = vadd.f32 %v939_v49, %v484_v46  ;;  %v506_v48 = vld [vmem:[%s2153_s16 + $0xc8] sm:$0xff] }
 0x11a   : > { %1046 = vst [vmem:[%s2153_s16 + $0x18] sm:$0xff] %v1014_v50  ;;  %v889_v51 = vpop.f32.mrf.mxu2 }
 0x11b   : > { %v978_v53 = vpop.f32.mrf.mxu3 }
 0x11c   : > { %v979_v54 = vadd.f32 %v978_v53, %v889_v51  ;;  %v852_v55 = vpop.f32.mrf.mxu0 }
 0x11d   : > { %v941_v57 = vpop.f32.mrf.mxu1 }
 0x11e   : > { %v1030_v58 = vadd.f32 %v979_v54, %v500_v52  ;;  %v942_v59 = vadd.f32 %v941_v57, %v852_v55  ;;  %v491_v52 = vld [vmem:[%s2153_s16 + $0x50] sm:$0xff] }
 0x120   : > { %1062 = vst [vmem:[%s2153_s16 + $0x98] sm:$0xff] %v1030_v58  ;;  %v1015_v60 = vadd.f32 %v942_v59, %v485_v56  ;;  %v507_v58 = vld [vmem:[%s2153_s16 + $0xd0] sm:$0xff] }
 0x122   : > { %1047 = vst [vmem:[%s2153_s16 + $0x20] sm:$0xff] %v1015_v60  ;;  %v892_v61 = vpop.f32.mrf.mxu2 }
 0x123   : > { %v981_v63 = vpop.f32.mrf.mxu3 }
 0x124   : > { %v982_v0 = vadd.f32 %v981_v63, %v892_v61  ;;  %v854_v1 = vpop.f32.mrf.mxu0 }
 0x125   : > { %v943_v3 = vpop.f32.mrf.mxu1 }
 0x126   : > { %v1031_v4 = vadd.f32 %v982_v0, %v501_v62  ;;  %v944_v5 = vadd.f32 %v943_v3, %v854_v1  ;;  %v492_v62 = vld [vmem:[%s2153_s16 + $0x58] sm:$0xff] }
 0x128   : > { %1063 = vst [vmem:[%s2153_s16 + $0xa0] sm:$0xff] %v1031_v4  ;;  %v1016_v6 = vadd.f32 %v944_v5, %v486_v2  ;;  %v508_v4 = vld [vmem:[%s2153_s16 + $0xd8] sm:$0xff] }
 0x12a   : > { %1048 = vst [vmem:[%s2153_s16 + $0x28] sm:$0xff] %v1016_v6  ;;  %v894_v7 = vpop.f32.mrf.mxu2 }
 0x12b   : > { %v983_v9 = vpop.f32.mrf.mxu3 }
 0x12c   : > { %v984_v10 = vadd.f32 %v983_v9, %v894_v7  ;;  %v857_v11 = vpop.f32.mrf.mxu0 }
 0x12d   : > { %v946_v13 = vpop.f32.mrf.mxu1 }
 0x12e   : > { %v1032_v14 = vadd.f32 %v984_v10, %v502_v8  ;;  %v947_v15 = vadd.f32 %v946_v13, %v857_v11  ;;  %v493_v8 = vld [vmem:[%s2153_s16 + $0x60] sm:$0xff] }
 0x130   : > { %1064 = vst [vmem:[%s2153_s16 + $0xa8] sm:$0xff] %v1032_v14  ;;  %v1017_v16 = vadd.f32 %v947_v15, %v487_v12  ;;  %v509_v14 = vld [vmem:[%s2153_s16 + $0xe0] sm:$0xff] }
 0x132   : > { %1049 = vst [vmem:[%s2153_s16 + $0x30] sm:$0xff] %v1017_v16  ;;  %v897_v17 = vpop.f32.mrf.mxu2 }
 0x133   : > { %v986_v19 = vpop.f32.mrf.mxu3 }
 0x134   : > { %v987_v20 = vadd.f32 %v986_v19, %v897_v17  ;;  %v859_v21 = vpop.f32.mrf.mxu0 }
 0x135   : > { %v948_v23 = vpop.f32.mrf.mxu1 }
 0x136   : > { %v1033_v24 = vadd.f32 %v987_v20, %v503_v18  ;;  %v949_v25 = vadd.f32 %v948_v23, %v859_v21  ;;  %v494_v18 = vld [vmem:[%s2153_s16 + $0x68] sm:$0xff] }
 0x138   : > { %1065 = vst [vmem:[%s2153_s16 + $0xb0] sm:$0xff] %v1033_v24  ;;  %v1018_v26 = vadd.f32 %v949_v25, %v488_v22  ;;  %v510_v24 = vld [vmem:[%s2153_s16 + $0xe8] sm:$0xff] }
 0x13a   : > { %1050 = vst [vmem:[%s2153_s16 + $0x38] sm:$0xff] %v1018_v26  ;;  %v899_v27 = vpop.f32.mrf.mxu2 }
 0x13b   : > { %v988_v29 = vpop.f32.mrf.mxu3 }
 0x13c   : > { %v989_v30 = vadd.f32 %v988_v29, %v899_v27  ;;  %v862_v31 = vpop.f32.mrf.mxu0 }
 0x13d   : > { %v951_v33 = vpop.f32.mrf.mxu1 }
 0x13e   : > { %v1034_v34 = vadd.f32 %v989_v30, %v504_v28  ;;  %v952_v35 = vadd.f32 %v951_v33, %v862_v31  ;;  %v495_v28 = vld [vmem:[%s2153_s16 + $0x70] sm:$0xff] }
 0x140   : > { %1066 = vst [vmem:[%s2153_s16 + $0xb8] sm:$0xff] %v1034_v34  ;;  %v1019_v36 = vadd.f32 %v952_v35, %v489_v32  ;;  %v511_v34 = vld [vmem:[%s2153_s16 + $0xf0] sm:$0xff] }
 0x142   : > { %1051 = vst [vmem:[%s2153_s16 + $0x40] sm:$0xff] %v1019_v36  ;;  %v902_v37 = vpop.f32.mrf.mxu2 }
 0x143   : > { %v991_v39 = vpop.f32.mrf.mxu3 }
 0x144   : > { %v992_v40 = vadd.f32 %v991_v39, %v902_v37  ;;  %v864_v41 = vpop.f32.mrf.mxu0 }
 0x145   : > { %v953_v43 = vpop.f32.mrf.mxu1 }
 0x146   : > { %v1035_v44 = vadd.f32 %v992_v40, %v505_v38  ;;  %v954_v45 = vadd.f32 %v953_v43, %v864_v41  ;;  %v496_v38 = vld [vmem:[%s2153_s16 + $0x78] sm:$0xff] }
 0x148   : > { %1067 = vst [vmem:[%s2153_s16 + $0xc0] sm:$0xff] %v1035_v44  ;;  %v1020_v46 = vadd.f32 %v954_v45, %v490_v42  ;;  %v512_v44 = vld [vmem:[%s2153_s16 + $0xf8] sm:$0xff] }
 0x14a   : > { %1052 = vst [vmem:[%s2153_s16 + $0x48] sm:$0xff] %v1020_v46  ;;  %v904_v47 = vpop.f32.mrf.mxu2 }
 0x14b   : > { %v993_v49 = vpop.f32.mrf.mxu3 }
 0x14c   : > { %v994_v50 = vadd.f32 %v993_v49, %v904_v47  ;;  %v867_v51 = vpop.f32.mrf.mxu0 }
 0x14d   : > { %v956_v53 = vpop.f32.mrf.mxu1 }
 0x14e   : > { %v1036_v54 = vadd.f32 %v994_v50, %v506_v48  ;;  %v957_v55 = vadd.f32 %v956_v53, %v867_v51 }
 0x150   : > { %1068 = vst [vmem:[%s2153_s16 + $0xc8] sm:$0xff] %v1036_v54  ;;  %v1021_v56 = vadd.f32 %v957_v55, %v491_v52 }
 0x152   : > { %1053 = vst [vmem:[%s2153_s16 + $0x50] sm:$0xff] %v1021_v56  ;;  %v907_v57 = vpop.f32.mrf.mxu2 }
 0x153   : > { %v996_v59 = vpop.f32.mrf.mxu3 }
 0x154   : > { %v997_v60 = vadd.f32 %v996_v59, %v907_v57  ;;  %v869_v61 = vpop.f32.mrf.mxu0 }
 0x155   : > { %v958_v63 = vpop.f32.mrf.mxu1 }
 0x156   : > { %v1037_v0 = vadd.f32 %v997_v60, %v507_v58  ;;  %v959_v1 = vadd.f32 %v958_v63, %v869_v61 }
 0x158   : > { %1069 = vst [vmem:[%s2153_s16 + $0xd0] sm:$0xff] %v1037_v0  ;;  %v1022_v2 = vadd.f32 %v959_v1, %v492_v62 }
 0x15a   : > { %1054 = vst [vmem:[%s2153_s16 + $0x58] sm:$0xff] %v1022_v2  ;;  %v909_v3 = vpop.f32.mrf.mxu2 }
 0x15b   : > { %v998_v5 = vpop.f32.mrf.mxu3 }
 0x15c   : > { %v999_v6 = vadd.f32 %v998_v5, %v909_v3  ;;  %v872_v7 = vpop.f32.mrf.mxu0 }
 0x15d   : > { %v961_v9 = vpop.f32.mrf.mxu1 }
 0x15e   : > { %v1038_v10 = vadd.f32 %v999_v6, %v508_v4  ;;  %v962_v11 = vadd.f32 %v961_v9, %v872_v7 }
 0x160   : > { %1070 = vst [vmem:[%s2153_s16 + $0xd8] sm:$0xff] %v1038_v10  ;;  %v1023_v12 = vadd.f32 %v962_v11, %v493_v8 }
 0x162   : > { %1055 = vst [vmem:[%s2153_s16 + $0x60] sm:$0xff] %v1023_v12  ;;  %v912_v13 = vpop.f32.mrf.mxu2 }
 0x163   : > { %v1001_v15 = vpop.f32.mrf.mxu3 }
 0x164   : > { %v1002_v16 = vadd.f32 %v1001_v15, %v912_v13  ;;  %v874_v17 = vpop.f32.mrf.mxu0 }
 0x165   : > { %v963_v19 = vpop.f32.mrf.mxu1 }
 0x166   : > { %v1039_v20 = vadd.f32 %v1002_v16, %v509_v14  ;;  %v964_v21 = vadd.f32 %v963_v19, %v874_v17 }
 0x168   : > { %1071 = vst [vmem:[%s2153_s16 + $0xe0] sm:$0xff] %v1039_v20  ;;  %v1024_v22 = vadd.f32 %v964_v21, %v494_v18 }
 0x16a   : > { %1056 = vst [vmem:[%s2153_s16 + $0x68] sm:$0xff] %v1024_v22  ;;  %v914_v23 = vpop.f32.mrf.mxu2 }
 0x16b   : > { %v1003_v25 = vpop.f32.mrf.mxu3 }
 0x16c   : > { %v1004_v26 = vadd.f32 %v1003_v25, %v914_v23  ;;  %v877_v27 = vpop.f32.mrf.mxu0 }
 0x16d   : > { %v966_v29 = vpop.f32.mrf.mxu1 }
 0x16e   : > { %v1040_v30 = vadd.f32 %v1004_v26, %v510_v24  ;;  %v967_v31 = vadd.f32 %v966_v29, %v877_v27 }
 0x170   : > { %1072 = vst [vmem:[%s2153_s16 + $0xe8] sm:$0xff] %v1040_v30  ;;  %v1025_v32 = vadd.f32 %v967_v31, %v495_v28 }
 0x172   : > { %1057 = vst [vmem:[%s2153_s16 + $0x70] sm:$0xff] %v1025_v32  ;;  %v917_v33 = vpop.f32.mrf.mxu2 }
 0x173   : > { %v1006_v35 = vpop.f32.mrf.mxu3 }
 0x174   : > { %v1007_v36 = vadd.f32 %v1006_v35, %v917_v33  ;;  %v879_v37 = vpop.f32.mrf.mxu0 }
 0x175   : > { %v968_v39 = vpop.f32.mrf.mxu1 }
 0x176   : > { %v1041_v40 = vadd.f32 %v1007_v36, %v511_v34  ;;  %v969_v41 = vadd.f32 %v968_v39, %v879_v37 }
 0x178   : > { %1073 = vst [vmem:[%s2153_s16 + $0xf0] sm:$0xff] %v1041_v40  ;;  %v1026_v42 = vadd.f32 %v969_v41, %v496_v38 }
 0x17a   : > { %1058 = vst [vmem:[%s2153_s16 + $0x78] sm:$0xff] %v1026_v42  ;;  %v919_v43 = vpop.f32.mrf.mxu2 }
 0x17b   : > { %v1008_v45 = vpop.f32.mrf.mxu3 }
 0x17c   : > { %v1009_v46 = vadd.f32 %v1008_v45, %v919_v43 }
 0x17e   : > { %v1042_v47 = vadd.f32 %v1009_v46, %v512_v44 }
 0x180   : > { %1074 = vst [vmem:[%s2153_s16 + $0xf8] sm:$0xff] %v1042_v47 }
 0x181 PF: > { %p1642_p4 = scmp.ne.s32.totalorder %s1985_s14, 3 }
 0x183   : > { %1078 = sbr.rel (%p1642_p4) target bundleno = 432 (0x1b0), region = 48 }
 0x188   : > { %v1079_v48 = vld [vmem:[%s2153_s16] sm:$0xff]  ;;  %v1080_v50 = vld [vmem:[%s2153_s16 + $0x8] sm:$0xff]  ;;  %v1081_v55 = vld [vmem:[%s2153_s16 + $0x10] sm:$0xff] }
 0x189   : > { %v1699_v49 = vld [vmem:[%s2141_s27] sm:$0xff]   ;;  %v1111_v51 = vmax.f32 %v1079_v48, 0.0  ;;  %v1112_v53 = vmax.f32 %v1080_v50, 0.0  ;;  %v1762_v56 = vld [vmem:[%s2141_s27 + $0x8] sm:$0xff]   ;;  %v1082_v57 = vld [vmem:[%s2153_s16 + $0x18] sm:$0xff]  ;;  %v1113_v58 = vmax.f32 %v1081_v55, 0.0 }
 0x18a   : > { %v1700_v52 = vunpack.c.l.bf16 %v1699_v49  ;;  %v1701_v54 = vunpack.c.h.bf16 %v1699_v49  ;;  %v1704_v59 = vunpack.c.l.bf16 %v1762_v56  ;;  %v1114_v60 = vmax.f32 %v1082_v57, 0.0  ;;  %v1083_v62 = vld [vmem:[%s2153_s16 + $0x20] sm:$0xff]  ;;  %v1763_v63 = vld [vmem:[%s2141_s27 + $0x10] sm:$0xff]   ;;  %v1084_v0 = vld [vmem:[%s2153_s16 + $0x28] sm:$0xff] }
 0x18b   : > { %v1705_v61 = vunpack.c.h.bf16 %v1762_v56  ;;  %v1115_v3 = vmax.f32 %v1083_v62, 0.0  ;;  %v1708_v4 = vunpack.c.l.bf16 %v1763_v63  ;;  %v1085_v5 = vld [vmem:[%s2153_s16 + $0x30] sm:$0xff]  ;;  %v1764_v6 = vld [vmem:[%s2141_s27 + $0x18] sm:$0xff]   ;;  %v1116_v9 = vmax.f32 %v1084_v0, 0.0  ;;  %v1087_v12 = vld [vmem:[%s2153_s16 + $0x40] sm:$0xff] }
 0x18c   : > { %v1207_v1 = vadd.f32 %v1700_v52, %v1111_v51  ;;  %v1208_v2 = vadd.f32 %v1701_v54, %v1112_v53  ;;  %v1209_v7 = vadd.f32 %v1704_v59, %v1113_v58  ;;  %v1709_v10 = vunpack.c.h.bf16 %v1763_v63  ;;  %v1086_v11 = vld [vmem:[%s2153_s16 + $0x38] sm:$0xff]  ;;  %v1765_v17 = vld [vmem:[%s2141_s27 + $0x20] sm:$0xff]   ;;  %v1088_v18 = vld [vmem:[%s2153_s16 + $0x48] sm:$0xff] }
 0x18d   : > { %v1210_v8 = vadd.f32 %v1705_v61, %v1114_v60  ;;  %v1211_v15 = vadd.f32 %v1708_v4, %v1115_v3  ;;  %v1117_v16 = vmax.f32 %v1085_v5, 0.0  ;;  %v1712_v22 = vunpack.c.l.bf16 %v1764_v6  ;;  %v1089_v23 = vld [vmem:[%s2153_s16 + $0x50] sm:$0xff]  ;;  %v1766_v24 = vld [vmem:[%s2141_s27 + $0x28] sm:$0xff]   ;;  %v1090_v29 = vld [vmem:[%s2153_s16 + $0x58] sm:$0xff] }
 0x18e   : > { %v1239_v13 = vmul.f32 0.5, %v1207_v1  ;;  %v1240_v14 = vmul.f32 0.5, %v1208_v2  ;;  %v1241_v19 = vmul.f32 0.5, %v1209_v7  ;;  %v1212_v21 = vadd.f32 %v1709_v10, %v1116_v9  ;;  %v1091_v34 = vld [vmem:[%s2153_s16 + $0x60] sm:$0xff]  ;;  %v1767_v39 = vld [vmem:[%s2141_s27 + $0x30] sm:$0xff]   ;;  %v1092_v40 = vld [vmem:[%s2153_s16 + $0x68] sm:$0xff] }
 0x18f   : > { %v1242_v20 = vmul.f32 0.5, %v1210_v8  ;;  %v1243_v25 = vmul.f32 0.5, %v1211_v15  ;;  %v1118_v26 = vmax.f32 %v1086_v11, 0.0  ;;  %v1713_v27 = vunpack.c.h.bf16 %v1764_v6  ;;  %v1093_v45 = vld [vmem:[%s2153_s16 + $0x70] sm:$0xff]  ;;  %v1768_v50 = vld [vmem:[%s2141_s27 + $0x38] sm:$0xff]   ;;  %v1095_v56 = vld [vmem:[%s2153_s16 + $0x80] sm:$0xff] }
 0x190   : > { %1271 = vst [vmem:[%s2153_s16] sm:$0xff] %v1239_v13  ;;  %v1119_v28 = vmax.f32 %v1087_v12, 0.0  ;;  %v1244_v30 = vmul.f32 0.5, %v1212_v21  ;;  %v1213_v31 = vadd.f32 %v1712_v22, %v1117_v16  ;;  %v1716_v32 = vunpack.c.l.bf16 %v1765_v17  ;;  %v1094_v51 = vld [vmem:[%s2153_s16 + $0x78] sm:$0xff]  ;;  %v1769_v57 = vld [vmem:[%s2141_s27 + $0x40] sm:$0xff]   ;;  %v1096_v62 = vld [vmem:[%s2153_s16 + $0x88] sm:$0xff] }
 0x191   : > { %1272 = vst [vmem:[%s2153_s16 + $0x8] sm:$0xff] %v1240_v14  ;;  %v1120_v33 = vmax.f32 %v1088_v18, 0.0  ;;  %v1214_v35 = vadd.f32 %v1713_v27, %v1118_v26  ;;  %v1717_v36 = vunpack.c.h.bf16 %v1765_v17  ;;  %v1121_v37 = vmax.f32 %v1089_v23, 0.0  ;;  %v1097_v3 = vld [vmem:[%s2153_s16 + $0x90] sm:$0xff]  ;;  %v1770_v8 = vld [vmem:[%s2141_s27 + $0x48] sm:$0xff]   ;;  %v1098_v9 = vld [vmem:[%s2153_s16 + $0x98] sm:$0xff] }
 0x192   : > { %1273 = vst [vmem:[%s2153_s16 + $0x10] sm:$0xff] %v1241_v19  ;;  %v1720_v38 = vunpack.c.l.bf16 %v1766_v24  ;;  %v1245_v41 = vmul.f32 0.5, %v1213_v31  ;;  %v1215_v42 = vadd.f32 %v1716_v32, %v1119_v28  ;;  %v1122_v43 = vmax.f32 %v1090_v29, 0.0  ;;  %v1099_v14 = vld [vmem:[%s2153_s16 + $0xa0] sm:$0xff]  ;;  %v1771_v19 = vld [vmem:[%s2141_s27 + $0x50] sm:$0xff]   ;;  %v1772_v26 = vld [vmem:[%s2141_s27 + $0x58] sm:$0xff]  }
 0x193   : > { %1274 = vst [vmem:[%s2153_s16 + $0x18] sm:$0xff] %v1242_v20  ;;  %v1721_v44 = vunpack.c.h.bf16 %v1766_v24  ;;  %v1246_v46 = vmul.f32 0.5, %v1214_v35  ;;  %v1216_v47 = vadd.f32 %v1717_v36, %v1120_v33  ;;  %v1123_v49 = vmax.f32 %v1091_v34, 0.0  ;;  %v1100_v20 = vld [vmem:[%s2153_s16 + $0xa8] sm:$0xff]  ;;  %v1102_v31 = vld [vmem:[%s2153_s16 + $0xb8] sm:$0xff]  ;;  %v1103_v36 = vld [vmem:[%s2153_s16 + $0xc0] sm:$0xff] }
 0x194   : > { %1275 = vst [vmem:[%s2153_s16 + $0x20] sm:$0xff] %v1243_v25  ;;  %v1217_v48 = vadd.f32 %v1720_v38, %v1121_v37  ;;  %v1247_v52 = vmul.f32 0.5, %v1215_v42  ;;  %v1724_v54 = vunpack.c.l.bf16 %v1767_v39  ;;  %v1124_v55 = vmax.f32 %v1092_v40, 0.0  ;;  %v1101_v25 = vld [vmem:[%s2153_s16 + $0xb0] sm:$0xff]  ;;  %v1104_v42 = vld [vmem:[%s2153_s16 + $0xc8] sm:$0xff] }
 0x195   : > { %1276 = vst [vmem:[%s2153_s16 + $0x28] sm:$0xff] %v1244_v30  ;;  %v1218_v53 = vadd.f32 %v1721_v44, %v1122_v43  ;;  %v1248_v58 = vmul.f32 0.5, %v1216_v47  ;;  %v1725_v60 = vunpack.c.h.bf16 %v1767_v39  ;;  %v1125_v61 = vmax.f32 %v1093_v45, 0.0  ;;  %v1105_v47 = vld [vmem:[%s2153_s16 + $0xd0] sm:$0xff] }
 0x196   : > { %1277 = vst [vmem:[%s2153_s16 + $0x30] sm:$0xff] %v1245_v41  ;;  %v1249_v59 = vmul.f32 0.5, %v1217_v48  ;;  %v1219_v0 = vadd.f32 %v1724_v54, %v1123_v49  ;;  %v1728_v1 = vunpack.c.l.bf16 %v1768_v50  ;;  %v1126_v2 = vmax.f32 %v1094_v51, 0.0  ;;  %v1773_v41 = vld [vmem:[%s2141_s27 + $0x60] sm:$0xff]  }
 0x197   : > { %1278 = vst [vmem:[%s2153_s16 + $0x38] sm:$0xff] %v1246_v46  ;;  %v1250_v63 = vmul.f32 0.5, %v1218_v53  ;;  %v1220_v4 = vadd.f32 %v1725_v60, %v1124_v55  ;;  %v1729_v5 = vunpack.c.h.bf16 %v1768_v50  ;;  %v1127_v6 = vmax.f32 %v1095_v56, 0.0  ;;  %v1106_v53 = vld [vmem:[%s2153_s16 + $0xd8] sm:$0xff] }
 0x198   : > { %1279 = vst [vmem:[%s2153_s16 + $0x40] sm:$0xff] %v1247_v52  ;;  %v1732_v7 = vunpack.c.l.bf16 %v1769_v57  ;;  %v1251_v10 = vmul.f32 0.5, %v1219_v0  ;;  %v1221_v11 = vadd.f32 %v1728_v1, %v1125_v61  ;;  %v1128_v12 = vmax.f32 %v1096_v62, 0.0  ;;  %v1774_v52 = vld [vmem:[%s2141_s27 + $0x68] sm:$0xff]  }
 0x199   : > { %1280 = vst [vmem:[%s2153_s16 + $0x48] sm:$0xff] %v1248_v58  ;;  %v1733_v13 = vunpack.c.h.bf16 %v1769_v57  ;;  %v1252_v15 = vmul.f32 0.5, %v1220_v4  ;;  %v1222_v16 = vadd.f32 %v1729_v5, %v1126_v2  ;;  %v1129_v18 = vmax.f32 %v1097_v3, 0.0  ;;  %v1107_v58 = vld [vmem:[%s2153_s16 + $0xe0] sm:$0xff]  ;;  %v1108_v0 = vld [vmem:[%s2153_s16 + $0xe8] sm:$0xff]  ;;  %v1109_v5 = vld [vmem:[%s2153_s16 + $0xf0] sm:$0xff] }
 0x19a   : > { %1281 = vst [vmem:[%s2153_s16 + $0x50] sm:$0xff] %v1249_v59  ;;  %v1223_v17 = vadd.f32 %v1732_v7, %v1127_v6  ;;  %v1253_v21 = vmul.f32 0.5, %v1221_v11  ;;  %v1736_v23 = vunpack.c.l.bf16 %v1770_v8  ;;  %v1130_v24 = vmax.f32 %v1098_v9, 0.0  ;;  %v1775_v59 = vld [vmem:[%s2141_s27 + $0x70] sm:$0xff]   ;;  %v1110_v11 = vld [vmem:[%s2153_s16 + $0xf8] sm:$0xff] }
 0x19b   : > { %1282 = vst [vmem:[%s2153_s16 + $0x58] sm:$0xff] %v1250_v63  ;;  %v1224_v22 = vadd.f32 %v1733_v13, %v1128_v12  ;;  %v1254_v27 = vmul.f32 0.5, %v1222_v16  ;;  %v1737_v29 = vunpack.c.h.bf16 %v1770_v8  ;;  %v1131_v30 = vmax.f32 %v1099_v14, 0.0 }
 0x19c   : > { %1283 = vst [vmem:[%s2153_s16 + $0x60] sm:$0xff] %v1251_v10  ;;  %v1255_v28 = vmul.f32 0.5, %v1223_v17  ;;  %v1225_v33 = vadd.f32 %v1736_v23, %v1129_v18  ;;  %v1740_v34 = vunpack.c.l.bf16 %v1771_v19  ;;  %v1132_v35 = vmax.f32 %v1100_v20, 0.0  ;;  %v1776_v10 = vld [vmem:[%s2141_s27 + $0x78] sm:$0xff]  }
 0x19d   : > { %1284 = vst [vmem:[%s2153_s16 + $0x68] sm:$0xff] %v1252_v15  ;;  %v1256_v32 = vmul.f32 0.5, %v1224_v22  ;;  %v1226_v37 = vadd.f32 %v1737_v29, %v1130_v24  ;;  %v1741_v38 = vunpack.c.h.bf16 %v1771_v19  ;;  %v1133_v39 = vmax.f32 %v1101_v25, 0.0 }
 0x19e   : > { %1285 = vst [vmem:[%s2153_s16 + $0x70] sm:$0xff] %v1253_v21  ;;  %v1744_v40 = vunpack.c.l.bf16 %v1772_v26  ;;  %v1257_v43 = vmul.f32 0.5, %v1225_v33  ;;  %v1227_v44 = vadd.f32 %v1740_v34, %v1131_v30  ;;  %v1134_v45 = vmax.f32 %v1102_v31, 0.0 }
 0x19f   : > { %1286 = vst [vmem:[%s2153_s16 + $0x78] sm:$0xff] %v1254_v27  ;;  %v1745_v46 = vunpack.c.h.bf16 %v1772_v26  ;;  %v1258_v48 = vmul.f32 0.5, %v1226_v37  ;;  %v1228_v49 = vadd.f32 %v1741_v38, %v1132_v35  ;;  %v1135_v51 = vmax.f32 %v1103_v36, 0.0 }
 0x1a0   : > { %1287 = vst [vmem:[%s2153_s16 + $0x80] sm:$0xff] %v1255_v28  ;;  %v1229_v50 = vadd.f32 %v1744_v40, %v1133_v39  ;;  %v1259_v54 = vmul.f32 0.5, %v1227_v44  ;;  %v1748_v56 = vunpack.c.l.bf16 %v1773_v41  ;;  %v1136_v57 = vmax.f32 %v1104_v42, 0.0 }
 0x1a1   : > { %1288 = vst [vmem:[%s2153_s16 + $0x88] sm:$0xff] %v1256_v32  ;;  %v1230_v55 = vadd.f32 %v1745_v46, %v1134_v45  ;;  %v1260_v60 = vmul.f32 0.5, %v1228_v49  ;;  %v1749_v62 = vunpack.c.h.bf16 %v1773_v41  ;;  %v1137_v63 = vmax.f32 %v1105_v47, 0.0 }
 0x1a2   : > { %1289 = vst [vmem:[%s2153_s16 + $0x90] sm:$0xff] %v1257_v43  ;;  %v1261_v61 = vmul.f32 0.5, %v1229_v50  ;;  %v1231_v2 = vadd.f32 %v1748_v56, %v1135_v51  ;;  %v1752_v3 = vunpack.c.l.bf16 %v1774_v52  ;;  %v1138_v4 = vmax.f32 %v1106_v53, 0.0 }
 0x1a3   : > { %1290 = vst [vmem:[%s2153_s16 + $0x98] sm:$0xff] %v1258_v48  ;;  %v1262_v1 = vmul.f32 0.5, %v1230_v55  ;;  %v1232_v6 = vadd.f32 %v1749_v62, %v1136_v57  ;;  %v1753_v7 = vunpack.c.h.bf16 %v1774_v52  ;;  %v1139_v8 = vmax.f32 %v1107_v58, 0.0 }
 0x1a4   : > { %1291 = vst [vmem:[%s2153_s16 + $0xa0] sm:$0xff] %v1259_v54  ;;  %v1756_v9 = vunpack.c.l.bf16 %v1775_v59  ;;  %v1263_v12 = vmul.f32 0.5, %v1231_v2  ;;  %v1233_v13 = vadd.f32 %v1752_v3, %v1137_v63  ;;  %v1140_v14 = vmax.f32 %v1108_v0, 0.0 }
 0x1a5   : > { %1292 = vst [vmem:[%s2153_s16 + $0xa8] sm:$0xff] %v1260_v60  ;;  %v1757_v15 = vunpack.c.h.bf16 %v1775_v59  ;;  %v1264_v16 = vmul.f32 0.5, %v1232_v6  ;;  %v1234_v17 = vadd.f32 %v1753_v7, %v1138_v4  ;;  %v1141_v19 = vmax.f32 %v1109_v5, 0.0 }
 0x1a6   : > { %1293 = vst [vmem:[%s2153_s16 + $0xb0] sm:$0xff] %v1261_v61  ;;  %v1235_v18 = vadd.f32 %v1756_v9, %v1139_v8  ;;  %v1265_v20 = vmul.f32 0.5, %v1233_v13  ;;  %v1760_v22 = vunpack.c.l.bf16 %v1776_v10  ;;  %v1142_v23 = vmax.f32 %v1110_v11, 0.0 }
 0x1a7   : > { %1294 = vst [vmem:[%s2153_s16 + $0xb8] sm:$0xff] %v1262_v1  ;;  %v1236_v21 = vadd.f32 %v1757_v15, %v1140_v14  ;;  %v1266_v24 = vmul.f32 0.5, %v1234_v17  ;;  %v1761_v26 = vunpack.c.h.bf16 %v1776_v10 }
 0x1a8   : > { %1295 = vst [vmem:[%s2153_s16 + $0xc0] sm:$0xff] %v1263_v12  ;;  %v1267_v25 = vmul.f32 0.5, %v1235_v18  ;;  %v1237_v28 = vadd.f32 %v1760_v22, %v1141_v19 }
 0x1a9   : > { %1296 = vst [vmem:[%s2153_s16 + $0xc8] sm:$0xff] %v1264_v16  ;;  %v1268_v27 = vmul.f32 0.5, %v1236_v21  ;;  %v1238_v29 = vadd.f32 %v1761_v26, %v1142_v23 }
 0x1aa   : > { %1297 = vst [vmem:[%s2153_s16 + $0xd0] sm:$0xff] %v1265_v20  ;;  %v1269_v30 = vmul.f32 0.5, %v1237_v28 }
 0x1ab   : > { %1298 = vst [vmem:[%s2153_s16 + $0xd8] sm:$0xff] %v1266_v24  ;;  %v1270_v31 = vmul.f32 0.5, %v1238_v29 }
 0x1ac   : > { %1299 = vst [vmem:[%s2153_s16 + $0xe0] sm:$0xff] %v1267_v25 }
 0x1ad   : > { %1300 = vst [vmem:[%s2153_s16 + $0xe8] sm:$0xff] %v1268_v27 }
 0x1ae   : > { %1301 = vst [vmem:[%s2153_s16 + $0xf0] sm:$0xff] %v1269_v30 }
 0x1af   : > { %1302 = vst [vmem:[%s2153_s16 + $0xf8] sm:$0xff] %v1270_v31 }
 0x1b0 PF: > { %s1697_s14 = sshll.u32 %s1989_s15, 8  ;;  %s1316_s26 = sshll.u32 %s2153_s16, 4  ;;  %s1317_s26 = int_to_ptr.vmem [resolvable:$true] %s1316_s26 }
 0x1b1   : > { %s1315_s21 = scalar_lea.hbm %s2497_s7, %s1697_s14  ;;  %s2513_s29 = sand.u32 1, %s1977_s1  }
 0x1b2   : > { %s1318_s27 = sshll.u32 %s1315_s21, 4  ;;  %s1304_s18 = scalar_lea.sflag [#allocation7], %s2513_s29  ;;  %s1319_s27 = int_to_ptr.hbm [resolvable:$true] %s1318_s27 }
 0x1b3   : > { %s1919_s19 = sshra.s32 %s1319_s27, 4  ;;  %s1925_s15 = scalar_lea.hbm %s2497_s7, 1024  ;;  %s1920_s19 = int_to_ptr.hbm [resolvable:$true] %s1919_s19 }
 0x1b4   : > { %s1921_s24 = scalar_lea.hbm %s1920_s19, 256  ;;  %p1926_p8 = scmp.lt.s32.totalorder %s1920_s19, %s2497_s7 }
 0x1b5   : > { %p1922_p5 = scmp.ne.s32.totalorder %s1920_s19, %s1921_s24  ;;  %p1927_p10 = scmp.lt.s32.totalorder %s1925_s15, %s1921_s24 }
 0x1b7   : > { %p1923_p6 = pnand %p1922_p5, %p2106_p3  ;;  %p1928_p11 = por %p1927_p10, %p1926_p8 }
 0x1b9   : > { %p1924_p7 = pneg %p1923_p6 }
 0x1bb   : > { %p1929_p12 = pnand %p1928_p11, %p1924_p7 }
 0x1bd   : > { %1932 = shalt.err (!%p1929_p12)
}
 0x1be   : > { %s2006_s9 = smov 128   ;;  %s2007_s10 = smov 8  }
 0x1bf   : > { %1793 = dma.vmem_to_hbm [thread:$0]  (%p2106_p3), %s1317_s26, 4096, %s1319_s27, %s1304_s18, %s2006_s9, %s2006_s9, %s2007_s10  }
 0x1c0 PF: > { %p1799_p13 = scmp.ge.s32.totalorder %s2001_s17, 2  ;;  %s1333_s28 = sand.u32 1, %s1973_s0  }
 0x1c1   : > { %s1334_s11 = scalar_lea.sflag [#allocation7], %s1333_s28 }
 0x1c2   : > { %p1796_p0 = pnand %p1799_p13, %p2116_p9 }
 0x1c4   : > { %p1797_p1 = pneg %p1796_p0 }
 0x1c6   : > { %1968 = dma.done.wait (%p1797_p1), %s1334_s11, 4096  }
 0x1c7   : > { %1970 = vsyncadd (%p1797_p1), %s1334_s11, 4294963200  ;;  %s38_s17 = sadd.s32 1, %s2001_s17   ;;  %s2514_s16 = sld [smem:[#allocation10_spill]] }
 0x1c8   : > { %p35_p2 = scmp.ge.s32.totalorder %s38_s17, 18   ;;  %s2515_s13 = sld [smem:[#allocation15_spill]] }
 0x1c9   : > { %s2516_s14 = sld [smem:[#allocation11_spill]]  ;;  %s2520_s0 = smov %s1977_s1 }
 0x1ca   : > { %s2517_s15 = sld [smem:[#allocation12_spill]] }
 0x1cb   : > { %s2518_s22 = sld [smem:[#allocation13_spill]] }
 0x1cc   : > { %s2519_s2 = sld [smem:[#allocation14_spill]] }
 0x1cd   : > { %s2521_s1 = smov %s2514_s16  ;;  %37 = sbr.rel (!%p35_p2) target bundleno = 14 (0xe), region = 92 }
 0x1d1   : > { %s2522_s16 = smov %s2518_s22 }
 0x1d2   :  { %1340 = vsyncpa [#allocation7], 1 }
 0x1d3   :  { %1342 = vsyncpa [#allocation7 + $0x1], 1 }

</bundles_post_ra>
